<compile_context>
chip_gen: v5e
topology: v5e:2x2
jax: 0.10.0
libtpu: 0.0.40
codegen_flags: <defaults>
</compile_context>

<pallas_src>
import jax
import jax.numpy as jnp
from jax import lax
from jax.experimental import pallas as pl
from jax.experimental.pallas import tpu as pltpu

# ----------------------------- config ---------------------------------------
SRC_LEN = 8
TRG_LEN = 8
BATCH = 2
EMB = 16
HID = 32
SRC_VOCAB = 20
TRG_VOCAB = 20
VOCAB_PAD = 128  # lane-dense padded target vocab

_VMEM = pl.BlockSpec(memory_space=pltpu.MemorySpace.VMEM)


# ----------------------------- Pallas kernels -------------------------------
def _encoder_kernel(emb_ref, wihcat_ref, bcat_ref, whhstack_ref,
                    fchw_ref, fchb_ref, fccw_ref, fccb_ref,
                    hid_ref, cell_ref, proj_ref):
    """Fused bidirectional LSTM encoder + state projections.

    emb_ref:      [S*B, E]      time-major flattened source embeddings
    wihcat_ref:   [E, 8H]       [W_ih_fwd | W_ih_bwd]
    bcat_ref:     [1, 8H]       [b_fwd | b_bwd] (combined i/f/g/o biases)
    whhstack_ref: [2H, 4H]      [W_hh_fwd ; W_hh_bwd] (block-diagonal use)
    proj_ref:     [S*B, 8H]     VMEM scratch for the hoisted input projection
    outputs:      hid_ref/cell_ref [B, H]
    """
    B, H = hid_ref.shape
    SB = emb_ref.shape[0]
    S = SB // B
    H2, H4 = 2 * H, 4 * H

    # Hoisted input projection: one matmul for the whole sequence, both dirs.
    proj_ref[...] = (jnp.dot(emb_ref[...], wihcat_ref[...],
                             preferred_element_type=jnp.float32)
                     + bcat_ref[...])

    whh = whhstack_ref[...]  # [2H, 4H]

    # Block-diagonal packing of the recurrent state:
    #   rows [0,B)  -> forward direction, lanes [0,H)
    #   rows [B,2B) -> backward direction, lanes [H,2H)
    row = lax.broadcasted_iota(jnp.int32, (2 * B, H2), 0)
    col = lax.broadcasted_iota(jnp.int32, (2 * B, H2), 1)
    dir_mask = jnp.where((row < B) == (col < H), 1.0, 0.0).astype(jnp.float32)

    # Whole-vreg activation mask: tanh on the g-gate region, sigmoid elsewhere.
    lane = lax.broadcasted_iota(jnp.int32, (2 * B, H4), 1)
    g_zone = (lane >= 2 * H) & (lane < 3 * H)

    h_blk = jnp.zeros((2 * B, H2), jnp.float32)
    c = jnp.zeros((2 * B, H), jnp.float32)
    for t in range(S):  # fully unrolled; fwd and bwd advance together
        xf = proj_ref[t * B:(t + 1) * B, 0:H4]                    # fwd @ time t
        xb = proj_ref[(S - 1 - t) * B:(S - t) * B, H4:2 * H4]     # bwd @ time S-1-t
        x_both = jnp.concatenate([xf, xb], axis=0)                # [2B, 4H]
        gates = jnp.dot(h_blk, whh,
                        preferred_element_type=jnp.float32) + x_both
        acts = jnp.where(g_zone, jnp.tanh(gates), jax.nn.sigmoid(gates))
        i, f = acts[:, 0:H], acts[:, H:2 * H]
        g, o = acts[:, 2 * H:3 * H], acts[:, 3 * H:4 * H]
        c = f * c + i * g
        h_new = o * jnp.tanh(c)                                   # [2B, H]
        h_blk = jnp.concatenate([h_new, h_new], axis=1) * dir_mask

    # Final states: fwd after t=S-1, bwd after processing token 0.
    h_cat = jnp.concatenate([h_blk[0:B, 0:H], h_blk[B:2 * B, H:H2]], axis=1)
    c_cat = jnp.concatenate([c[0:B, :], c[B:2 * B, :]], axis=1)
    hid_ref[...] = jnp.tanh(
        jnp.dot(h_cat, fchw_ref[...], preferred_element_type=jnp.float32)
        + fchb_ref[...])
    cell_ref[...] = jnp.tanh(
        jnp.dot(c_cat, fccw_ref[...], preferred_element_type=jnp.float32)
        + fccb_ref[...])


def _decoder_kernel(h0_ref, c0_ref, embtbl_ref, wih_ref, whh_ref, b_ref,
                    wfc_ref, bfc_ref, out_ref):
    """Fused greedy decoder loop (LSTM + output Linear + argmax + embedding feedback).

    h0/c0:   [B, H]        encoder-projected initial states
    embtbl:  [Vp, E]       padded decoder embedding table
    wih:     [E, 4H]       input->gates
    whh:     [H, 4H]       hidden->gates
    b:       [B, 4H]       pre-broadcast combined bias
    wfc:     [H, Vp]       output projection (padded lanes = 0)
    bfc:     [B, Vp]       pre-broadcast output bias (padded lanes = -1e30)
    out_ref: [T*B, Vp]     lane-dense logits slab
    """
    B, H = h0_ref.shape
    Vp = wfc_ref.shape[1]
    T = out_ref.shape[0] // B

    # Fold the embedding table through the input projection once:
    #   (onehot @ emb) @ W_ih == onehot @ (emb @ W_ih)   (exact: onehot is 0/1)
    emb_proj = jnp.dot(embtbl_ref[...], wih_ref[...],
                       preferred_element_type=jnp.float32)   # [Vp, 4H]
    whh = whh_ref[...]
    wfc = wfc_ref[...]
    b = b_ref[...]
    bfc = bfc_ref[...]

    lane4 = lax.broadcasted_iota(jnp.int32, (B, 4 * H), 1)
    g_zone = (lane4 >= 2 * H) & (lane4 < 3 * H)
    vlane = lax.broadcasted_iota(jnp.int32, (B, Vp), 1)

    onehot = (vlane == 0).astype(jnp.float32)  # initial input = token id 0
    h = h0_ref[...]
    c = c0_ref[...]
    for t in range(T):  # fully unrolled greedy decode, all state in VMEM/vregs
        gates = (jnp.dot(onehot, emb_proj, preferred_element_type=jnp.float32)
                 + jnp.dot(h, whh, preferred_element_type=jnp.float32) + b)
        acts = jnp.where(g_zone, jnp.tanh(gates), jax.nn.sigmoid(gates))
        i, f = acts[:, 0:H], acts[:, H:2 * H]
        g, o = acts[:, 2 * H:3 * H], acts[:, 3 * H:4 * H]
        c = f * c + i * g
        h = o * jnp.tanh(c)
        logits = jnp.dot(h, wfc, preferred_element_type=jnp.float32) + bfc
        out_ref[t * B:(t + 1) * B, :] = logits
        # greedy top-1 feedback (first-index tie-break) as a one-hot row select
        m = jnp.max(logits, axis=1, keepdims=True)
        top1 = jnp.min(jnp.where(logits >= m, vlane, Vp), axis=1, keepdims=True)
        onehot = (vlane == top1).astype(jnp.float32)


# ----------------------------- parameters -----------------------------------
def init_params(key):
    def nrm(k, shape, scale=0.1):
        return scale * jax.random.normal(k, shape, dtype=jnp.float32)

    keys = jax.random.split(key, 16)
    p = {
        # encoder
        "enc_emb": nrm(keys[0], (SRC_VOCAB, EMB)),
        "enc_wih_f": nrm(keys[1], (EMB, 4 * HID)),
        "enc_whh_f": nrm(keys[2], (HID, 4 * HID)),
        "enc_b_f": nrm(keys[3], (1, 4 * HID)),
        "enc_wih_b": nrm(keys[4], (EMB, 4 * HID)),
        "enc_whh_b": nrm(keys[5], (HID, 4 * HID)),
        "enc_b_b": nrm(keys[6], (1, 4 * HID)),
        "enc_fc_h_w": nrm(keys[7], (2 * HID, HID)),
        "enc_fc_h_b": nrm(keys[8], (1, HID)),
        "enc_fc_c_w": nrm(keys[9], (2 * HID, HID)),
        "enc_fc_c_b": nrm(keys[10], (1, HID)),
        # decoder
        "dec_emb": nrm(keys[11], (TRG_VOCAB, EMB)),
        "dec_wih": nrm(keys[12], (EMB, 4 * HID)),
        "dec_whh": nrm(keys[13], (HID, 4 * HID)),
        "dec_b": nrm(keys[14], (1, 4 * HID)),
        "dec_fc_w": nrm(keys[15], (HID, TRG_VOCAB)),
        "dec_fc_b": jnp.zeros((1, TRG_VOCAB), jnp.float32),
    }
    return p


# ----------------------------- model ----------------------------------------
def seq2seq_forward(src, trg, p, teacher_forcing_ratio=0.0):
    """Mirrors Seq2Seq.forward. src/trg: [T, B] int32. Returns [trg_len, B, V]."""
    S, B = src.shape
    T = trg.shape[0]
    H, E, V, Vp = HID, EMB, TRG_VOCAB, VOCAB_PAD

    # ---------------- encoder: one fused Pallas kernel ----------------------
    emb_flat = jnp.take(p["enc_emb"], src.reshape(-1), axis=0)            # [S*B, E]
    wih_cat = jnp.concatenate([p["enc_wih_f"], p["enc_wih_b"]], axis=1)   # [E, 8H]
    b_cat = jnp.concatenate([p["enc_b_f"], p["enc_b_b"]], axis=1)         # [1, 8H]
    whh_stack = jnp.concatenate([p["enc_whh_f"], p["enc_whh_b"]], axis=0)  # [2H, 4H]

    hidden, cell = pl.pallas_call(
        _encoder_kernel,
        out_shape=(jax.ShapeDtypeStruct((B, H), jnp.float32),
                   jax.ShapeDtypeStruct((B, H), jnp.float32)),
        in_specs=[_VMEM] * 8,
        out_specs=(_VMEM, _VMEM),
        scratch_shapes=[pltpu.VMEM((S * B, 8 * H), jnp.float32)],
    )(emb_flat, wih_cat, b_cat, whh_stack,
      p["enc_fc_h_w"], p["enc_fc_h_b"], p["enc_fc_c_w"], p["enc_fc_c_b"])

    # ---------------- decoder: one fused Pallas kernel ----------------------
    emb_p = jnp.zeros((Vp, E), jnp.float32).at[:V, :].set(p["dec_emb"])
    wfc_p = jnp.zeros((H, Vp), jnp.float32).at[:, :V].set(p["dec_fc_w"])
    bfc_p = jnp.full((1, Vp), -1e30, jnp.float32).at[:, :V].set(p["dec_fc_b"])
    b_dec = jnp.broadcast_to(p["dec_b"], (B, 4 * H))          # pre-broadcast bias
    bfc_b = jnp.broadcast_to(bfc_p, (B, Vp))

    out_flat = pl.pallas_call(
        _decoder_kernel,
        out_shape=jax.ShapeDtypeStruct((T * B, Vp), jnp.float32),
        in_specs=[_VMEM] * 8,
        out_specs=_VMEM,
    )(hidden, cell, emb_p, p["dec_wih"], p["dec_whh"], b_dec, wfc_p, bfc_b)

    # teacher_forcing_ratio = 0.0 -> greedy feedback handled inside the kernel.
    return out_flat.reshape(T, B, Vp)[:, :, :V]


# ----------------------------- main ------------------------------------------
if __name__ == "__main__":
    key = jax.random.PRNGKey(0)
    k_param, k_src, k_trg = jax.random.split(key, 3)

    params = init_params(k_param)
    src = jax.random.randint(k_src, (SRC_LEN, BATCH), 0, SRC_VOCAB, dtype=jnp.int32)
    trg = jax.random.randint(k_trg, (TRG_LEN, BATCH), 0, TRG_VOCAB, dtype=jnp.int32)

    fwd = jax.jit(seq2seq_forward)
    outputs = jax.block_until_ready(fwd(src, trg, params))

    assert outputs.shape == (TRG_LEN, BATCH, TRG_VOCAB)
    assert outputs.dtype == jnp.float32
    assert bool(jnp.all(jnp.isfinite(outputs)))
    print("KERNEL_OK")
</pallas_src>

<mosaic_0001>
module attributes {stable_mosaic.version = 11 : i64} {
  func.func @_encoder_kernel(%arg0: memref<16x16xf32, #tpu.memory_space<vmem>>, %arg1: memref<16x256xf32, #tpu.memory_space<vmem>>, %arg2: memref<1x256xf32, #tpu.memory_space<vmem>>, %arg3: memref<64x128xf32, #tpu.memory_space<vmem>>, %arg4: memref<64x32xf32, #tpu.memory_space<vmem>>, %arg5: memref<1x32xf32, #tpu.memory_space<vmem>>, %arg6: memref<64x32xf32, #tpu.memory_space<vmem>>, %arg7: memref<1x32xf32, #tpu.memory_space<vmem>>, %arg8: memref<2x32xf32, #tpu.memory_space<vmem>>, %arg9: memref<2x32xf32, #tpu.memory_space<vmem>>, %arg10: memref<16x256xf32, #tpu.memory_space<vmem>>) attributes {dimension_semantics = [], scalar_prefetch = 0 : i64, scratch_operands = 1 : i64, tpu.core_type = #tpu.core_type<tc>} {
    %c0 = arith.constant 0 : index
    %c0_0 = arith.constant 0 : index
    %0 = vector.load %arg0[%c0, %c0_0] : memref<16x16xf32, #tpu.memory_space<vmem>>, vector<16x16xf32>
    %c0_1 = arith.constant 0 : index
    %c0_2 = arith.constant 0 : index
    %1 = vector.load %arg1[%c0_1, %c0_2] : memref<16x256xf32, #tpu.memory_space<vmem>>, vector<16x256xf32>
    %cst = arith.constant dense<0.000000e+00> : vector<16x256xf32>
    %2 = tpu.matmul %0, %1, %cst {dimension_numbers = #tpu.dot_dimension_numbers<[1], [0], [0], [1], [0, 0, 1, 1], [], []>} : vector<16x16xf32>, vector<16x256xf32>, vector<16x256xf32> -> vector<16x256xf32>
    %c0_3 = arith.constant 0 : index
    %c0_4 = arith.constant 0 : index
    %3 = vector.load %arg2[%c0_3, %c0_4] : memref<1x256xf32, #tpu.memory_space<vmem>>, vector<1x256xf32>
    %4 = vector.broadcast %3 : vector<1x256xf32> to vector<16x256xf32>
    %5 = arith.addf %2, %4 : vector<16x256xf32>
    %c0_5 = arith.constant 0 : index
    %c0_6 = arith.constant 0 : index
    %6 = vector.load %arg10[%c0_5, %c0_6] : memref<16x256xf32, #tpu.memory_space<vmem>>, vector<16x256xf32>
    tpu.vector_store %arg10[%c0_5, %c0_6], %5 {strides = array<i32>} : memref<16x256xf32, #tpu.memory_space<vmem>>, vector<16x256xf32>,
    %c0_7 = arith.constant 0 : index
    %c0_8 = arith.constant 0 : index
    %7 = vector.load %arg3[%c0_7, %c0_8] : memref<64x128xf32, #tpu.memory_space<vmem>>, vector<64x128xf32>
    %8 = tpu.iota {dimensions = array<i32: 0>} : vector<4x64xi32>
    %9 = tpu.iota {dimensions = array<i32: 1>} : vector<4x64xi32>
    %c2_i32 = arith.constant 2 : i32
    %10 = vector.broadcast %c2_i32 : i32 to vector<4x64xi32>
    %11 = arith.cmpi slt, %8, %10 : vector<4x64xi32>
    %c32_i32 = arith.constant 32 : i32
    %12 = vector.broadcast %c32_i32 : i32 to vector<4x64xi32>
    %13 = arith.cmpi slt, %9, %12 : vector<4x64xi32>
    %14 = arith.xori %11, %13 : vector<4x64xi1>
    %cst_9 = arith.constant dense<true> : vector<4x64xi1>
    %15 = arith.xori %14, %cst_9 : vector<4x64xi1>
    %cst_10 = arith.constant 1.000000e+00 : f32
    %cst_11 = arith.constant 0.000000e+00 : f32
    %16 = vector.broadcast %cst_10 : f32 to vector<4x64xf32>
    %17 = vector.broadcast %cst_11 : f32 to vector<4x64xf32>
    %18 = arith.select %15, %16, %17 : vector<4x64xi1>, vector<4x64xf32>
    %19 = tpu.iota {dimensions = array<i32: 1>} : vector<4x128xi32>
    %c64_i32 = arith.constant 64 : i32
    %20 = vector.broadcast %c64_i32 : i32 to vector<4x128xi32>
    %21 = arith.cmpi sge, %19, %20 : vector<4x128xi32>
    %c96_i32 = arith.constant 96 : i32
    %22 = vector.broadcast %c96_i32 : i32 to vector<4x128xi32>
    %23 = arith.cmpi slt, %19, %22 : vector<4x128xi32>
    %24 = arith.andi %21, %23 : vector<4x128xi1>
    %cst_12 = arith.constant 0.000000e+00 : f32
    %25 = vector.broadcast %cst_12 : f32 to vector<4x64xf32>
    %cst_13 = arith.constant 0.000000e+00 : f32
    %26 = vector.broadcast %cst_13 : f32 to vector<4x32xf32>
    %c0_14 = arith.constant 0 : index
    %c0_15 = arith.constant 0 : index
    %27 = vector.load %arg10[%c0_14, %c0_15] : memref<16x256xf32, #tpu.memory_space<vmem>>, vector<2x128xf32>
    %c14 = arith.constant 14 : index
    %c128 = arith.constant 128 : index
    %28 = vector.load %arg10[%c14, %c128] : memref<16x256xf32, #tpu.memory_space<vmem>>, vector<2x128xf32>
    %29 = tpu.concatenate %27, %28 in 0 : vector<2x128xf32>, vector<2x128xf32> -> vector<4x128xf32>
    %cst_16 = arith.constant dense<0.000000e+00> : vector<4x128xf32>
    %30 = tpu.matmul %25, %7, %cst_16 {dimension_numbers = #tpu.dot_dimension_numbers<[1], [0], [0], [1], [0, 0, 1, 1], [], []>} : vector<4x64xf32>, vector<64x128xf32>, vector<4x128xf32> -> vector<4x128xf32>
    %31 = arith.addf %30, %29 : vector<4x128xf32>
    %32 = math.tanh %31 : vector<4x128xf32>
    %33 = arith.negf %31 : vector<4x128xf32>
    %34 = math.exp %33 : vector<4x128xf32>
    %cst_17 = arith.constant 1.000000e+00 : f32
    %35 = vector.broadcast %cst_17 : f32 to vector<4x128xf32>
    %36 = arith.addf %35, %34 : vector<4x128xf32>
    %37 = arith.divf %35, %36 : vector<4x128xf32>
    %38 = arith.select %24, %32, %37 : vector<4x128xi1>, vector<4x128xf32>
    %39 = vector.extract_strided_slice %38 {offsets = [0, 0], sizes = [4, 32], strides = [1, 1]} : vector<4x128xf32> to vector<4x32xf32>
    %40 = vector.extract_strided_slice %38 {offsets = [0, 32], sizes = [4, 32], strides = [1, 1]} : vector<4x128xf32> to vector<4x32xf32>
    %41 = vector.extract_strided_slice %38 {offsets = [0, 64], sizes = [4, 32], strides = [1, 1]} : vector<4x128xf32> to vector<4x32xf32>
    %42 = vector.extract_strided_slice %38 {offsets = [0, 96], sizes = [4, 32], strides = [1, 1]} : vector<4x128xf32> to vector<4x32xf32>
    %43 = arith.mulf %40, %26 : vector<4x32xf32>
    %44 = arith.mulf %39, %41 : vector<4x32xf32>
    %45 = arith.addf %43, %44 : vector<4x32xf32>
    %46 = math.tanh %45 : vector<4x32xf32>
    %47 = arith.mulf %42, %46 : vector<4x32xf32>
    %48 = tpu.concatenate %47, %47 in 1 : vector<4x32xf32>, vector<4x32xf32> -> vector<4x64xf32>
    %49 = arith.mulf %48, %18 : vector<4x64xf32>
    %c2 = arith.constant 2 : index
    %c0_18 = arith.constant 0 : index
    %50 = vector.load %arg10[%c2, %c0_18] : memref<16x256xf32, #tpu.memory_space<vmem>>, vector<2x128xf32>
    %c12 = arith.constant 12 : index
    %c128_19 = arith.constant 128 : index
    %51 = vector.load %arg10[%c12, %c128_19] : memref<16x256xf32, #tpu.memory_space<vmem>>, vector<2x128xf32>
    %52 = tpu.concatenate %50, %51 in 0 : vector<2x128xf32>, vector<2x128xf32> -> vector<4x128xf32>
    %cst_20 = arith.constant dense<0.000000e+00> : vector<4x128xf32>
    %53 = tpu.matmul %49, %7, %cst_20 {dimension_numbers = #tpu.dot_dimension_numbers<[1], [0], [0], [1], [0, 0, 1, 1], [], []>} : vector<4x64xf32>, vector<64x128xf32>, vector<4x128xf32> -> vector<4x128xf32>
    %54 = arith.addf %53, %52 : vector<4x128xf32>
    %55 = math.tanh %54 : vector<4x128xf32>
    %56 = arith.negf %54 : vector<4x128xf32>
    %57 = math.exp %56 : vector<4x128xf32>
    %cst_21 = arith.constant 1.000000e+00 : f32
    %58 = vector.broadcast %cst_21 : f32 to vector<4x128xf32>
    %59 = arith.addf %58, %57 : vector<4x128xf32>
    %60 = arith.divf %58, %59 : vector<4x128xf32>
    %61 = arith.select %24, %55, %60 : vector<4x128xi1>, vector<4x128xf32>
    %62 = vector.extract_strided_slice %61 {offsets = [0, 0], sizes = [4, 32], strides = [1, 1]} : vector<4x128xf32> to vector<4x32xf32>
    %63 = vector.extract_strided_slice %61 {offsets = [0, 32], sizes = [4, 32], strides = [1, 1]} : vector<4x128xf32> to vector<4x32xf32>
    %64 = vector.extract_strided_slice %61 {offsets = [0, 64], sizes = [4, 32], strides = [1, 1]} : vector<4x128xf32> to vector<4x32xf32>
    %65 = vector.extract_strided_slice %61 {offsets = [0, 96], sizes = [4, 32], strides = [1, 1]} : vector<4x128xf32> to vector<4x32xf32>
    %66 = arith.mulf %63, %45 : vector<4x32xf32>
    %67 = arith.mulf %62, %64 : vector<4x32xf32>
    %68 = arith.addf %66, %67 : vector<4x32xf32>
    %69 = math.tanh %68 : vector<4x32xf32>
    %70 = arith.mulf %65, %69 : vector<4x32xf32>
    %71 = tpu.concatenate %70, %70 in 1 : vector<4x32xf32>, vector<4x32xf32> -> vector<4x64xf32>
    %72 = arith.mulf %71, %18 : vector<4x64xf32>
    %c4 = arith.constant 4 : index
    %c0_22 = arith.constant 0 : index
    %73 = vector.load %arg10[%c4, %c0_22] : memref<16x256xf32, #tpu.memory_space<vmem>>, vector<2x128xf32>
    %c10 = arith.constant 10 : index
    %c128_23 = arith.constant 128 : index
    %74 = vector.load %arg10[%c10, %c128_23] : memref<16x256xf32, #tpu.memory_space<vmem>>, vector<2x128xf32>
    %75 = tpu.concatenate %73, %74 in 0 : vector<2x128xf32>, vector<2x128xf32> -> vector<4x128xf32>
    %cst_24 = arith.constant dense<0.000000e+00> : vector<4x128xf32>
    %76 = tpu.matmul %72, %7, %cst_24 {dimension_numbers = #tpu.dot_dimension_numbers<[1], [0], [0], [1], [0, 0, 1, 1], [], []>} : vector<4x64xf32>, vector<64x128xf32>, vector<4x128xf32> -> vector<4x128xf32>
    %77 = arith.addf %76, %75 : vector<4x128xf32>
    %78 = math.tanh %77 : vector<4x128xf32>
    %79 = arith.negf %77 : vector<4x128xf32>
    %80 = math.exp %79 : vector<4x128xf32>
    %cst_25 = arith.constant 1.000000e+00 : f32
    %81 = vector.broadcast %cst_25 : f32 to vector<4x128xf32>
    %82 = arith.addf %81, %80 : vector<4x128xf32>
    %83 = arith.divf %81, %82 : vector<4x128xf32>
    %84 = arith.select %24, %78, %83 : vector<4x128xi1>, vector<4x128xf32>
    %85 = vector.extract_strided_slice %84 {offsets = [0, 0], sizes = [4, 32], strides = [1, 1]} : vector<4x128xf32> to vector<4x32xf32>
    %86 = vector.extract_strided_slice %84 {offsets = [0, 32], sizes = [4, 32], strides = [1, 1]} : vector<4x128xf32> to vector<4x32xf32>
    %87 = vector.extract_strided_slice %84 {offsets = [0, 64], sizes = [4, 32], strides = [1, 1]} : vector<4x128xf32> to vector<4x32xf32>
    %88 = vector.extract_strided_slice %84 {offsets = [0, 96], sizes = [4, 32], strides = [1, 1]} : vector<4x128xf32> to vector<4x32xf32>
    %89 = arith.mulf %86, %68 : vector<4x32xf32>
    %90 = arith.mulf %85, %87 : vector<4x32xf32>
    %91 = arith.addf %89, %90 : vector<4x32xf32>
    %92 = math.tanh %91 : vector<4x32xf32>
    %93 = arith.mulf %88, %92 : vector<4x32xf32>
    %94 = tpu.concatenate %93, %93 in 1 : vector<4x32xf32>, vector<4x32xf32> -> vector<4x64xf32>
    %95 = arith.mulf %94, %18 : vector<4x64xf32>
    %c6 = arith.constant 6 : index
    %c0_26 = arith.constant 0 : index
    %96 = vector.load %arg10[%c6, %c0_26] : memref<16x256xf32, #tpu.memory_space<vmem>>, vector<2x128xf32>
    %c8 = arith.constant 8 : index
    %c128_27 = arith.constant 128 : index
    %97 = vector.load %arg10[%c8, %c128_27] : memref<16x256xf32, #tpu.memory_space<vmem>>, vector<2x128xf32>
    %98 = tpu.concatenate %96, %97 in 0 : vector<2x128xf32>, vector<2x128xf32> -> vector<4x128xf32>
    %cst_28 = arith.constant dense<0.000000e+00> : vector<4x128xf32>
    %99 = tpu.matmul %95, %7, %cst_28 {dimension_numbers = #tpu.dot_dimension_numbers<[1], [0], [0], [1], [0, 0, 1, 1], [], []>} : vector<4x64xf32>, vector<64x128xf32>, vector<4x128xf32> -> vector<4x128xf32>
    %100 = arith.addf %99, %98 : vector<4x128xf32>
    %101 = math.tanh %100 : vector<4x128xf32>
    %102 = arith.negf %100 : vector<4x128xf32>
    %103 = math.exp %102 : vector<4x128xf32>
    %cst_29 = arith.constant 1.000000e+00 : f32
    %104 = vector.broadcast %cst_29 : f32 to vector<4x128xf32>
    %105 = arith.addf %104, %103 : vector<4x128xf32>
    %106 = arith.divf %104, %105 : vector<4x128xf32>
    %107 = arith.select %24, %101, %106 : vector<4x128xi1>, vector<4x128xf32>
    %108 = vector.extract_strided_slice %107 {offsets = [0, 0], sizes = [4, 32], strides = [1, 1]} : vector<4x128xf32> to vector<4x32xf32>
    %109 = vector.extract_strided_slice %107 {offsets = [0, 32], sizes = [4, 32], strides = [1, 1]} : vector<4x128xf32> to vector<4x32xf32>
    %110 = vector.extract_strided_slice %107 {offsets = [0, 64], sizes = [4, 32], strides = [1, 1]} : vector<4x128xf32> to vector<4x32xf32>
    %111 = vector.extract_strided_slice %107 {offsets = [0, 96], sizes = [4, 32], strides = [1, 1]} : vector<4x128xf32> to vector<4x32xf32>
    %112 = arith.mulf %109, %91 : vector<4x32xf32>
    %113 = arith.mulf %108, %110 : vector<4x32xf32>
    %114 = arith.addf %112, %113 : vector<4x32xf32>
    %115 = math.tanh %114 : vector<4x32xf32>
    %116 = arith.mulf %111, %115 : vector<4x32xf32>
    %117 = tpu.concatenate %116, %116 in 1 : vector<4x32xf32>, vector<4x32xf32> -> vector<4x64xf32>
    %118 = arith.mulf %117, %18 : vector<4x64xf32>
    %c8_30 = arith.constant 8 : index
    %c0_31 = arith.constant 0 : index
    %119 = vector.load %arg10[%c8_30, %c0_31] : memref<16x256xf32, #tpu.memory_space<vmem>>, vector<2x128xf32>
    %c6_32 = arith.constant 6 : index
    %c128_33 = arith.constant 128 : index
    %120 = vector.load %arg10[%c6_32, %c128_33] : memref<16x256xf32, #tpu.memory_space<vmem>>, vector<2x128xf32>
    %121 = tpu.concatenate %119, %120 in 0 : vector<2x128xf32>, vector<2x128xf32> -> vector<4x128xf32>
    %cst_34 = arith.constant dense<0.000000e+00> : vector<4x128xf32>
    %122 = tpu.matmul %118, %7, %cst_34 {dimension_numbers = #tpu.dot_dimension_numbers<[1], [0], [0], [1], [0, 0, 1, 1], [], []>} : vector<4x64xf32>, vector<64x128xf32>, vector<4x128xf32> -> vector<4x128xf32>
    %123 = arith.addf %122, %121 : vector<4x128xf32>
    %124 = math.tanh %123 : vector<4x128xf32>
    %125 = arith.negf %123 : vector<4x128xf32>
    %126 = math.exp %125 : vector<4x128xf32>
    %cst_35 = arith.constant 1.000000e+00 : f32
    %127 = vector.broadcast %cst_35 : f32 to vector<4x128xf32>
    %128 = arith.addf %127, %126 : vector<4x128xf32>
    %129 = arith.divf %127, %128 : vector<4x128xf32>
    %130 = arith.select %24, %124, %129 : vector<4x128xi1>, vector<4x128xf32>
    %131 = vector.extract_strided_slice %130 {offsets = [0, 0], sizes = [4, 32], strides = [1, 1]} : vector<4x128xf32> to vector<4x32xf32>
    %132 = vector.extract_strided_slice %130 {offsets = [0, 32], sizes = [4, 32], strides = [1, 1]} : vector<4x128xf32> to vector<4x32xf32>
    %133 = vector.extract_strided_slice %130 {offsets = [0, 64], sizes = [4, 32], strides = [1, 1]} : vector<4x128xf32> to vector<4x32xf32>
    %134 = vector.extract_strided_slice %130 {offsets = [0, 96], sizes = [4, 32], strides = [1, 1]} : vector<4x128xf32> to vector<4x32xf32>
    %135 = arith.mulf %132, %114 : vector<4x32xf32>
    %136 = arith.mulf %131, %133 : vector<4x32xf32>
    %137 = arith.addf %135, %136 : vector<4x32xf32>
    %138 = math.tanh %137 : vector<4x32xf32>
    %139 = arith.mulf %134, %138 : vector<4x32xf32>
    %140 = tpu.concatenate %139, %139 in 1 : vector<4x32xf32>, vector<4x32xf32> -> vector<4x64xf32>
    %141 = arith.mulf %140, %18 : vector<4x64xf32>
    %c10_36 = arith.constant 10 : index
    %c0_37 = arith.constant 0 : index
    %142 = vector.load %arg10[%c10_36, %c0_37] : memref<16x256xf32, #tpu.memory_space<vmem>>, vector<2x128xf32>
    %c4_38 = arith.constant 4 : index
    %c128_39 = arith.constant 128 : index
    %143 = vector.load %arg10[%c4_38, %c128_39] : memref<16x256xf32, #tpu.memory_space<vmem>>, vector<2x128xf32>
    %144 = tpu.concatenate %142, %143 in 0 : vector<2x128xf32>, vector<2x128xf32> -> vector<4x128xf32>
    %cst_40 = arith.constant dense<0.000000e+00> : vector<4x128xf32>
    %145 = tpu.matmul %141, %7, %cst_40 {dimension_numbers = #tpu.dot_dimension_numbers<[1], [0], [0], [1], [0, 0, 1, 1], [], []>} : vector<4x64xf32>, vector<64x128xf32>, vector<4x128xf32> -> vector<4x128xf32>
    %146 = arith.addf %145, %144 : vector<4x128xf32>
    %147 = math.tanh %146 : vector<4x128xf32>
    %148 = arith.negf %146 : vector<4x128xf32>
    %149 = math.exp %148 : vector<4x128xf32>
    %cst_41 = arith.constant 1.000000e+00 : f32
    %150 = vector.broadcast %cst_41 : f32 to vector<4x128xf32>
    %151 = arith.addf %150, %149 : vector<4x128xf32>
    %152 = arith.divf %150, %151 : vector<4x128xf32>
    %153 = arith.select %24, %147, %152 : vector<4x128xi1>, vector<4x128xf32>
    %154 = vector.extract_strided_slice %153 {offsets = [0, 0], sizes = [4, 32], strides = [1, 1]} : vector<4x128xf32> to vector<4x32xf32>
    %155 = vector.extract_strided_slice %153 {offsets = [0, 32], sizes = [4, 32], strides = [1, 1]} : vector<4x128xf32> to vector<4x32xf32>
    %156 = vector.extract_strided_slice %153 {offsets = [0, 64], sizes = [4, 32], strides = [1, 1]} : vector<4x128xf32> to vector<4x32xf32>
    %157 = vector.extract_strided_slice %153 {offsets = [0, 96], sizes = [4, 32], strides = [1, 1]} : vector<4x128xf32> to vector<4x32xf32>
    %158 = arith.mulf %155, %137 : vector<4x32xf32>
    %159 = arith.mulf %154, %156 : vector<4x32xf32>
    %160 = arith.addf %158, %159 : vector<4x32xf32>
    %161 = math.tanh %160 : vector<4x32xf32>
    %162 = arith.mulf %157, %161 : vector<4x32xf32>
    %163 = tpu.concatenate %162, %162 in 1 : vector<4x32xf32>, vector<4x32xf32> -> vector<4x64xf32>
    %164 = arith.mulf %163, %18 : vector<4x64xf32>
    %c12_42 = arith.constant 12 : index
    %c0_43 = arith.constant 0 : index
    %165 = vector.load %arg10[%c12_42, %c0_43] : memref<16x256xf32, #tpu.memory_space<vmem>>, vector<2x128xf32>
    %c2_44 = arith.constant 2 : index
    %c128_45 = arith.constant 128 : index
    %166 = vector.load %arg10[%c2_44, %c128_45] : memref<16x256xf32, #tpu.memory_space<vmem>>, vector<2x128xf32>
    %167 = tpu.concatenate %165, %166 in 0 : vector<2x128xf32>, vector<2x128xf32> -> vector<4x128xf32>
    %cst_46 = arith.constant dense<0.000000e+00> : vector<4x128xf32>
    %168 = tpu.matmul %164, %7, %cst_46 {dimension_numbers = #tpu.dot_dimension_numbers<[1], [0], [0], [1], [0, 0, 1, 1], [], []>} : vector<4x64xf32>, vector<64x128xf32>, vector<4x128xf32> -> vector<4x128xf32>
    %169 = arith.addf %168, %167 : vector<4x128xf32>
    %170 = math.tanh %169 : vector<4x128xf32>
    %171 = arith.negf %169 : vector<4x128xf32>
    %172 = math.exp %171 : vector<4x128xf32>
    %cst_47 = arith.constant 1.000000e+00 : f32
    %173 = vector.broadcast %cst_47 : f32 to vector<4x128xf32>
    %174 = arith.addf %173, %172 : vector<4x128xf32>
    %175 = arith.divf %173, %174 : vector<4x128xf32>
    %176 = arith.select %24, %170, %175 : vector<4x128xi1>, vector<4x128xf32>
    %177 = vector.extract_strided_slice %176 {offsets = [0, 0], sizes = [4, 32], strides = [1, 1]} : vector<4x128xf32> to vector<4x32xf32>
    %178 = vector.extract_strided_slice %176 {offsets = [0, 32], sizes = [4, 32], strides = [1, 1]} : vector<4x128xf32> to vector<4x32xf32>
    %179 = vector.extract_strided_slice %176 {offsets = [0, 64], sizes = [4, 32], strides = [1, 1]} : vector<4x128xf32> to vector<4x32xf32>
    %180 = vector.extract_strided_slice %176 {offsets = [0, 96], sizes = [4, 32], strides = [1, 1]} : vector<4x128xf32> to vector<4x32xf32>
    %181 = arith.mulf %178, %160 : vector<4x32xf32>
    %182 = arith.mulf %177, %179 : vector<4x32xf32>
    %183 = arith.addf %181, %182 : vector<4x32xf32>
    %184 = math.tanh %183 : vector<4x32xf32>
    %185 = arith.mulf %180, %184 : vector<4x32xf32>
    %186 = tpu.concatenate %185, %185 in 1 : vector<4x32xf32>, vector<4x32xf32> -> vector<4x64xf32>
    %187 = arith.mulf %186, %18 : vector<4x64xf32>
    %c14_48 = arith.constant 14 : index
    %c0_49 = arith.constant 0 : index
    %188 = vector.load %arg10[%c14_48, %c0_49] : memref<16x256xf32, #tpu.memory_space<vmem>>, vector<2x128xf32>
    %c0_50 = arith.constant 0 : index
    %c128_51 = arith.constant 128 : index
    %189 = vector.load %arg10[%c0_50, %c128_51] : memref<16x256xf32, #tpu.memory_space<vmem>>, vector<2x128xf32>
    %190 = tpu.concatenate %188, %189 in 0 : vector<2x128xf32>, vector<2x128xf32> -> vector<4x128xf32>
    %cst_52 = arith.constant dense<0.000000e+00> : vector<4x128xf32>
    %191 = tpu.matmul %187, %7, %cst_52 {dimension_numbers = #tpu.dot_dimension_numbers<[1], [0], [0], [1], [0, 0, 1, 1], [], []>} : vector<4x64xf32>, vector<64x128xf32>, vector<4x128xf32> -> vector<4x128xf32>
    %192 = arith.addf %191, %190 : vector<4x128xf32>
    %193 = math.tanh %192 : vector<4x128xf32>
    %194 = arith.negf %192 : vector<4x128xf32>
    %195 = math.exp %194 : vector<4x128xf32>
    %cst_53 = arith.constant 1.000000e+00 : f32
    %196 = vector.broadcast %cst_53 : f32 to vector<4x128xf32>
    %197 = arith.addf %196, %195 : vector<4x128xf32>
    %198 = arith.divf %196, %197 : vector<4x128xf32>
    %199 = arith.select %24, %193, %198 : vector<4x128xi1>, vector<4x128xf32>
    %200 = vector.extract_strided_slice %199 {offsets = [0, 0], sizes = [4, 32], strides = [1, 1]} : vector<4x128xf32> to vector<4x32xf32>
    %201 = vector.extract_strided_slice %199 {offsets = [0, 32], sizes = [4, 32], strides = [1, 1]} : vector<4x128xf32> to vector<4x32xf32>
    %202 = vector.extract_strided_slice %199 {offsets = [0, 64], sizes = [4, 32], strides = [1, 1]} : vector<4x128xf32> to vector<4x32xf32>
    %203 = vector.extract_strided_slice %199 {offsets = [0, 96], sizes = [4, 32], strides = [1, 1]} : vector<4x128xf32> to vector<4x32xf32>
    %204 = arith.mulf %201, %183 : vector<4x32xf32>
    %205 = arith.mulf %200, %202 : vector<4x32xf32>
    %206 = arith.addf %204, %205 : vector<4x32xf32>
    %207 = math.tanh %206 : vector<4x32xf32>
    %208 = arith.mulf %203, %207 : vector<4x32xf32>
    %209 = tpu.concatenate %208, %208 in 1 : vector<4x32xf32>, vector<4x32xf32> -> vector<4x64xf32>
    %210 = arith.mulf %209, %18 : vector<4x64xf32>
    %211 = vector.extract_strided_slice %210 {offsets = [0, 0], sizes = [2, 32], strides = [1, 1]} : vector<4x64xf32> to vector<2x32xf32>
    %212 = vector.extract_strided_slice %210 {offsets = [2, 32], sizes = [2, 32], strides = [1, 1]} : vector<4x64xf32> to vector<2x32xf32>
    %213 = tpu.concatenate %211, %212 in 1 : vector<2x32xf32>, vector<2x32xf32> -> vector<2x64xf32>
    %214 = vector.extract_strided_slice %206 {offsets = [0, 0], sizes = [2, 32], strides = [1, 1]} : vector<4x32xf32> to vector<2x32xf32>
    %215 = vector.extract_strided_slice %206 {offsets = [2, 0], sizes = [2, 32], strides = [1, 1]} : vector<4x32xf32> to vector<2x32xf32>
    %216 = tpu.concatenate %214, %215 in 1 : vector<2x32xf32>, vector<2x32xf32> -> vector<2x64xf32>
    %c0_54 = arith.constant 0 : index
    %c0_55 = arith.constant 0 : index
    %217 = vector.load %arg4[%c0_54, %c0_55] : memref<64x32xf32, #tpu.memory_space<vmem>>, vector<64x32xf32>
    %cst_56 = arith.constant dense<0.000000e+00> : vector<2x32xf32>
    %218 = tpu.matmul %213, %217, %cst_56 {dimension_numbers = #tpu.dot_dimension_numbers<[1], [0], [0], [1], [0, 0, 1, 1], [], []>} : vector<2x64xf32>, vector<64x32xf32>, vector<2x32xf32> -> vector<2x32xf32>
    %c0_57 = arith.constant 0 : index
    %c0_58 = arith.constant 0 : index
    %219 = vector.load %arg5[%c0_57, %c0_58] : memref<1x32xf32, #tpu.memory_space<vmem>>, vector<1x32xf32>
    %220 = vector.broadcast %219 : vector<1x32xf32> to vector<2x32xf32>
    %221 = arith.addf %218, %220 : vector<2x32xf32>
    %222 = math.tanh %221 : vector<2x32xf32>
    %c0_59 = arith.constant 0 : index
    %c0_60 = arith.constant 0 : index
    %223 = vector.load %arg8[%c0_59, %c0_60] : memref<2x32xf32, #tpu.memory_space<vmem>>, vector<2x32xf32>
    tpu.vector_store %arg8[%c0_59, %c0_60], %222 {strides = array<i32>} : memref<2x32xf32, #tpu.memory_space<vmem>>, vector<2x32xf32>,
    %c0_61 = arith.constant 0 : index
    %c0_62 = arith.constant 0 : index
    %224 = vector.load %arg6[%c0_61, %c0_62] : memref<64x32xf32, #tpu.memory_space<vmem>>, vector<64x32xf32>
    %cst_63 = arith.constant dense<0.000000e+00> : vector<2x32xf32>
    %225 = tpu.matmul %216, %224, %cst_63 {dimension_numbers = #tpu.dot_dimension_numbers<[1], [0], [0], [1], [0, 0, 1, 1], [], []>} : vector<2x64xf32>, vector<64x32xf32>, vector<2x32xf32> -> vector<2x32xf32>
    %c0_64 = arith.constant 0 : index
    %c0_65 = arith.constant 0 : index
    %226 = vector.load %arg7[%c0_64, %c0_65] : memref<1x32xf32, #tpu.memory_space<vmem>>, vector<1x32xf32>
    %227 = vector.broadcast %226 : vector<1x32xf32> to vector<2x32xf32>
    %228 = arith.addf %225, %227 : vector<2x32xf32>
    %229 = math.tanh %228 : vector<2x32xf32>
    %c0_66 = arith.constant 0 : index
    %c0_67 = arith.constant 0 : index
    %230 = vector.load %arg9[%c0_66, %c0_67] : memref<2x32xf32, #tpu.memory_space<vmem>>, vector<2x32xf32>
    tpu.vector_store %arg9[%c0_66, %c0_67], %229 {strides = array<i32>} : memref<2x32xf32, #tpu.memory_space<vmem>>, vector<2x32xf32>,
    return
  }
}

module attributes {stable_mosaic.version = 11 : i64} {
  func.func @_decoder_kernel(%arg0: memref<2x32xf32, #tpu.memory_space<vmem>>, %arg1: memref<2x32xf32, #tpu.memory_space<vmem>>, %arg2: memref<128x16xf32, #tpu.memory_space<vmem>>, %arg3: memref<16x128xf32, #tpu.memory_space<vmem>>, %arg4: memref<32x128xf32, #tpu.memory_space<vmem>>, %arg5: memref<2x128xf32, #tpu.memory_space<vmem>>, %arg6: memref<32x128xf32, #tpu.memory_space<vmem>>, %arg7: memref<2x128xf32, #tpu.memory_space<vmem>>, %arg8: memref<16x128xf32, #tpu.memory_space<vmem>>) attributes {dimension_semantics = [], scalar_prefetch = 0 : i64, scratch_operands = 0 : i64, tpu.core_type = #tpu.core_type<tc>} {
    %c0 = arith.constant 0 : index
    %c0_0 = arith.constant 0 : index
    %0 = vector.load %arg2[%c0, %c0_0] : memref<128x16xf32, #tpu.memory_space<vmem>>, vector<128x16xf32>
    %c0_1 = arith.constant 0 : index
    %c0_2 = arith.constant 0 : index
    %1 = vector.load %arg3[%c0_1, %c0_2] : memref<16x128xf32, #tpu.memory_space<vmem>>, vector<16x128xf32>
    %cst = arith.constant dense<0.000000e+00> : vector<128x128xf32>
    %2 = tpu.matmul %0, %1, %cst {dimension_numbers = #tpu.dot_dimension_numbers<[1], [0], [0], [1], [0, 0, 1, 1], [], []>} : vector<128x16xf32>, vector<16x128xf32>, vector<128x128xf32> -> vector<128x128xf32>
    %c0_3 = arith.constant 0 : index
    %c0_4 = arith.constant 0 : index
    %3 = vector.load %arg4[%c0_3, %c0_4] : memref<32x128xf32, #tpu.memory_space<vmem>>, vector<32x128xf32>
    %c0_5 = arith.constant 0 : index
    %c0_6 = arith.constant 0 : index
    %4 = vector.load %arg6[%c0_5, %c0_6] : memref<32x128xf32, #tpu.memory_space<vmem>>, vector<32x128xf32>
    %c0_7 = arith.constant 0 : index
    %c0_8 = arith.constant 0 : index
    %5 = vector.load %arg5[%c0_7, %c0_8] : memref<2x128xf32, #tpu.memory_space<vmem>>, vector<2x128xf32>
    %c0_9 = arith.constant 0 : index
    %c0_10 = arith.constant 0 : index
    %6 = vector.load %arg7[%c0_9, %c0_10] : memref<2x128xf32, #tpu.memory_space<vmem>>, vector<2x128xf32>
    %7 = tpu.iota {dimensions = array<i32: 1>} : vector<2x128xi32>
    %c64_i32 = arith.constant 64 : i32
    %8 = vector.broadcast %c64_i32 : i32 to vector<2x128xi32>
    %9 = arith.cmpi sge, %7, %8 : vector<2x128xi32>
    %c96_i32 = arith.constant 96 : i32
    %10 = vector.broadcast %c96_i32 : i32 to vector<2x128xi32>
    %11 = arith.cmpi slt, %7, %10 : vector<2x128xi32>
    %12 = arith.andi %9, %11 : vector<2x128xi1>
    %13 = tpu.iota {dimensions = array<i32: 1>} : vector<2x128xi32>
    %c0_i32 = arith.constant 0 : i32
    %14 = vector.broadcast %c0_i32 : i32 to vector<2x128xi32>
    %15 = arith.cmpi eq, %13, %14 : vector<2x128xi32>
    %16 = arith.extui %15 : vector<2x128xi1> to vector<2x128xi32>
    %17 = arith.sitofp %16 : vector<2x128xi32> to vector<2x128xf32>
    %c0_11 = arith.constant 0 : index
    %c0_12 = arith.constant 0 : index
    %18 = vector.load %arg0[%c0_11, %c0_12] : memref<2x32xf32, #tpu.memory_space<vmem>>, vector<2x32xf32>
    %c0_13 = arith.constant 0 : index
    %c0_14 = arith.constant 0 : index
    %19 = vector.load %arg1[%c0_13, %c0_14] : memref<2x32xf32, #tpu.memory_space<vmem>>, vector<2x32xf32>
    %cst_15 = arith.constant dense<0.000000e+00> : vector<2x128xf32>
    %20 = tpu.matmul %17, %2, %cst_15 {dimension_numbers = #tpu.dot_dimension_numbers<[1], [0], [0], [1], [0, 0, 1, 1], [], []>} : vector<2x128xf32>, vector<128x128xf32>, vector<2x128xf32> -> vector<2x128xf32>
    %cst_16 = arith.constant dense<0.000000e+00> : vector<2x128xf32>
    %21 = tpu.matmul %18, %3, %cst_16 {dimension_numbers = #tpu.dot_dimension_numbers<[1], [0], [0], [1], [0, 0, 1, 1], [], []>} : vector<2x32xf32>, vector<32x128xf32>, vector<2x128xf32> -> vector<2x128xf32>
    %22 = arith.addf %20, %21 : vector<2x128xf32>
    %23 = arith.addf %22, %5 : vector<2x128xf32>
    %24 = math.tanh %23 : vector<2x128xf32>
    %25 = arith.negf %23 : vector<2x128xf32>
    %26 = math.exp %25 : vector<2x128xf32>
    %cst_17 = arith.constant 1.000000e+00 : f32
    %27 = vector.broadcast %cst_17 : f32 to vector<2x128xf32>
    %28 = arith.addf %27, %26 : vector<2x128xf32>
    %29 = arith.divf %27, %28 : vector<2x128xf32>
    %30 = arith.select %12, %24, %29 : vector<2x128xi1>, vector<2x128xf32>
    %31 = vector.extract_strided_slice %30 {offsets = [0, 0], sizes = [2, 32], strides = [1, 1]} : vector<2x128xf32> to vector<2x32xf32>
    %32 = vector.extract_strided_slice %30 {offsets = [0, 32], sizes = [2, 32], strides = [1, 1]} : vector<2x128xf32> to vector<2x32xf32>
    %33 = vector.extract_strided_slice %30 {offsets = [0, 64], sizes = [2, 32], strides = [1, 1]} : vector<2x128xf32> to vector<2x32xf32>
    %34 = vector.extract_strided_slice %30 {offsets = [0, 96], sizes = [2, 32], strides = [1, 1]} : vector<2x128xf32> to vector<2x32xf32>
    %35 = arith.mulf %32, %19 : vector<2x32xf32>
    %36 = arith.mulf %31, %33 : vector<2x32xf32>
    %37 = arith.addf %35, %36 : vector<2x32xf32>
    %38 = math.tanh %37 : vector<2x32xf32>
    %39 = arith.mulf %34, %38 : vector<2x32xf32>
    %cst_18 = arith.constant dense<0.000000e+00> : vector<2x128xf32>
    %40 = tpu.matmul %39, %4, %cst_18 {dimension_numbers = #tpu.dot_dimension_numbers<[1], [0], [0], [1], [0, 0, 1, 1], [], []>} : vector<2x32xf32>, vector<32x128xf32>, vector<2x128xf32> -> vector<2x128xf32>
    %41 = arith.addf %40, %6 : vector<2x128xf32>
    %c0_19 = arith.constant 0 : index
    %c0_20 = arith.constant 0 : index
    %42 = vector.load %arg8[%c0_19, %c0_20] : memref<16x128xf32, #tpu.memory_space<vmem>>, vector<2x128xf32>
    tpu.vector_store %arg8[%c0_19, %c0_20], %41 {strides = array<i32>} : memref<16x128xf32, #tpu.memory_space<vmem>>, vector<2x128xf32>,
    %cst_21 = arith.constant dense<0xFF800000> : vector<2xf32>
    %43 = vector.multi_reduction <maximumf>, %41, %cst_21 [1] : vector<2x128xf32> to vector<2xf32>
    %44 = vector.shape_cast %43 : vector<2xf32> to vector<2x1xf32>
    %45 = vector.broadcast %44 : vector<2x1xf32> to vector<2x128xf32>
    %46 = arith.cmpf oge, %41, %45 : vector<2x128xf32>
    %c128_i32 = arith.constant 128 : i32
    %47 = vector.broadcast %c128_i32 : i32 to vector<2x128xi32>
    %48 = arith.select %46, %13, %47 : vector<2x128xi1>, vector<2x128xi32>
    %cst_22 = arith.constant dense<2147483647> : vector<2xi32>
    %49 = vector.multi_reduction <minsi>, %48, %cst_22 [1] : vector<2x128xi32> to vector<2xi32>
    %50 = vector.shape_cast %49 : vector<2xi32> to vector<2x1xi32>
    %51 = vector.broadcast %50 : vector<2x1xi32> to vector<2x128xi32>
    %52 = arith.cmpi eq, %13, %51 : vector<2x128xi32>
    %53 = arith.extui %52 : vector<2x128xi1> to vector<2x128xi32>
    %54 = arith.sitofp %53 : vector<2x128xi32> to vector<2x128xf32>
    %cst_23 = arith.constant dense<0.000000e+00> : vector<2x128xf32>
    %55 = tpu.matmul %54, %2, %cst_23 {dimension_numbers = #tpu.dot_dimension_numbers<[1], [0], [0], [1], [0, 0, 1, 1], [], []>} : vector<2x128xf32>, vector<128x128xf32>, vector<2x128xf32> -> vector<2x128xf32>
    %cst_24 = arith.constant dense<0.000000e+00> : vector<2x128xf32>
    %56 = tpu.matmul %39, %3, %cst_24 {dimension_numbers = #tpu.dot_dimension_numbers<[1], [0], [0], [1], [0, 0, 1, 1], [], []>} : vector<2x32xf32>, vector<32x128xf32>, vector<2x128xf32> -> vector<2x128xf32>
    %57 = arith.addf %55, %56 : vector<2x128xf32>
    %58 = arith.addf %57, %5 : vector<2x128xf32>
    %59 = math.tanh %58 : vector<2x128xf32>
    %60 = arith.negf %58 : vector<2x128xf32>
    %61 = math.exp %60 : vector<2x128xf32>
    %cst_25 = arith.constant 1.000000e+00 : f32
    %62 = vector.broadcast %cst_25 : f32 to vector<2x128xf32>
    %63 = arith.addf %62, %61 : vector<2x128xf32>
    %64 = arith.divf %62, %63 : vector<2x128xf32>
    %65 = arith.select %12, %59, %64 : vector<2x128xi1>, vector<2x128xf32>
    %66 = vector.extract_strided_slice %65 {offsets = [0, 0], sizes = [2, 32], strides = [1, 1]} : vector<2x128xf32> to vector<2x32xf32>
    %67 = vector.extract_strided_slice %65 {offsets = [0, 32], sizes = [2, 32], strides = [1, 1]} : vector<2x128xf32> to vector<2x32xf32>
    %68 = vector.extract_strided_slice %65 {offsets = [0, 64], sizes = [2, 32], strides = [1, 1]} : vector<2x128xf32> to vector<2x32xf32>
    %69 = vector.extract_strided_slice %65 {offsets = [0, 96], sizes = [2, 32], strides = [1, 1]} : vector<2x128xf32> to vector<2x32xf32>
    %70 = arith.mulf %67, %37 : vector<2x32xf32>
    %71 = arith.mulf %66, %68 : vector<2x32xf32>
    %72 = arith.addf %70, %71 : vector<2x32xf32>
    %73 = math.tanh %72 : vector<2x32xf32>
    %74 = arith.mulf %69, %73 : vector<2x32xf32>
    %cst_26 = arith.constant dense<0.000000e+00> : vector<2x128xf32>
    %75 = tpu.matmul %74, %4, %cst_26 {dimension_numbers = #tpu.dot_dimension_numbers<[1], [0], [0], [1], [0, 0, 1, 1], [], []>} : vector<2x32xf32>, vector<32x128xf32>, vector<2x128xf32> -> vector<2x128xf32>
    %76 = arith.addf %75, %6 : vector<2x128xf32>
    %c2 = arith.constant 2 : index
    %c0_27 = arith.constant 0 : index
    %77 = vector.load %arg8[%c2, %c0_27] : memref<16x128xf32, #tpu.memory_space<vmem>>, vector<2x128xf32>
    tpu.vector_store %arg8[%c2, %c0_27], %76 {strides = array<i32>} : memref<16x128xf32, #tpu.memory_space<vmem>>, vector<2x128xf32>,
    %cst_28 = arith.constant dense<0xFF800000> : vector<2xf32>
    %78 = vector.multi_reduction <maximumf>, %76, %cst_28 [1] : vector<2x128xf32> to vector<2xf32>
    %79 = vector.shape_cast %78 : vector<2xf32> to vector<2x1xf32>
    %80 = vector.broadcast %79 : vector<2x1xf32> to vector<2x128xf32>
    %81 = arith.cmpf oge, %76, %80 : vector<2x128xf32>
    %c128_i32_29 = arith.constant 128 : i32
    %82 = vector.broadcast %c128_i32_29 : i32 to vector<2x128xi32>
    %83 = arith.select %81, %13, %82 : vector<2x128xi1>, vector<2x128xi32>
    %cst_30 = arith.constant dense<2147483647> : vector<2xi32>
    %84 = vector.multi_reduction <minsi>, %83, %cst_30 [1] : vector<2x128xi32> to vector<2xi32>
    %85 = vector.shape_cast %84 : vector<2xi32> to vector<2x1xi32>
    %86 = vector.broadcast %85 : vector<2x1xi32> to vector<2x128xi32>
    %87 = arith.cmpi eq, %13, %86 : vector<2x128xi32>
    %88 = arith.extui %87 : vector<2x128xi1> to vector<2x128xi32>
    %89 = arith.sitofp %88 : vector<2x128xi32> to vector<2x128xf32>
    %cst_31 = arith.constant dense<0.000000e+00> : vector<2x128xf32>
    %90 = tpu.matmul %89, %2, %cst_31 {dimension_numbers = #tpu.dot_dimension_numbers<[1], [0], [0], [1], [0, 0, 1, 1], [], []>} : vector<2x128xf32>, vector<128x128xf32>, vector<2x128xf32> -> vector<2x128xf32>
    %cst_32 = arith.constant dense<0.000000e+00> : vector<2x128xf32>
    %91 = tpu.matmul %74, %3, %cst_32 {dimension_numbers = #tpu.dot_dimension_numbers<[1], [0], [0], [1], [0, 0, 1, 1], [], []>} : vector<2x32xf32>, vector<32x128xf32>, vector<2x128xf32> -> vector<2x128xf32>
    %92 = arith.addf %90, %91 : vector<2x128xf32>
    %93 = arith.addf %92, %5 : vector<2x128xf32>
    %94 = math.tanh %93 : vector<2x128xf32>
    %95 = arith.negf %93 : vector<2x128xf32>
    %96 = math.exp %95 : vector<2x128xf32>
    %cst_33 = arith.constant 1.000000e+00 : f32
    %97 = vector.broadcast %cst_33 : f32 to vector<2x128xf32>
    %98 = arith.addf %97, %96 : vector<2x128xf32>
    %99 = arith.divf %97, %98 : vector<2x128xf32>
    %100 = arith.select %12, %94, %99 : vector<2x128xi1>, vector<2x128xf32>
    %101 = vector.extract_strided_slice %100 {offsets = [0, 0], sizes = [2, 32], strides = [1, 1]} : vector<2x128xf32> to vector<2x32xf32>
    %102 = vector.extract_strided_slice %100 {offsets = [0, 32], sizes = [2, 32], strides = [1, 1]} : vector<2x128xf32> to vector<2x32xf32>
    %103 = vector.extract_strided_slice %100 {offsets = [0, 64], sizes = [2, 32], strides = [1, 1]} : vector<2x128xf32> to vector<2x32xf32>
    %104 = vector.extract_strided_slice %100 {offsets = [0, 96], sizes = [2, 32], strides = [1, 1]} : vector<2x128xf32> to vector<2x32xf32>
    %105 = arith.mulf %102, %72 : vector<2x32xf32>
    %106 = arith.mulf %101, %103 : vector<2x32xf32>
    %107 = arith.addf %105, %106 : vector<2x32xf32>
    %108 = math.tanh %107 : vector<2x32xf32>
    %109 = arith.mulf %104, %108 : vector<2x32xf32>
    %cst_34 = arith.constant dense<0.000000e+00> : vector<2x128xf32>
    %110 = tpu.matmul %109, %4, %cst_34 {dimension_numbers = #tpu.dot_dimension_numbers<[1], [0], [0], [1], [0, 0, 1, 1], [], []>} : vector<2x32xf32>, vector<32x128xf32>, vector<2x128xf32> -> vector<2x128xf32>
    %111 = arith.addf %110, %6 : vector<2x128xf32>
    %c4 = arith.constant 4 : index
    %c0_35 = arith.constant 0 : index
    %112 = vector.load %arg8[%c4, %c0_35] : memref<16x128xf32, #tpu.memory_space<vmem>>, vector<2x128xf32>
    tpu.vector_store %arg8[%c4, %c0_35], %111 {strides = array<i32>} : memref<16x128xf32, #tpu.memory_space<vmem>>, vector<2x128xf32>,
    %cst_36 = arith.constant dense<0xFF800000> : vector<2xf32>
    %113 = vector.multi_reduction <maximumf>, %111, %cst_36 [1] : vector<2x128xf32> to vector<2xf32>
    %114 = vector.shape_cast %113 : vector<2xf32> to vector<2x1xf32>
    %115 = vector.broadcast %114 : vector<2x1xf32> to vector<2x128xf32>
    %116 = arith.cmpf oge, %111, %115 : vector<2x128xf32>
    %c128_i32_37 = arith.constant 128 : i32
    %117 = vector.broadcast %c128_i32_37 : i32 to vector<2x128xi32>
    %118 = arith.select %116, %13, %117 : vector<2x128xi1>, vector<2x128xi32>
    %cst_38 = arith.constant dense<2147483647> : vector<2xi32>
    %119 = vector.multi_reduction <minsi>, %118, %cst_38 [1] : vector<2x128xi32> to vector<2xi32>
    %120 = vector.shape_cast %119 : vector<2xi32> to vector<2x1xi32>
    %121 = vector.broadcast %120 : vector<2x1xi32> to vector<2x128xi32>
    %122 = arith.cmpi eq, %13, %121 : vector<2x128xi32>
    %123 = arith.extui %122 : vector<2x128xi1> to vector<2x128xi32>
    %124 = arith.sitofp %123 : vector<2x128xi32> to vector<2x128xf32>
    %cst_39 = arith.constant dense<0.000000e+00> : vector<2x128xf32>
    %125 = tpu.matmul %124, %2, %cst_39 {dimension_numbers = #tpu.dot_dimension_numbers<[1], [0], [0], [1], [0, 0, 1, 1], [], []>} : vector<2x128xf32>, vector<128x128xf32>, vector<2x128xf32> -> vector<2x128xf32>
    %cst_40 = arith.constant dense<0.000000e+00> : vector<2x128xf32>
    %126 = tpu.matmul %109, %3, %cst_40 {dimension_numbers = #tpu.dot_dimension_numbers<[1], [0], [0], [1], [0, 0, 1, 1], [], []>} : vector<2x32xf32>, vector<32x128xf32>, vector<2x128xf32> -> vector<2x128xf32>
    %127 = arith.addf %125, %126 : vector<2x128xf32>
    %128 = arith.addf %127, %5 : vector<2x128xf32>
    %129 = math.tanh %128 : vector<2x128xf32>
    %130 = arith.negf %128 : vector<2x128xf32>
    %131 = math.exp %130 : vector<2x128xf32>
    %cst_41 = arith.constant 1.000000e+00 : f32
    %132 = vector.broadcast %cst_41 : f32 to vector<2x128xf32>
    %133 = arith.addf %132, %131 : vector<2x128xf32>
    %134 = arith.divf %132, %133 : vector<2x128xf32>
    %135 = arith.select %12, %129, %134 : vector<2x128xi1>, vector<2x128xf32>
    %136 = vector.extract_strided_slice %135 {offsets = [0, 0], sizes = [2, 32], strides = [1, 1]} : vector<2x128xf32> to vector<2x32xf32>
    %137 = vector.extract_strided_slice %135 {offsets = [0, 32], sizes = [2, 32], strides = [1, 1]} : vector<2x128xf32> to vector<2x32xf32>
    %138 = vector.extract_strided_slice %135 {offsets = [0, 64], sizes = [2, 32], strides = [1, 1]} : vector<2x128xf32> to vector<2x32xf32>
    %139 = vector.extract_strided_slice %135 {offsets = [0, 96], sizes = [2, 32], strides = [1, 1]} : vector<2x128xf32> to vector<2x32xf32>
    %140 = arith.mulf %137, %107 : vector<2x32xf32>
    %141 = arith.mulf %136, %138 : vector<2x32xf32>
    %142 = arith.addf %140, %141 : vector<2x32xf32>
    %143 = math.tanh %142 : vector<2x32xf32>
    %144 = arith.mulf %139, %143 : vector<2x32xf32>
    %cst_42 = arith.constant dense<0.000000e+00> : vector<2x128xf32>
    %145 = tpu.matmul %144, %4, %cst_42 {dimension_numbers = #tpu.dot_dimension_numbers<[1], [0], [0], [1], [0, 0, 1, 1], [], []>} : vector<2x32xf32>, vector<32x128xf32>, vector<2x128xf32> -> vector<2x128xf32>
    %146 = arith.addf %145, %6 : vector<2x128xf32>
    %c6 = arith.constant 6 : index
    %c0_43 = arith.constant 0 : index
    %147 = vector.load %arg8[%c6, %c0_43] : memref<16x128xf32, #tpu.memory_space<vmem>>, vector<2x128xf32>
    tpu.vector_store %arg8[%c6, %c0_43], %146 {strides = array<i32>} : memref<16x128xf32, #tpu.memory_space<vmem>>, vector<2x128xf32>,
    %cst_44 = arith.constant dense<0xFF800000> : vector<2xf32>
    %148 = vector.multi_reduction <maximumf>, %146, %cst_44 [1] : vector<2x128xf32> to vector<2xf32>
    %149 = vector.shape_cast %148 : vector<2xf32> to vector<2x1xf32>
    %150 = vector.broadcast %149 : vector<2x1xf32> to vector<2x128xf32>
    %151 = arith.cmpf oge, %146, %150 : vector<2x128xf32>
    %c128_i32_45 = arith.constant 128 : i32
    %152 = vector.broadcast %c128_i32_45 : i32 to vector<2x128xi32>
    %153 = arith.select %151, %13, %152 : vector<2x128xi1>, vector<2x128xi32>
    %cst_46 = arith.constant dense<2147483647> : vector<2xi32>
    %154 = vector.multi_reduction <minsi>, %153, %cst_46 [1] : vector<2x128xi32> to vector<2xi32>
    %155 = vector.shape_cast %154 : vector<2xi32> to vector<2x1xi32>
    %156 = vector.broadcast %155 : vector<2x1xi32> to vector<2x128xi32>
    %157 = arith.cmpi eq, %13, %156 : vector<2x128xi32>
    %158 = arith.extui %157 : vector<2x128xi1> to vector<2x128xi32>
    %159 = arith.sitofp %158 : vector<2x128xi32> to vector<2x128xf32>
    %cst_47 = arith.constant dense<0.000000e+00> : vector<2x128xf32>
    %160 = tpu.matmul %159, %2, %cst_47 {dimension_numbers = #tpu.dot_dimension_numbers<[1], [0], [0], [1], [0, 0, 1, 1], [], []>} : vector<2x128xf32>, vector<128x128xf32>, vector<2x128xf32> -> vector<2x128xf32>
    %cst_48 = arith.constant dense<0.000000e+00> : vector<2x128xf32>
    %161 = tpu.matmul %144, %3, %cst_48 {dimension_numbers = #tpu.dot_dimension_numbers<[1], [0], [0], [1], [0, 0, 1, 1], [], []>} : vector<2x32xf32>, vector<32x128xf32>, vector<2x128xf32> -> vector<2x128xf32>
    %162 = arith.addf %160, %161 : vector<2x128xf32>
    %163 = arith.addf %162, %5 : vector<2x128xf32>
    %164 = math.tanh %163 : vector<2x128xf32>
    %165 = arith.negf %163 : vector<2x128xf32>
    %166 = math.exp %165 : vector<2x128xf32>
    %cst_49 = arith.constant 1.000000e+00 : f32
    %167 = vector.broadcast %cst_49 : f32 to vector<2x128xf32>
    %168 = arith.addf %167, %166 : vector<2x128xf32>
    %169 = arith.divf %167, %168 : vector<2x128xf32>
    %170 = arith.select %12, %164, %169 : vector<2x128xi1>, vector<2x128xf32>
    %171 = vector.extract_strided_slice %170 {offsets = [0, 0], sizes = [2, 32], strides = [1, 1]} : vector<2x128xf32> to vector<2x32xf32>
    %172 = vector.extract_strided_slice %170 {offsets = [0, 32], sizes = [2, 32], strides = [1, 1]} : vector<2x128xf32> to vector<2x32xf32>
    %173 = vector.extract_strided_slice %170 {offsets = [0, 64], sizes = [2, 32], strides = [1, 1]} : vector<2x128xf32> to vector<2x32xf32>
    %174 = vector.extract_strided_slice %170 {offsets = [0, 96], sizes = [2, 32], strides = [1, 1]} : vector<2x128xf32> to vector<2x32xf32>
    %175 = arith.mulf %172, %142 : vector<2x32xf32>
    %176 = arith.mulf %171, %173 : vector<2x32xf32>
    %177 = arith.addf %175, %176 : vector<2x32xf32>
    %178 = math.tanh %177 : vector<2x32xf32>
    %179 = arith.mulf %174, %178 : vector<2x32xf32>
    %cst_50 = arith.constant dense<0.000000e+00> : vector<2x128xf32>
    %180 = tpu.matmul %179, %4, %cst_50 {dimension_numbers = #tpu.dot_dimension_numbers<[1], [0], [0], [1], [0, 0, 1, 1], [], []>} : vector<2x32xf32>, vector<32x128xf32>, vector<2x128xf32> -> vector<2x128xf32>
    %181 = arith.addf %180, %6 : vector<2x128xf32>
    %c8 = arith.constant 8 : index
    %c0_51 = arith.constant 0 : index
    %182 = vector.load %arg8[%c8, %c0_51] : memref<16x128xf32, #tpu.memory_space<vmem>>, vector<2x128xf32>
    tpu.vector_store %arg8[%c8, %c0_51], %181 {strides = array<i32>} : memref<16x128xf32, #tpu.memory_space<vmem>>, vector<2x128xf32>,
    %cst_52 = arith.constant dense<0xFF800000> : vector<2xf32>
    %183 = vector.multi_reduction <maximumf>, %181, %cst_52 [1] : vector<2x128xf32> to vector<2xf32>
    %184 = vector.shape_cast %183 : vector<2xf32> to vector<2x1xf32>
    %185 = vector.broadcast %184 : vector<2x1xf32> to vector<2x128xf32>
    %186 = arith.cmpf oge, %181, %185 : vector<2x128xf32>
    %c128_i32_53 = arith.constant 128 : i32
    %187 = vector.broadcast %c128_i32_53 : i32 to vector<2x128xi32>
    %188 = arith.select %186, %13, %187 : vector<2x128xi1>, vector<2x128xi32>
    %cst_54 = arith.constant dense<2147483647> : vector<2xi32>
    %189 = vector.multi_reduction <minsi>, %188, %cst_54 [1] : vector<2x128xi32> to vector<2xi32>
    %190 = vector.shape_cast %189 : vector<2xi32> to vector<2x1xi32>
    %191 = vector.broadcast %190 : vector<2x1xi32> to vector<2x128xi32>
    %192 = arith.cmpi eq, %13, %191 : vector<2x128xi32>
    %193 = arith.extui %192 : vector<2x128xi1> to vector<2x128xi32>
    %194 = arith.sitofp %193 : vector<2x128xi32> to vector<2x128xf32>
    %cst_55 = arith.constant dense<0.000000e+00> : vector<2x128xf32>
    %195 = tpu.matmul %194, %2, %cst_55 {dimension_numbers = #tpu.dot_dimension_numbers<[1], [0], [0], [1], [0, 0, 1, 1], [], []>} : vector<2x128xf32>, vector<128x128xf32>, vector<2x128xf32> -> vector<2x128xf32>
    %cst_56 = arith.constant dense<0.000000e+00> : vector<2x128xf32>
    %196 = tpu.matmul %179, %3, %cst_56 {dimension_numbers = #tpu.dot_dimension_numbers<[1], [0], [0], [1], [0, 0, 1, 1], [], []>} : vector<2x32xf32>, vector<32x128xf32>, vector<2x128xf32> -> vector<2x128xf32>
    %197 = arith.addf %195, %196 : vector<2x128xf32>
    %198 = arith.addf %197, %5 : vector<2x128xf32>
    %199 = math.tanh %198 : vector<2x128xf32>
    %200 = arith.negf %198 : vector<2x128xf32>
    %201 = math.exp %200 : vector<2x128xf32>
    %cst_57 = arith.constant 1.000000e+00 : f32
    %202 = vector.broadcast %cst_57 : f32 to vector<2x128xf32>
    %203 = arith.addf %202, %201 : vector<2x128xf32>
    %204 = arith.divf %202, %203 : vector<2x128xf32>
    %205 = arith.select %12, %199, %204 : vector<2x128xi1>, vector<2x128xf32>
    %206 = vector.extract_strided_slice %205 {offsets = [0, 0], sizes = [2, 32], strides = [1, 1]} : vector<2x128xf32> to vector<2x32xf32>
    %207 = vector.extract_strided_slice %205 {offsets = [0, 32], sizes = [2, 32], strides = [1, 1]} : vector<2x128xf32> to vector<2x32xf32>
    %208 = vector.extract_strided_slice %205 {offsets = [0, 64], sizes = [2, 32], strides = [1, 1]} : vector<2x128xf32> to vector<2x32xf32>
    %209 = vector.extract_strided_slice %205 {offsets = [0, 96], sizes = [2, 32], strides = [1, 1]} : vector<2x128xf32> to vector<2x32xf32>
    %210 = arith.mulf %207, %177 : vector<2x32xf32>
    %211 = arith.mulf %206, %208 : vector<2x32xf32>
    %212 = arith.addf %210, %211 : vector<2x32xf32>
    %213 = math.tanh %212 : vector<2x32xf32>
    %214 = arith.mulf %209, %213 : vector<2x32xf32>
    %cst_58 = arith.constant dense<0.000000e+00> : vector<2x128xf32>
    %215 = tpu.matmul %214, %4, %cst_58 {dimension_numbers = #tpu.dot_dimension_numbers<[1], [0], [0], [1], [0, 0, 1, 1], [], []>} : vector<2x32xf32>, vector<32x128xf32>, vector<2x128xf32> -> vector<2x128xf32>
    %216 = arith.addf %215, %6 : vector<2x128xf32>
    %c10 = arith.constant 10 : index
    %c0_59 = arith.constant 0 : index
    %217 = vector.load %arg8[%c10, %c0_59] : memref<16x128xf32, #tpu.memory_space<vmem>>, vector<2x128xf32>
    tpu.vector_store %arg8[%c10, %c0_59], %216 {strides = array<i32>} : memref<16x128xf32, #tpu.memory_space<vmem>>, vector<2x128xf32>,
    %cst_60 = arith.constant dense<0xFF800000> : vector<2xf32>
    %218 = vector.multi_reduction <maximumf>, %216, %cst_60 [1] : vector<2x128xf32> to vector<2xf32>
    %219 = vector.shape_cast %218 : vector<2xf32> to vector<2x1xf32>
    %220 = vector.broadcast %219 : vector<2x1xf32> to vector<2x128xf32>
    %221 = arith.cmpf oge, %216, %220 : vector<2x128xf32>
    %c128_i32_61 = arith.constant 128 : i32
    %222 = vector.broadcast %c128_i32_61 : i32 to vector<2x128xi32>
    %223 = arith.select %221, %13, %222 : vector<2x128xi1>, vector<2x128xi32>
    %cst_62 = arith.constant dense<2147483647> : vector<2xi32>
    %224 = vector.multi_reduction <minsi>, %223, %cst_62 [1] : vector<2x128xi32> to vector<2xi32>
    %225 = vector.shape_cast %224 : vector<2xi32> to vector<2x1xi32>
    %226 = vector.broadcast %225 : vector<2x1xi32> to vector<2x128xi32>
    %227 = arith.cmpi eq, %13, %226 : vector<2x128xi32>
    %228 = arith.extui %227 : vector<2x128xi1> to vector<2x128xi32>
    %229 = arith.sitofp %228 : vector<2x128xi32> to vector<2x128xf32>
    %cst_63 = arith.constant dense<0.000000e+00> : vector<2x128xf32>
    %230 = tpu.matmul %229, %2, %cst_63 {dimension_numbers = #tpu.dot_dimension_numbers<[1], [0], [0], [1], [0, 0, 1, 1], [], []>} : vector<2x128xf32>, vector<128x128xf32>, vector<2x128xf32> -> vector<2x128xf32>
    %cst_64 = arith.constant dense<0.000000e+00> : vector<2x128xf32>
    %231 = tpu.matmul %214, %3, %cst_64 {dimension_numbers = #tpu.dot_dimension_numbers<[1], [0], [0], [1], [0, 0, 1, 1], [], []>} : vector<2x32xf32>, vector<32x128xf32>, vector<2x128xf32> -> vector<2x128xf32>
    %232 = arith.addf %230, %231 : vector<2x128xf32>
    %233 = arith.addf %232, %5 : vector<2x128xf32>
    %234 = math.tanh %233 : vector<2x128xf32>
    %235 = arith.negf %233 : vector<2x128xf32>
    %236 = math.exp %235 : vector<2x128xf32>
    %cst_65 = arith.constant 1.000000e+00 : f32
    %237 = vector.broadcast %cst_65 : f32 to vector<2x128xf32>
    %238 = arith.addf %237, %236 : vector<2x128xf32>
    %239 = arith.divf %237, %238 : vector<2x128xf32>
    %240 = arith.select %12, %234, %239 : vector<2x128xi1>, vector<2x128xf32>
    %241 = vector.extract_strided_slice %240 {offsets = [0, 0], sizes = [2, 32], strides = [1, 1]} : vector<2x128xf32> to vector<2x32xf32>
    %242 = vector.extract_strided_slice %240 {offsets = [0, 32], sizes = [2, 32], strides = [1, 1]} : vector<2x128xf32> to vector<2x32xf32>
    %243 = vector.extract_strided_slice %240 {offsets = [0, 64], sizes = [2, 32], strides = [1, 1]} : vector<2x128xf32> to vector<2x32xf32>
    %244 = vector.extract_strided_slice %240 {offsets = [0, 96], sizes = [2, 32], strides = [1, 1]} : vector<2x128xf32> to vector<2x32xf32>
    %245 = arith.mulf %242, %212 : vector<2x32xf32>
    %246 = arith.mulf %241, %243 : vector<2x32xf32>
    %247 = arith.addf %245, %246 : vector<2x32xf32>
    %248 = math.tanh %247 : vector<2x32xf32>
    %249 = arith.mulf %244, %248 : vector<2x32xf32>
    %cst_66 = arith.constant dense<0.000000e+00> : vector<2x128xf32>
    %250 = tpu.matmul %249, %4, %cst_66 {dimension_numbers = #tpu.dot_dimension_numbers<[1], [0], [0], [1], [0, 0, 1, 1], [], []>} : vector<2x32xf32>, vector<32x128xf32>, vector<2x128xf32> -> vector<2x128xf32>
    %251 = arith.addf %250, %6 : vector<2x128xf32>
    %c12 = arith.constant 12 : index
    %c0_67 = arith.constant 0 : index
    %252 = vector.load %arg8[%c12, %c0_67] : memref<16x128xf32, #tpu.memory_space<vmem>>, vector<2x128xf32>
    tpu.vector_store %arg8[%c12, %c0_67], %251 {strides = array<i32>} : memref<16x128xf32, #tpu.memory_space<vmem>>, vector<2x128xf32>,
    %cst_68 = arith.constant dense<0xFF800000> : vector<2xf32>
    %253 = vector.multi_reduction <maximumf>, %251, %cst_68 [1] : vector<2x128xf32> to vector<2xf32>
    %254 = vector.shape_cast %253 : vector<2xf32> to vector<2x1xf32>
    %255 = vector.broadcast %254 : vector<2x1xf32> to vector<2x128xf32>
    %256 = arith.cmpf oge, %251, %255 : vector<2x128xf32>
    %c128_i32_69 = arith.constant 128 : i32
    %257 = vector.broadcast %c128_i32_69 : i32 to vector<2x128xi32>
    %258 = arith.select %256, %13, %257 : vector<2x128xi1>, vector<2x128xi32>
    %cst_70 = arith.constant dense<2147483647> : vector<2xi32>
    %259 = vector.multi_reduction <minsi>, %258, %cst_70 [1] : vector<2x128xi32> to vector<2xi32>
    %260 = vector.shape_cast %259 : vector<2xi32> to vector<2x1xi32>
    %261 = vector.broadcast %260 : vector<2x1xi32> to vector<2x128xi32>
    %262 = arith.cmpi eq, %13, %261 : vector<2x128xi32>
    %263 = arith.extui %262 : vector<2x128xi1> to vector<2x128xi32>
    %264 = arith.sitofp %263 : vector<2x128xi32> to vector<2x128xf32>
    %cst_71 = arith.constant dense<0.000000e+00> : vector<2x128xf32>
    %265 = tpu.matmul %264, %2, %cst_71 {dimension_numbers = #tpu.dot_dimension_numbers<[1], [0], [0], [1], [0, 0, 1, 1], [], []>} : vector<2x128xf32>, vector<128x128xf32>, vector<2x128xf32> -> vector<2x128xf32>
    %cst_72 = arith.constant dense<0.000000e+00> : vector<2x128xf32>
    %266 = tpu.matmul %249, %3, %cst_72 {dimension_numbers = #tpu.dot_dimension_numbers<[1], [0], [0], [1], [0, 0, 1, 1], [], []>} : vector<2x32xf32>, vector<32x128xf32>, vector<2x128xf32> -> vector<2x128xf32>
    %267 = arith.addf %265, %266 : vector<2x128xf32>
    %268 = arith.addf %267, %5 : vector<2x128xf32>
    %269 = math.tanh %268 : vector<2x128xf32>
    %270 = arith.negf %268 : vector<2x128xf32>
    %271 = math.exp %270 : vector<2x128xf32>
    %cst_73 = arith.constant 1.000000e+00 : f32
    %272 = vector.broadcast %cst_73 : f32 to vector<2x128xf32>
    %273 = arith.addf %272, %271 : vector<2x128xf32>
    %274 = arith.divf %272, %273 : vector<2x128xf32>
    %275 = arith.select %12, %269, %274 : vector<2x128xi1>, vector<2x128xf32>
    %276 = vector.extract_strided_slice %275 {offsets = [0, 0], sizes = [2, 32], strides = [1, 1]} : vector<2x128xf32> to vector<2x32xf32>
    %277 = vector.extract_strided_slice %275 {offsets = [0, 32], sizes = [2, 32], strides = [1, 1]} : vector<2x128xf32> to vector<2x32xf32>
    %278 = vector.extract_strided_slice %275 {offsets = [0, 64], sizes = [2, 32], strides = [1, 1]} : vector<2x128xf32> to vector<2x32xf32>
    %279 = vector.extract_strided_slice %275 {offsets = [0, 96], sizes = [2, 32], strides = [1, 1]} : vector<2x128xf32> to vector<2x32xf32>
    %280 = arith.mulf %277, %247 : vector<2x32xf32>
    %281 = arith.mulf %276, %278 : vector<2x32xf32>
    %282 = arith.addf %280, %281 : vector<2x32xf32>
    %283 = math.tanh %282 : vector<2x32xf32>
    %284 = arith.mulf %279, %283 : vector<2x32xf32>
    %cst_74 = arith.constant dense<0.000000e+00> : vector<2x128xf32>
    %285 = tpu.matmul %284, %4, %cst_74 {dimension_numbers = #tpu.dot_dimension_numbers<[1], [0], [0], [1], [0, 0, 1, 1], [], []>} : vector<2x32xf32>, vector<32x128xf32>, vector<2x128xf32> -> vector<2x128xf32>
    %286 = arith.addf %285, %6 : vector<2x128xf32>
    %c14 = arith.constant 14 : index
    %c0_75 = arith.constant 0 : index
    %287 = vector.load %arg8[%c14, %c0_75] : memref<16x128xf32, #tpu.memory_space<vmem>>, vector<2x128xf32>
    tpu.vector_store %arg8[%c14, %c0_75], %286 {strides = array<i32>} : memref<16x128xf32, #tpu.memory_space<vmem>>, vector<2x128xf32>,
    return
  }
}

</mosaic_0001>

<bundles_post_ra>
// kernel: seq2seq_forward.2
= control target key start
LH: loop header
LB: loop body
LE: loop exit
PB: predicated region body
PF: predicated region fallthrough
CT: control target
= control target key end

     0   :  { %v108_v0 = vlaneseq  ;;  %vm43_vm0 = vcmask 130048   ;;  %vm933_vm4 = vmmov 1   ;;  %v934_v12 = vmov 0.0   ;;  %s936_s15 = smov 32   ;;  %s937_s22 = smov 96   ;;  %s1219_s1 = inlined_call_operand.vmem [shape: f32[16,256], index: 1, kind: input, shape index: {}]   ;;  %s1220_s0 = inlined_call_operand.vmem [shape: f32[16,16], index: 0, kind: input, shape index: {}]   ;;  %s1221_s3 = inlined_call_operand.vmem [shape: f32[64,128], index: 3, kind: input, shape index: {}]   ;;  %s1222_s2 = inlined_call_operand.vmem [shape: f32[1,256], index: 2, kind: input, shape index: {}]   ;;  %s1223_s6 = inlined_call_operand.vmem [shape: f32[64,32], index: 6, kind: input, shape index: {}]   ;;  %s1224_s7 = inlined_call_operand.vmem [shape: f32[1,32], index: 7, kind: input, shape index: {}]   ;;  %s1225_s5 = inlined_call_operand.vmem [shape: f32[1,32], index: 5, kind: input, shape index: {}]   ;;  %s1226_s4 = inlined_call_operand.vmem [shape: f32[64,32], index: 4, kind: input, shape index: {}]   ;;  %s1227_s9 = inlined_call_operand.vmem [shape: f32[2,32], index: 9, kind: output, shape index: {1}]   ;;  %s1228_s8 = inlined_call_operand.vmem [shape: f32[2,32], index: 8, kind: output, shape index: {0}]  }
   0x1   :  { %v35_v1 = vld [vmem:[%s1219_s1 + $0x10] sm:$0xff]  ;;  %v36_v2 = vld [vmem:[%s1219_s1 + $0x18] sm:$0xff]  ;;  %v33_v3 = vld [vmem:[%s1219_s1] sm:$0xff]  ;;  %vm125_vm6 = vcmask 1041408   ;;  %vm196_vm14 = vcmask 261120   ;;  %vm127_vm15 = vcmask 523264  }
   0x2   :  { %64 = vmatpush.msra.mxu0 %v35_v1  ;;  %87 = vmatpush.msra.mxu1 %v36_v2  ;;  %v34_v4 = vld [vmem:[%s1219_s1 + $0x8] sm:$0xff]  ;;  %v31_v5 = vld [vmem:[%s1220_s0] sm:$0xff]  ;;  %v1006_v6 = vld [vmem:[%s1221_s3 + $0x38] sm:$0xff]  ;;  %v109_v7 = vshrl.u32 %v108_v0, 7  ;;  %v1008_v8 = vand.u32 127, %v108_v0 }
   0x3   :  { %139 = vmatpush.msra.mxu2 %v1006_v6  ;;  %v1014_v9 = vld [vmem:[%s1221_s3 + $0x30] sm:$0xff]  ;;  %219 = vmatpush.msra.mxu3 %v1006_v6  ;;  %v105_v10 = vld [vmem:[%s1221_s3 + $0x28] sm:$0xff]  ;;  %v104_v11 = vld [vmem:[%s1221_s3 + $0x20] sm:$0xff] }
   0x4   :  { %65 = vmatpush.msra.mxu0 %v33_v3  ;;  %88 = vmatpush.msra.mxu1 %v34_v4  ;;  %vm112_vm1 = vcmp.lt.s32.totalorder %v109_v7, 2  ;;  %vm113_vm2 = vcmp.lt.s32.totalorder %v1008_v8, 32  ;;  %v103_v14 = vld [vmem:[%s1221_s3 + $0x18] sm:$0xff]  ;;  %v32_v15 = vld [vmem:[%s1220_s0 + $0x8] sm:$0xff]  ;;  %v102_v16 = vld [vmem:[%s1221_s3 + $0x10] sm:$0xff]  ;;  %vm117_vm7 = vcmp.ge.s32.totalorder %v1008_v8, 64 }
   0x5   :  { %837 = vmatmul.msk.f32.vlgmr.msra.gmra.mxu0 %vm43_vm0, %v31_v5  ;;  %839 = vmatmul.msk.f32.vlgmr.msra.gmra.mxu1 %vm43_vm0, %v31_v5  ;;  %vm114_vm3 = vmxor %vm112_vm1, %vm113_vm2  ;;  %v101_v17 = vld [vmem:[%s1221_s3 + $0x8] sm:$0xff]  ;;  %v100_v18 = vld [vmem:[%s1221_s3] sm:$0xff]  ;;  %vm118_vm8 = vcmp.lt.s32.totalorder %v1008_v8, 96 }
   0x6   :  { %140 = vmatpush.msra.mxu2 %v1014_v9  ;;  %vm115_vm5 = vmxor %vm114_vm3, %vm933_vm4  ;;  %220 = vmatpush.msra.mxu3 %v1014_v9  ;;  %v37_v19 = vld [vmem:[%s1222_s2] sm:$0x3]  ;;  %s935_s2 = smov 64   ;;  %v797_v45 = vld [vmem:[%s1223_s6 + $0x28] sm:$0xff] }
   0x7   :  { %v1028_v13 = vsel %vm115_vm5, 1.0, %v934_v12  ;;  %295 = vmatpush.msrb.mxu0 %v1006_v6  ;;  %374 = vmatpush.msrb.mxu1 %v1006_v6  ;;  %v39_v20 = vperm.slane %v37_v19, 0  ;;  %v40_v21 = vperm.slane %v37_v19, 1  ;;  %vm1065_vm10 = vmand %vm117_vm7, %vm118_vm8 }
   0x8   :  { %141 = vmatpush.msra.mxu2 %v105_v10  ;;  %221 = vmatpush.msra.mxu3 %v105_v10 }
   0x9   :  { %296 = vmatpush.msrb.mxu0 %v1014_v9  ;;  %375 = vmatpush.msrb.mxu1 %v1014_v9 }
   0xa   :  { %142 = vmatpush.msra.mxu2 %v104_v11  ;;  %222 = vmatpush.msra.mxu3 %v104_v11 }
   0xb   :  { %297 = vmatpush.msrb.mxu0 %v105_v10  ;;  %376 = vmatpush.msrb.mxu1 %v105_v10 }
   0xc   :  { %143 = vmatpush.msra.mxu2 %v103_v14  ;;  %223 = vmatpush.msra.mxu3 %v103_v14 }
   0xd   :  { %838 = vmatmul.msk.f32.gmra.mxu0 %vm43_vm0, %v32_v15  ;;  %840 = vmatmul.msk.f32.gmra.mxu1 %vm43_vm0, %v32_v15 }
   0xe   :  { %144 = vmatpush.msra.mxu2 %v102_v16  ;;  %224 = vmatpush.msra.mxu3 %v102_v16 }
   0xf   :  { %298 = vmatpush.msrb.mxu0 %v104_v11  ;;  %377 = vmatpush.msrb.mxu1 %v104_v11 }
  0x10   :  { %145 = vmatpush.msra.mxu2 %v101_v17  ;;  %225 = vmatpush.msra.mxu3 %v101_v17 }
  0x11   :  { %299 = vmatpush.msrb.mxu0 %v103_v14  ;;  %378 = vmatpush.msrb.mxu1 %v103_v14 }
  0x12   :  { %146 = vmatpush.msra.mxu2 %v100_v18  ;;  %226 = vmatpush.msra.mxu3 %v100_v18 }
  0x13   :  { %147 = vmatmul.f32.vlgmr.msra.gmra.mxu2 %v934_v12  ;;  %300 = vmatpush.msrb.mxu0 %v102_v16 }
  0x14   :  { %379 = vmatpush.msrb.mxu1 %v102_v16  ;;  %450 = vmatpush.msrb.mxu2 %v1006_v6 }
  0x15   :  { %301 = vmatpush.msrb.mxu0 %v101_v17  ;;  %529 = vmatpush.msrb.mxu3 %v1006_v6 }
  0x16   :  { %380 = vmatpush.msrb.mxu1 %v101_v17  ;;  %451 = vmatpush.msrb.mxu2 %v1014_v9 }
  0x17   :  { %302 = vmatpush.msrb.mxu0 %v100_v18  ;;  %530 = vmatpush.msrb.mxu3 %v1014_v9 }
  0x18   :  { %381 = vmatpush.msrb.mxu1 %v100_v18  ;;  %452 = vmatpush.msrb.mxu2 %v105_v10 }
  0x19   :  { %531 = vmatpush.msrb.mxu3 %v105_v10  ;;  %605 = vmatpush.msra.mxu0 %v1006_v6 }
  0x1a   :  { %453 = vmatpush.msrb.mxu2 %v104_v11  ;;  %684 = vmatpush.msra.mxu1 %v1006_v6 }
  0x1b   :  { %532 = vmatpush.msrb.mxu3 %v104_v11  ;;  %606 = vmatpush.msra.mxu0 %v1014_v9 }
  0x1c   :  { %454 = vmatpush.msrb.mxu2 %v103_v14  ;;  %685 = vmatpush.msra.mxu1 %v1014_v9 }
  0x1d   :  { %533 = vmatpush.msrb.mxu3 %v103_v14  ;;  %607 = vmatpush.msra.mxu0 %v105_v10 }
  0x1e   :  { %455 = vmatpush.msrb.mxu2 %v102_v16  ;;  %686 = vmatpush.msra.mxu1 %v105_v10 }
  0x1f   :  { %534 = vmatpush.msrb.mxu3 %v102_v16  ;;  %608 = vmatpush.msra.mxu0 %v104_v11 }
  0x20   :  { %456 = vmatpush.msrb.mxu2 %v101_v17  ;;  %687 = vmatpush.msra.mxu1 %v104_v11 }
  0x21   :  { %535 = vmatpush.msrb.mxu3 %v101_v17  ;;  %609 = vmatpush.msra.mxu0 %v103_v14 }
  0x22   :  { %457 = vmatpush.msrb.mxu2 %v100_v18  ;;  %688 = vmatpush.msra.mxu1 %v103_v14 }
  0x23   :  { %536 = vmatpush.msrb.mxu3 %v100_v18  ;;  %610 = vmatpush.msra.mxu0 %v102_v16 }
  0x24   :  { %689 = vmatpush.msra.mxu1 %v102_v16 }
  0x25   :  { %611 = vmatpush.msra.mxu0 %v101_v17 }
  0x26   :  { %690 = vmatpush.msra.mxu1 %v101_v17 }
  0x27   :  { %612 = vmatpush.msra.mxu0 %v100_v18 }
  0x28   :  { %691 = vmatpush.msra.mxu1 %v100_v18 }
  0x82   :  { %v67_v22 = vpop.f32.mrf.mxu0  ;;  %v90_v23 = vpop.f32.mrf.mxu1 }
  0x83   :  { %v68_v24 = vadd.f32 %v67_v22, %v39_v20  ;;  %v91_v25 = vadd.f32 %v90_v23, %v40_v21 }
  0x85   :  { %96 = vst [vmem:[#allocation2 + $0x10] sm:$0xff] %v68_v24 }
  0x86   :  { %97 = vst [vmem:[#allocation2] sm:$0xff] %v91_v25 }
  0x8a   :  { %v70_v26 = vpop.f32.mrf.mxu0  ;;  %v93_v27 = vpop.f32.mrf.mxu1 }
  0x8b   :  { %v71_v28 = vadd.f32 %v70_v26, %v39_v20  ;;  %v94_v29 = vadd.f32 %v93_v27, %v40_v21 }
  0x8c   :  { %v120_v30 = vld [vmem:[#allocation2 + $0x10] sm:$0x3]  ;;  %v199_v0 = vld [vmem:[#allocation2 + $0x10] sm:$0xc] }
  0x8d   :  { %98 = vst [vmem:[#allocation2 + $0x18] sm:$0xff] %v71_v28  ;;  %v202_v2 = vrot.slane %v199_v0, 2 }
  0x8e   :  { %99 = vst [vmem:[#allocation2 + $0x8] sm:$0xff] %v94_v29 }
  0x95   :  { %v121_v31 = vld [vmem:[#allocation2 + $0x8] sm:$0xc0]  ;;  %v200_v1 = vld [vmem:[#allocation2 + $0x8] sm:$0x30] }
  0x96   :  { %v123_v32 = vrot.slane %v121_v31, 4  ;;  %v148_v33 = vpop.f32.mrf.mxu2  ;;  %v205_v3 = vrot.slane %v200_v1, 2 }
  0x98   :  { %v126_v34 = vsel %vm125_vm6, %v120_v30, %v123_v32  ;;  %v207_v4 = vsel %vm125_vm6, %v202_v2, %v205_v3 }
  0x99   :  { %v149_v35 = vadd.f32 %v148_v33, %v126_v34 }
  0x9b   :  { %v841_v36 = vmul.f32 -1.442695, %v149_v35 }
  0x9d   :  { %865 = vpow2.f32 %v841_v36 }
  0xa3   :  { %v866_v37 = vpop.eup %865 }
  0xa4   :  { %v155_v38 = vadd.f32 1.0, %v866_v37  ;;  %v279_v37 = vld [vmem:[#allocation2 + $0x8] sm:$0xc] }
  0xa6   :  { %867 = vrcp.f32 %v155_v38  ;;  %v167_v42 = vand.u32 2147483648, %v155_v38  ;;  %v165_v44 = vand.u32 2147483647, %v155_v38  ;;  %vm161_vm11 = vweird.f32 %v155_v38 }
  0xa7   :  { %869 = vtanh.f32 %v149_v35  ;;  %v278_v35 = vld [vmem:[#allocation2 + $0x10] sm:$0x30] }
  0xa8   :  { %v168_v47 = vor.u32 1.1754944e-38, %v167_v42  ;;  %vm166_vm13 = vcmp.eq.f32.partialorder %v165_v44, 8.507059e+37  ;;  %v281_v36 = vrot.slane %v278_v35, 4 }
  0xac   :  { %v868_v39 = vpop.eup %867 }
  0xad   :  { %v157_v40 = vmul.f32 %v868_v39, %v155_v38  ;;  %vm162_vm9 = vweird.f32 %v868_v39  ;;  %v870_v49 = vpop.eup %869  ;;  %v283_v38 = vsel %vm125_vm6, %v281_v36, %v279_v37 }
  0xae   :  { %vm163_vm12 = vmor %vm161_vm11, %vm162_vm9 }
  0xaf   :  { %v158_v41 = vsub.f32 1.0, %v157_v40 }
  0xb1   :  { %v159_v43 = vmul.f32 %v868_v39, %v158_v41 }
  0xb3   :  { %v160_v46 = vadd.f32 %v868_v39, %v159_v43 }
  0xb5   :  { %v164_v48 = vsel %vm163_vm12, %v868_v39, %v160_v46 }
  0xb6   :  { %v169_v50 = vsel %vm166_vm13, %v168_v47, %v164_v48 }
  0xb7   :  { %v171_v51 = vsel %vm1065_vm10, %v870_v49, %v169_v50 }
  0xb8   :  { %174 = vrot.lane.b32.xlu0 %v171_v51, %s935_s2  ;;  %v172_v54 = vmul.f32 0.0, %v171_v51 }
 0x12a   :  { %v175_v52 = vpop.permute.xlu0 %174 }
 0x12b   :  { %v177_v53 = vmul.f32 %v175_v52, %v171_v51 }
 0x12d   :  { %179 = vrot.lane.b32.xlu0 %v177_v53, %s936_s15 }
 0x19f   :  { %v180_v55 = vpop.permute.xlu0 %179 }
 0x1a0   :  { %v182_v56 = vadd.f32 %v180_v55, %v172_v54 }
 0x1a2   :  { %871 = vtanh.f32 %v182_v56 }
 0x1a8   :  { %v872_v57 = vpop.eup %871 }
 0x1a9   :  { %185 = vrot.lane.b32.xlu1 %v872_v57, %s935_s2 }
 0x21b   :  { %v186_v58 = vpop.permute.xlu1 %185 }
 0x21c   :  { %v188_v59 = vmul.f32 %v186_v58, %v171_v51 }
 0x21e   :  { %193 = vrot.lane.b32.xlu2 %v188_v59, %s935_s2  ;;  %190 = vrot.lane.b32.xlu1 %v188_v59, %s936_s15 }
 0x278   :  { %v194_v60 = vpop.permute.xlu2 %193 }
 0x290   :  { %v191_v61 = vpop.permute.xlu1 %190 }
 0x291   :  { %v197_v62 = vsel %vm196_vm14, %v191_v61, %v194_v60 }
 0x292   :  { %v198_v63 = vmul.f32 %v197_v62, %v1028_v13 }
 0x294   :  { %842 = vmatmul.msk.f32.vlgmr.msra.gmra.mxu3 %vm127_vm15, %v198_v63 }
 0x317   :  { %v228_v5 = vpop.f32.mrf.mxu3 }
 0x318   :  { %v229_v6 = vadd.f32 %v228_v5, %v207_v4  ;;  %v354_v5 = vld [vmem:[#allocation2 + $0x10] sm:$0xc0] }
 0x31a   :  { %v843_v7 = vmul.f32 -1.442695, %v229_v6 }
 0x31c   :  { %873 = vpow2.f32 %v843_v7  ;;  %v357_v7 = vrot.slane %v354_v5, 6 }
 0x322   :  { %v874_v8 = vpop.eup %873 }
 0x323   :  { %v235_v9 = vadd.f32 1.0, %v874_v8 }
 0x325   :  { %875 = vrcp.f32 %v235_v9  ;;  %v247_v14 = vand.u32 2147483648, %v235_v9  ;;  %v245_v16 = vand.u32 2147483647, %v235_v9  ;;  %vm241_vm1 = vweird.f32 %v235_v9 }
 0x326   :  { %877 = vtanh.f32 %v229_v6  ;;  %v355_v6 = vld [vmem:[#allocation2 + $0x8] sm:$0x3] }
 0x327   :  { %v248_v18 = vor.u32 1.1754944e-38, %v247_v14  ;;  %vm246_vm3 = vcmp.eq.f32.partialorder %v245_v16, 8.507059e+37  ;;  %v360_v8 = vrot.slane %v355_v6, 6 }
 0x32b   :  { %v876_v10 = vpop.eup %875 }
 0x32c   :  { %v237_v11 = vmul.f32 %v876_v10, %v235_v9  ;;  %vm242_vm0 = vweird.f32 %v876_v10  ;;  %v878_v20 = vpop.eup %877  ;;  %v362_v9 = vsel %vm125_vm6, %v357_v7, %v360_v8 }
 0x32d   :  { %vm243_vm2 = vmor %vm241_vm1, %vm242_vm0 }
 0x32e   :  { %v238_v12 = vsub.f32 1.0, %v237_v11 }
 0x330   :  { %v239_v15 = vmul.f32 %v876_v10, %v238_v12 }
 0x332   :  { %v240_v17 = vadd.f32 %v876_v10, %v239_v15 }
 0x334   :  { %v244_v19 = vsel %vm243_vm2, %v876_v10, %v240_v17 }
 0x335   :  { %v249_v21 = vsel %vm246_vm3, %v248_v18, %v244_v19 }
 0x336   :  { %v251_v22 = vsel %vm1065_vm10, %v878_v20, %v249_v21 }
 0x337   :  { %254 = vrot.lane.b32.xlu2 %v251_v22, %s935_s2  ;;  %v252_v25 = vmul.f32 %v251_v22, %v182_v56 }
 0x391   :  { %v255_v23 = vpop.permute.xlu2 %254 }
 0x392   :  { %v257_v24 = vmul.f32 %v255_v23, %v251_v22 }
 0x394   :  { %259 = vrot.lane.b32.xlu0 %v257_v24, %s936_s15 }
 0x406   :  { %v260_v26 = vpop.permute.xlu0 %259 }
 0x407   :  { %v262_v27 = vadd.f32 %v260_v26, %v252_v25 }
 0x409   :  { %879 = vtanh.f32 %v262_v27 }
 0x40f   :  { %v880_v28 = vpop.eup %879 }
 0x410   :  { %265 = vrot.lane.b32.xlu1 %v880_v28, %s935_s2 }
 0x482   :  { %v266_v29 = vpop.permute.xlu1 %265 }
 0x483   :  { %v268_v30 = vmul.f32 %v266_v29, %v251_v22 }
 0x485   :  { %273 = vrot.lane.b32.xlu0 %v268_v30, %s935_s2  ;;  %270 = vrot.lane.b32.xlu2 %v268_v30, %s936_s15 }
 0x4df   :  { %v271_v31 = vpop.permute.xlu2 %270 }
 0x4f7   :  { %v274_v32 = vpop.permute.xlu0 %273 }
 0x4f8   :  { %v276_v33 = vsel %vm196_vm14, %v271_v31, %v274_v32 }
 0x4f9   :  { %v277_v34 = vmul.f32 %v276_v33, %v1028_v13 }
 0x4fb   :  { %844 = vmatmul.msk.f32.vlgmr.msrb.gmra.mxu0 %vm127_vm15, %v277_v34 }
 0x578   :  { %v304_v39 = vpop.f32.mrf.mxu0 }
 0x579   :  { %v305_v40 = vadd.f32 %v304_v39, %v283_v38 }
 0x57b   :  { %v845_v41 = vmul.f32 -1.442695, %v305_v40 }
 0x57d   :  { %881 = vpow2.f32 %v845_v41  ;;  %v433_v41 = vld [vmem:[#allocation2 + $0x18] sm:$0x3] }
 0x583   :  { %v882_v42 = vpop.eup %881 }
 0x584   :  { %v311_v43 = vadd.f32 1.0, %v882_v42 }
 0x586   :  { %883 = vrcp.f32 %v311_v43  ;;  %v323_v48 = vand.u32 2147483648, %v311_v43  ;;  %v321_v50 = vand.u32 2147483647, %v311_v43  ;;  %vm317_vm5 = vweird.f32 %v311_v43 }
 0x587   :  { %885 = vtanh.f32 %v305_v40  ;;  %v434_v40 = vld [vmem:[#allocation2] sm:$0xc0] }
 0x588   :  { %v324_v52 = vor.u32 1.1754944e-38, %v323_v48  ;;  %vm322_vm8 = vcmp.eq.f32.partialorder %v321_v50, 8.507059e+37  ;;  %v436_v42 = vrot.slane %v434_v40, 4 }
 0x58c   :  { %v884_v44 = vpop.eup %883 }
 0x58d   :  { %v313_v46 = vmul.f32 %v884_v44, %v311_v43  ;;  %vm318_vm4 = vweird.f32 %v884_v44  ;;  %v886_v54 = vpop.eup %885  ;;  %v438_v43 = vsel %vm125_vm6, %v433_v41, %v436_v42 }
 0x58e   :  { %vm319_vm7 = vmor %vm317_vm5, %vm318_vm4 }
 0x58f   :  { %v314_v47 = vsub.f32 1.0, %v313_v46 }
 0x591   :  { %v315_v49 = vmul.f32 %v884_v44, %v314_v47 }
 0x593   :  { %v316_v51 = vadd.f32 %v884_v44, %v315_v49 }
 0x595   :  { %v320_v53 = vsel %vm319_vm7, %v884_v44, %v316_v51 }
 0x596   :  { %v325_v55 = vsel %vm322_vm8, %v324_v52, %v320_v53 }
 0x597   :  { %v327_v56 = vsel %vm1065_vm10, %v886_v54, %v325_v55 }
 0x598   :  { %330 = vrot.lane.b32.xlu1 %v327_v56, %s935_s2  ;;  %v328_v59 = vmul.f32 %v327_v56, %v262_v27 }
 0x60a   :  { %v331_v57 = vpop.permute.xlu1 %330 }
 0x60b   :  { %v333_v58 = vmul.f32 %v331_v57, %v327_v56 }
 0x60d   :  { %335 = vrot.lane.b32.xlu2 %v333_v58, %s936_s15 }
 0x667   :  { %v336_v60 = vpop.permute.xlu2 %335 }
 0x668   :  { %v338_v61 = vadd.f32 %v336_v60, %v328_v59 }
 0x66a   :  { %887 = vtanh.f32 %v338_v61 }
 0x670   :  { %v888_v62 = vpop.eup %887 }
 0x671   :  { %341 = vrot.lane.b32.xlu0 %v888_v62, %s935_s2 }
 0x6e3   :  { %v342_v63 = vpop.permute.xlu0 %341 }
 0x6e4   :  { %v344_v0 = vmul.f32 %v342_v63, %v327_v56 }
 0x6e6   :  { %349 = vrot.lane.b32.xlu2 %v344_v0, %s935_s2  ;;  %346 = vrot.lane.b32.xlu1 %v344_v0, %s936_s15 }
 0x740   :  { %v350_v1 = vpop.permute.xlu2 %349 }
 0x758   :  { %v347_v2 = vpop.permute.xlu1 %346 }
 0x759   :  { %v352_v3 = vsel %vm196_vm14, %v347_v2, %v350_v1 }
 0x75a   :  { %v353_v4 = vmul.f32 %v352_v3, %v1028_v13 }
 0x75c   :  { %846 = vmatmul.msk.f32.vlgmr.msrb.gmra.mxu1 %vm127_vm15, %v353_v4 }
 0x7d9   :  { %v383_v10 = vpop.f32.mrf.mxu1 }
 0x7da   :  { %v384_v11 = vadd.f32 %v383_v10, %v362_v9  ;;  %v509_v10 = vld [vmem:[#allocation2 + $0x18] sm:$0xc] }
 0x7dc   :  { %v847_v12 = vmul.f32 -1.442695, %v384_v11 }
 0x7de   :  { %889 = vpow2.f32 %v847_v12  ;;  %v512_v12 = vrot.slane %v509_v10, 2 }
 0x7e4   :  { %v890_v14 = vpop.eup %889 }
 0x7e5   :  { %v390_v15 = vadd.f32 1.0, %v890_v14 }
 0x7e7   :  { %891 = vrcp.f32 %v390_v15  ;;  %v402_v19 = vand.u32 2147483648, %v390_v15  ;;  %v400_v21 = vand.u32 2147483647, %v390_v15  ;;  %vm396_vm11 = vweird.f32 %v390_v15 }
 0x7e8   :  { %893 = vtanh.f32 %v384_v11  ;;  %v510_v11 = vld [vmem:[#allocation2] sm:$0x30] }
 0x7e9   :  { %v403_v23 = vor.u32 1.1754944e-38, %v402_v19  ;;  %vm401_vm13 = vcmp.eq.f32.partialorder %v400_v21, 8.507059e+37  ;;  %v515_v14 = vrot.slane %v510_v11, 2 }
 0x7ed   :  { %v892_v16 = vpop.eup %891 }
 0x7ee   :  { %v392_v17 = vmul.f32 %v892_v16, %v390_v15  ;;  %vm397_vm9 = vweird.f32 %v892_v16  ;;  %v894_v25 = vpop.eup %893  ;;  %v517_v15 = vsel %vm125_vm6, %v512_v12, %v515_v14 }
 0x7ef   :  { %vm398_vm12 = vmor %vm396_vm11, %vm397_vm9 }
 0x7f0   :  { %v393_v18 = vsub.f32 1.0, %v392_v17 }
 0x7f2   :  { %v394_v20 = vmul.f32 %v892_v16, %v393_v18 }
 0x7f4   :  { %v395_v22 = vadd.f32 %v892_v16, %v394_v20 }
 0x7f6   :  { %v399_v24 = vsel %vm398_vm12, %v892_v16, %v395_v22 }
 0x7f7   :  { %v404_v26 = vsel %vm401_vm13, %v403_v23, %v399_v24 }
 0x7f8   :  { %v406_v27 = vsel %vm1065_vm10, %v894_v25, %v404_v26 }
 0x7f9   :  { %409 = vrot.lane.b32.xlu0 %v406_v27, %s935_s2  ;;  %v407_v30 = vmul.f32 %v406_v27, %v338_v61 }
 0x86b   :  { %v410_v28 = vpop.permute.xlu0 %409 }
 0x86c   :  { %v412_v29 = vmul.f32 %v410_v28, %v406_v27 }
 0x86e   :  { %414 = vrot.lane.b32.xlu1 %v412_v29, %s936_s15 }
 0x8e0   :  { %v415_v31 = vpop.permute.xlu1 %414 }
 0x8e1   :  { %v417_v32 = vadd.f32 %v415_v31, %v407_v30 }
 0x8e3   :  { %895 = vtanh.f32 %v417_v32 }
 0x8e9   :  { %v896_v33 = vpop.eup %895 }
 0x8ea   :  { %420 = vrot.lane.b32.xlu2 %v896_v33, %s935_s2 }
 0x944   :  { %v421_v34 = vpop.permute.xlu2 %420 }
 0x945   :  { %v423_v35 = vmul.f32 %v421_v34, %v406_v27 }
 0x947   :  { %428 = vrot.lane.b32.xlu1 %v423_v35, %s935_s2  ;;  %425 = vrot.lane.b32.xlu0 %v423_v35, %s936_s15 }
 0x9b9   :  { %v429_v36 = vpop.permute.xlu1 %428  ;;  %v426_v37 = vpop.permute.xlu0 %425 }
 0x9ba   :  { %v431_v38 = vsel %vm196_vm14, %v426_v37, %v429_v36 }
 0x9bb   :  { %v432_v39 = vmul.f32 %v431_v38, %v1028_v13 }
 0x9bd   :  { %848 = vmatmul.msk.f32.vlgmr.msrb.gmra.mxu2 %vm127_vm15, %v432_v39 }
 0xa40   :  { %v459_v44 = vpop.f32.mrf.mxu2 }
 0xa41   :  { %v460_v46 = vadd.f32 %v459_v44, %v438_v43 }
 0xa43   :  { %v849_v47 = vmul.f32 -1.442695, %v460_v46 }
 0xa45   :  { %897 = vpow2.f32 %v849_v47 }
 0xa4b   :  { %v898_v48 = vpop.eup %897 }
 0xa4c   :  { %v466_v49 = vadd.f32 1.0, %v898_v48  ;;  %v589_v48 = vld [vmem:[#allocation2] sm:$0xc] }
 0xa4e   :  { %899 = vrcp.f32 %v466_v49  ;;  %v478_v53 = vand.u32 2147483648, %v466_v49  ;;  %v476_v55 = vand.u32 2147483647, %v466_v49  ;;  %vm472_vm1 = vweird.f32 %v466_v49 }
 0xa4f   :  { %901 = vtanh.f32 %v460_v46  ;;  %v588_v46 = vld [vmem:[#allocation2 + $0x18] sm:$0x30] }
 0xa50   :  { %v479_v57 = vor.u32 1.1754944e-38, %v478_v53  ;;  %vm477_vm3 = vcmp.eq.f32.partialorder %v476_v55, 8.507059e+37  ;;  %v591_v47 = vrot.slane %v588_v46, 4 }
 0xa54   :  { %v900_v50 = vpop.eup %899 }
 0xa55   :  { %v468_v51 = vmul.f32 %v900_v50, %v466_v49  ;;  %vm473_vm0 = vweird.f32 %v900_v50  ;;  %v902_v59 = vpop.eup %901  ;;  %v593_v49 = vsel %vm125_vm6, %v591_v47, %v589_v48  ;;  %v796_v47 = vld [vmem:[%s1223_s6 + $0x20] sm:$0xff]  ;;  %v795_v48 = vld [vmem:[%s1223_s6 + $0x18] sm:$0xff] }
 0xa56   :  { %vm474_vm2 = vmor %vm472_vm1, %vm473_vm0 }
 0xa57   :  { %v469_v52 = vsub.f32 1.0, %v468_v51 }
 0xa59   :  { %v470_v54 = vmul.f32 %v900_v50, %v469_v52 }
 0xa5b   :  { %v471_v56 = vadd.f32 %v900_v50, %v470_v54 }
 0xa5d   :  { %v475_v58 = vsel %vm474_vm2, %v900_v50, %v471_v56 }
 0xa5e   :  { %v480_v60 = vsel %vm477_vm3, %v479_v57, %v475_v58 }
 0xa5f   :  { %v482_v61 = vsel %vm1065_vm10, %v902_v59, %v480_v60 }
 0xa60   :  { %485 = vrot.lane.b32.xlu2 %v482_v61, %s935_s2  ;;  %v483_v0 = vmul.f32 %v482_v61, %v417_v32 }
 0xaba   :  { %v486_v62 = vpop.permute.xlu2 %485 }
 0xabb   :  { %v488_v63 = vmul.f32 %v486_v62, %v482_v61 }
 0xabd   :  { %490 = vrot.lane.b32.xlu0 %v488_v63, %s936_s15 }
 0xb2f   :  { %v491_v1 = vpop.permute.xlu0 %490 }
 0xb30   :  { %v493_v2 = vadd.f32 %v491_v1, %v483_v0 }
 0xb32   :  { %903 = vtanh.f32 %v493_v2 }
 0xb38   :  { %v904_v3 = vpop.eup %903 }
 0xb39   :  { %496 = vrot.lane.b32.xlu1 %v904_v3, %s935_s2 }
 0xbab   :  { %v497_v4 = vpop.permute.xlu1 %496 }
 0xbac   :  { %v499_v5 = vmul.f32 %v497_v4, %v482_v61 }
 0xbae   :  { %504 = vrot.lane.b32.xlu0 %v499_v5, %s935_s2  ;;  %501 = vrot.lane.b32.xlu2 %v499_v5, %s936_s15 }
 0xc08   :  { %v502_v6 = vpop.permute.xlu2 %501 }
 0xc20   :  { %v505_v7 = vpop.permute.xlu0 %504 }
 0xc21   :  { %v507_v8 = vsel %vm196_vm14, %v502_v6, %v505_v7 }
 0xc22   :  { %v508_v9 = vmul.f32 %v507_v8, %v1028_v13 }
 0xc24   :  { %850 = vmatmul.msk.f32.vlgmr.msrb.gmra.mxu3 %vm127_vm15, %v508_v9 }
 0xca7   :  { %v538_v16 = vpop.f32.mrf.mxu3 }
 0xca8   :  { %v539_v17 = vadd.f32 %v538_v16, %v517_v15  ;;  %v664_v16 = vld [vmem:[#allocation2 + $0x18] sm:$0xc0] }
 0xcaa   :  { %v851_v18 = vmul.f32 -1.442695, %v539_v17 }
 0xcac   :  { %905 = vpow2.f32 %v851_v18  ;;  %v667_v18 = vrot.slane %v664_v16, 6 }
 0xcb2   :  { %v906_v19 = vpop.eup %905 }
 0xcb3   :  { %v545_v20 = vadd.f32 1.0, %v906_v19 }
 0xcb5   :  { %907 = vrcp.f32 %v545_v20  ;;  %v557_v24 = vand.u32 2147483648, %v545_v20  ;;  %v555_v26 = vand.u32 2147483647, %v545_v20  ;;  %vm551_vm5 = vweird.f32 %v545_v20 }
 0xcb6   :  { %909 = vtanh.f32 %v539_v17  ;;  %v665_v17 = vld [vmem:[#allocation2] sm:$0x3] }
 0xcb7   :  { %v558_v28 = vor.u32 1.1754944e-38, %v557_v24  ;;  %vm556_vm8 = vcmp.eq.f32.partialorder %v555_v26, 8.507059e+37  ;;  %v670_v19 = vrot.slane %v665_v17, 6 }
 0xcbb   :  { %v908_v21 = vpop.eup %907 }
 0xcbc   :  { %v547_v22 = vmul.f32 %v908_v21, %v545_v20  ;;  %vm552_vm4 = vweird.f32 %v908_v21  ;;  %v910_v30 = vpop.eup %909  ;;  %v672_v20 = vsel %vm125_vm6, %v667_v18, %v670_v19 }
 0xcbd   :  { %vm553_vm7 = vmor %vm551_vm5, %vm552_vm4 }
 0xcbe   :  { %v548_v23 = vsub.f32 1.0, %v547_v22 }
 0xcc0   :  { %v549_v25 = vmul.f32 %v908_v21, %v548_v23 }
 0xcc2   :  { %v550_v27 = vadd.f32 %v908_v21, %v549_v25 }
 0xcc4   :  { %v554_v29 = vsel %vm553_vm7, %v908_v21, %v550_v27 }
 0xcc5   :  { %v559_v31 = vsel %vm556_vm8, %v558_v28, %v554_v29 }
 0xcc6   :  { %v561_v32 = vsel %vm1065_vm10, %v910_v30, %v559_v31 }
 0xcc7   :  { %564 = vrot.lane.b32.xlu1 %v561_v32, %s935_s2  ;;  %v562_v35 = vmul.f32 %v561_v32, %v493_v2 }
 0xd39   :  { %v565_v33 = vpop.permute.xlu1 %564 }
 0xd3a   :  { %v567_v34 = vmul.f32 %v565_v33, %v561_v32 }
 0xd3c   :  { %569 = vrot.lane.b32.xlu2 %v567_v34, %s936_s15 }
 0xd96   :  { %v570_v36 = vpop.permute.xlu2 %569 }
 0xd97   :  { %v572_v37 = vadd.f32 %v570_v36, %v562_v35 }
 0xd99   :  { %911 = vtanh.f32 %v572_v37 }
 0xd9f   :  { %v912_v38 = vpop.eup %911 }
 0xda0   :  { %575 = vrot.lane.b32.xlu0 %v912_v38, %s935_s2 }
 0xe12   :  { %v576_v39 = vpop.permute.xlu0 %575 }
 0xe13   :  { %v578_v40 = vmul.f32 %v576_v39, %v561_v32 }
 0xe15   :  { %583 = vrot.lane.b32.xlu2 %v578_v40, %s935_s2  ;;  %580 = vrot.lane.b32.xlu1 %v578_v40, %s936_s15  ;;  %v799_v40 = vld [vmem:[%s1223_s6 + $0x38] sm:$0xff] }
 0xe16   :  { %815 = vmatpush.msra.mxu3 %v799_v40 }
 0xe6f   :  { %v584_v41 = vpop.permute.xlu2 %583 }
 0xe87   :  { %v581_v42 = vpop.permute.xlu1 %580 }
 0xe88   :  { %v586_v43 = vsel %vm196_vm14, %v581_v42, %v584_v41  ;;  %v798_v41 = vld [vmem:[%s1223_s6 + $0x30] sm:$0xff] }
 0xe89   :  { %v587_v44 = vmul.f32 %v586_v43, %v1028_v13  ;;  %816 = vmatpush.msra.mxu3 %v798_v41 }
 0xe8b   :  { %852 = vmatmul.msk.f32.vlgmr.msra.gmra.mxu0 %vm127_vm15, %v587_v44  ;;  %817 = vmatpush.msra.mxu3 %v797_v45 }
 0xe8d   :  { %818 = vmatpush.msra.mxu3 %v796_v47 }
 0xe8f   :  { %819 = vmatpush.msra.mxu3 %v795_v48 }
 0xf08   :  { %v614_v50 = vpop.f32.mrf.mxu0 }
 0xf09   :  { %v615_v51 = vadd.f32 %v614_v50, %v593_v49  ;;  %v794_v49 = vld [vmem:[%s1223_s6 + $0x10] sm:$0xff]  ;;  %v793_v50 = vld [vmem:[%s1223_s6 + $0x8] sm:$0xff] }
 0xf0a   :  { %820 = vmatpush.msra.mxu3 %v794_v49 }
 0xf0b   :  { %v853_v52 = vmul.f32 -1.442695, %v615_v51 }
 0xf0c   :  { %821 = vmatpush.msra.mxu3 %v793_v50 }
 0xf0d   :  { %913 = vpow2.f32 %v853_v52 }
 0xf13   :  { %v914_v53 = vpop.eup %913 }
 0xf14   :  { %v621_v54 = vadd.f32 1.0, %v914_v53 }
 0xf16   :  { %915 = vrcp.f32 %v621_v54  ;;  %v633_v58 = vand.u32 2147483648, %v621_v54  ;;  %v631_v60 = vand.u32 2147483647, %v621_v54  ;;  %vm627_vm11 = vweird.f32 %v621_v54 }
 0xf17   :  { %917 = vtanh.f32 %v615_v51  ;;  %v792_v51 = vld [vmem:[%s1223_s6] sm:$0xff] }
 0xf18   :  { %v634_v62 = vor.u32 1.1754944e-38, %v633_v58  ;;  %vm632_vm13 = vcmp.eq.f32.partialorder %v631_v60, 8.507059e+37  ;;  %822 = vmatpush.msra.mxu3 %v792_v51  ;;  %v760_v58 = vld [vmem:[%s1226_s4 + $0x30] sm:$0xff]  ;;  %v758_v60 = vld [vmem:[%s1226_s4 + $0x20] sm:$0xff] }
 0xf1c   :  { %v916_v55 = vpop.eup %915 }
 0xf1d   :  { %v623_v56 = vmul.f32 %v916_v55, %v621_v54  ;;  %vm628_vm9 = vweird.f32 %v916_v55  ;;  %v918_v0 = vpop.eup %917 }
 0xf1e   :  { %vm629_vm12 = vmor %vm627_vm11, %vm628_vm9 }
 0xf1f   :  { %v624_v57 = vsub.f32 1.0, %v623_v56 }
 0xf21   :  { %v625_v59 = vmul.f32 %v916_v55, %v624_v57  ;;  %v761_v57 = vld [vmem:[%s1226_s4 + $0x38] sm:$0xff] }
 0xf22   :  { %777 = vmatpush.msra.mxu2 %v761_v57 }
 0xf23   :  { %v626_v61 = vadd.f32 %v916_v55, %v625_v59  ;;  %v759_v59 = vld [vmem:[%s1226_s4 + $0x28] sm:$0xff] }
 0xf24   :  { %778 = vmatpush.msra.mxu2 %v760_v58 }
 0xf25   :  { %v630_v63 = vsel %vm629_vm12, %v916_v55, %v626_v61  ;;  %v757_v61 = vld [vmem:[%s1226_s4 + $0x18] sm:$0xff] }
 0xf26   :  { %v635_v1 = vsel %vm632_vm13, %v634_v62, %v630_v63  ;;  %779 = vmatpush.msra.mxu2 %v759_v59  ;;  %v756_v62 = vld [vmem:[%s1226_s4 + $0x10] sm:$0xff]  ;;  %v755_v63 = vld [vmem:[%s1226_s4 + $0x8] sm:$0xff] }
 0xf27   :  { %v637_v2 = vsel %vm1065_vm10, %v918_v0, %v635_v1  ;;  %v754_v0 = vld [vmem:[%s1226_s4] sm:$0xff] }
 0xf28   :  { %640 = vrot.lane.b32.xlu0 %v637_v2, %s935_s2  ;;  %v638_v5 = vmul.f32 %v637_v2, %v572_v37  ;;  %780 = vmatpush.msra.mxu2 %v758_v60 }
 0xf2a   :  { %781 = vmatpush.msra.mxu2 %v757_v61 }
 0xf2c   :  { %782 = vmatpush.msra.mxu2 %v756_v62 }
 0xf2e   :  { %783 = vmatpush.msra.mxu2 %v755_v63 }
 0xf30   :  { %784 = vmatpush.msra.mxu2 %v754_v0 }
 0xf9a   :  { %v641_v3 = vpop.permute.xlu0 %640 }
 0xf9b   :  { %v643_v4 = vmul.f32 %v641_v3, %v637_v2 }
 0xf9d   :  { %645 = vrot.lane.b32.xlu1 %v643_v4, %s936_s15 }
0x100f   :  { %v646_v6 = vpop.permute.xlu1 %645 }
0x1010   :  { %v648_v7 = vadd.f32 %v646_v6, %v638_v5 }
0x1012   :  { %919 = vtanh.f32 %v648_v7 }
0x1018   :  { %v920_v8 = vpop.eup %919 }
0x1019   :  { %651 = vrot.lane.b32.xlu2 %v920_v8, %s935_s2 }
0x1073   :  { %v652_v9 = vpop.permute.xlu2 %651 }
0x1074   :  { %v654_v10 = vmul.f32 %v652_v9, %v637_v2 }
0x1076   :  { %659 = vrot.lane.b32.xlu1 %v654_v10, %s935_s2  ;;  %656 = vrot.lane.b32.xlu0 %v654_v10, %s936_s15 }
0x10e8   :  { %v660_v11 = vpop.permute.xlu1 %659  ;;  %v657_v12 = vpop.permute.xlu0 %656 }
0x10e9   :  { %v662_v14 = vsel %vm196_vm14, %v657_v12, %v660_v11 }
0x10ea   :  { %v663_v15 = vmul.f32 %v662_v14, %v1028_v13 }
0x10ec   :  { %854 = vmatmul.msk.f32.vlgmr.msra.gmra.mxu1 %vm127_vm15, %v663_v15 }
0x1169   :  { %v693_v21 = vpop.f32.mrf.mxu1 }
0x116a   :  { %v694_v22 = vadd.f32 %v693_v21, %v672_v20 }
0x116c   :  { %v855_v23 = vmul.f32 -1.442695, %v694_v22 }
0x116e   :  { %921 = vpow2.f32 %v855_v23 }
0x1174   :  { %v922_v24 = vpop.eup %921 }
0x1175   :  { %v700_v25 = vadd.f32 1.0, %v922_v24 }
0x1177   :  { %923 = vrcp.f32 %v700_v25  ;;  %v712_v29 = vand.u32 2147483648, %v700_v25  ;;  %v710_v31 = vand.u32 2147483647, %v700_v25  ;;  %vm706_vm1 = vweird.f32 %v700_v25 }
0x1178   :  { %925 = vtanh.f32 %v694_v22 }
0x1179   :  { %v713_v33 = vor.u32 1.1754944e-38, %v712_v29  ;;  %vm711_vm6 = vcmp.eq.f32.partialorder %v710_v31, 8.507059e+37 }
0x117d   :  { %v924_v26 = vpop.eup %923 }
0x117e   :  { %v702_v27 = vmul.f32 %v924_v26, %v700_v25  ;;  %vm707_vm0 = vweird.f32 %v924_v26  ;;  %v926_v35 = vpop.eup %925 }
0x117f   :  { %vm708_vm2 = vmor %vm706_vm1, %vm707_vm0 }
0x1180   :  { %v703_v28 = vsub.f32 1.0, %v702_v27 }
0x1182   :  { %v704_v30 = vmul.f32 %v924_v26, %v703_v28 }
0x1184   :  { %v705_v32 = vadd.f32 %v924_v26, %v704_v30 }
0x1186   :  { %v709_v34 = vsel %vm708_vm2, %v924_v26, %v705_v32 }
0x1187   :  { %v714_v36 = vsel %vm711_vm6, %v713_v33, %v709_v34 }
0x1188   :  { %v716_v37 = vsel %vm1065_vm10, %v926_v35, %v714_v36  ;;  %vm790_vm10 = vcmask 254976  }
0x1189   :  { %719 = vrot.lane.b32.xlu2 %v716_v37, %s935_s2  ;;  %v717_v42 = vmul.f32 %v716_v37, %v648_v7  ;;  %v863_v7 = vld [vmem:[%s1224_s7] ss:$0 sm:$0xff] }
0x11e3   :  { %v720_v38 = vpop.permute.xlu2 %719 }
0x11e4   :  { %v722_v39 = vmul.f32 %v720_v38, %v716_v37 }
0x11e6   :  { %724 = vrot.lane.b32.xlu0 %v722_v39, %s936_s15 }
0x1258   :  { %v725_v43 = vpop.permute.xlu0 %724 }
0x1259   :  { %v727_v44 = vadd.f32 %v725_v43, %v717_v42 }
0x125b   :  { %927 = vtanh.f32 %v727_v44  ;;  %v751_v54 = vrot.slane %v727_v44, 2 }
0x1261   :  { %v928_v46 = vpop.eup %927 }
0x1262   :  { %730 = vrot.lane.b32.xlu1 %v928_v46, %s935_s2 }
0x126a   :  { %748 = vrot.lane.b32.xlu1 %v727_v44, %s937_s22 }
0x12d4   :  { %v731_v52 = vpop.permute.xlu1 %730 }
0x12d5   :  { %v733_v53 = vmul.f32 %v731_v52, %v716_v37 }
0x12d7   :  { %738 = vrot.lane.b32.xlu0 %v733_v53, %s935_s2  ;;  %735 = vrot.lane.b32.xlu2 %v733_v53, %s936_s15 }
0x12dc   :  { %v749_v55 = vpop.permute.xlu1 %748 }
0x12dd   :  { %v753_v56 = vsel %vm196_vm14, %v749_v55, %v751_v54 }
0x12de   :  { %857 = vmatmul.msk.f32.vlgmr.msra.gmra.mxu3 %vm127_vm15, %v753_v56 }
0x1331   :  { %v736_v1 = vpop.permute.xlu2 %735 }
0x1349   :  { %v739_v2 = vpop.permute.xlu0 %738 }
0x134a   :  { %v741_v3 = vsel %vm196_vm14, %v736_v1, %v739_v2 }
0x134b   :  { %v742_v4 = vmul.f32 %v741_v3, %v1028_v13  ;;  %v864_v13 = vld [vmem:[%s1225_s5] ss:$0 sm:$0xff] }
0x134d   :  { %v744_v5 = vrot.slane %v742_v4, 2 }
0x134f   :  { %v746_v6 = vsel %vm196_vm14, %v742_v4, %v744_v5 }
0x1350   :  { %856 = vmatmul.msk.f32.vlgmr.msra.gmra.mxu2 %vm127_vm15, %v746_v6 }
0x1361   :  { %v824_v8 = vpop.f32.mrf.mxu3 }
0x1362   :  { %v825_v9 = vadd.f32 %v863_v7, %v824_v8 }
0x1364   :  { %929 = vtanh.f32 %v825_v9 }
0x136a   :  { %v930_v10 = vpop.eup %929 }
0x136b   :  { %828 = vst.msk [vmem:[%s1227_s9] sm:$0x3] %vm790_vm10, %v930_v10 }
0x13d3   :  { %v786_v11 = vpop.f32.mrf.mxu2 }
0x13d4   :  { %v787_v12 = vadd.f32 %v864_v13, %v786_v11 }
0x13d6   :  { %931 = vtanh.f32 %v787_v12 }
0x13dc   :  { %v932_v14 = vpop.eup %931 }
0x13dd   :  { %791 = vst.msk [vmem:[%s1228_s8] sm:$0x3] %vm790_vm10, %v932_v14 }

// kernel: seq2seq_forward.3
= control target key start
LH: loop header
LB: loop body
LE: loop exit
PB: predicated region body
PF: predicated region fallthrough
CT: control target
= control target key end

     0   :  { %vm48_vm0 = vcmask 130048   ;;  %s1965_s0 = inlined_call_operand.vmem [shape: f32[2,32], index: 0, kind: input, shape index: {}]   ;;  %s1966_s1 = inlined_call_operand.vmem [shape: f32[2,32], index: 1, kind: input, shape index: {}]   ;;  %s1967_s2 = inlined_call_operand.vmem [shape: f32[128,16], index: 2, kind: input, shape index: {}]   ;;  %s1968_s3 = inlined_call_operand.vmem [shape: f32[16,128], index: 3, kind: input, shape index: {}]   ;;  %s1969_s4 = inlined_call_operand.vmem [shape: f32[32,128], index: 4, kind: input, shape index: {}]   ;;  %s1970_s5 = inlined_call_operand.vmem [shape: f32[2,128], index: 5, kind: input, shape index: {}]   ;;  %s1971_s6 = inlined_call_operand.vmem [shape: f32[32,128], index: 6, kind: input, shape index: {}]   ;;  %s1972_s7 = inlined_call_operand.vmem [shape: f32[2,128], index: 7, kind: input, shape index: {}]   ;;  %s1973_s8 = inlined_call_operand.hbm [shape: f32[16,128], index: 8, kind: output, shape index: {}]  }
   0x1   :  { %v47_v0 = vld [vmem:[%s1968_s3 + $0x8] sm:$0xff]  ;;  %v46_v1 = vld [vmem:[%s1968_s3] sm:$0xff] }
   0x2   :  { %111 = vmatpush.msra.mxu0 %v47_v0  ;;  %v30_v2 = vld [vmem:[%s1967_s2] sm:$0xff] }
   0x3   :  { %13 = vsyncpa [#allocation3], 0  ;;  %v31_v3 = vld [vmem:[%s1967_s2 + $0x8] sm:$0xff]  ;;  %v32_v4 = vld [vmem:[%s1967_s2 + $0x10] sm:$0xff]  ;;  %vm182_vm1 = vcmask 261120   ;;  %v172_v43 = vlaneseq  ;;  %v1372_v45 = vmov 1.0  }
   0x4   :  { %112 = vmatpush.msra.mxu0 %v46_v1  ;;  %v33_v5 = vld [vmem:[%s1967_s2 + $0x18] sm:$0xff]  ;;  %v34_v6 = vld [vmem:[%s1967_s2 + $0x20] sm:$0xff]  ;;  %v35_v7 = vld [vmem:[%s1967_s2 + $0x28] sm:$0xff]  ;;  %s1373_s13 = smov 64   ;;  %s1374_s15 = smov 32   ;;  %vm295_vm10 = vcmask 1041408  }
   0x5   :  { %1210 = vmatmul.msk.f32.vlgmr.msra.gmra.mxu0 %vm48_vm0, %v30_v2  ;;  %v36_v8 = vld [vmem:[%s1967_s2 + $0x30] sm:$0xff]  ;;  %v37_v9 = vld [vmem:[%s1967_s2 + $0x38] sm:$0xff]  ;;  %v38_v10 = vld [vmem:[%s1967_s2 + $0x40] sm:$0xff]  ;;  %v1623_v44 = vand.u32 127, %v172_v43  ;;  %s1198_s12 = sshll.u32 %s1973_s8, 4  ;;  %s1199_s12 = int_to_ptr.hbm [resolvable:$true] %s1198_s12 }
   0x6   :  { %v39_v11 = vld [vmem:[%s1967_s2 + $0x48] sm:$0xff]  ;;  %v40_v12 = vld [vmem:[%s1967_s2 + $0x50] sm:$0xff]  ;;  %v41_v13 = vld [vmem:[%s1967_s2 + $0x58] sm:$0xff] }
   0x7   :  { %v42_v14 = vld [vmem:[%s1967_s2 + $0x60] sm:$0xff]  ;;  %v43_v15 = vld [vmem:[%s1967_s2 + $0x68] sm:$0xff]  ;;  %v44_v16 = vld [vmem:[%s1967_s2 + $0x70] sm:$0xff]  ;;  %vm177_vm2 = vcmp.eq.s32.totalorder %v1623_v44, 0  ;;  %vm174_vm3 = vcmp.ge.s32.totalorder %v1623_v44, 64  ;;  %vm175_vm4 = vcmp.lt.s32.totalorder %v1623_v44, 96 }
   0x8   :  { %v45_v17 = vld [vmem:[%s1967_s2 + $0x78] sm:$0xff]  ;;  %v1523_v30 = vld [vmem:[%s1971_s6 + $0x10] sm:$0xff]  ;;  %v1529_v31 = vld [vmem:[%s1971_s6 + $0x8] sm:$0xff] }
   0x9   :  { %v1518_v29 = vld [vmem:[%s1971_s6 + $0x18] sm:$0xff]  ;;  %v1536_v32 = vld [vmem:[%s1971_s6] sm:$0xff]  ;;  %v1558_v39 = vld [vmem:[%s1969_s4 + $0x10] sm:$0xff] }
   0xa   :  { %286 = vmatpush.msra.mxu3 %v1518_v29  ;;  %v1550_v37 = vld [vmem:[%s1969_s4 + $0x18] sm:$0xff]  ;;  %v1565_v40 = vld [vmem:[%s1969_s4 + $0x8] sm:$0xff]  ;;  %v1574_v41 = vld [vmem:[%s1969_s4] sm:$0xff] }
   0xb   :  { %198 = vmatpush.msra.mxu1 %v1550_v37  ;;  %v180_v42 = vld [vmem:[%s1965_s0] sm:$0x3]  ;;  %vm1653_vm6 = vmand %vm174_vm3, %vm175_vm4 }
   0xc   :  { %287 = vmatpush.msra.mxu3 %v1523_v30  ;;  %v1648_v47 = vld [vmem:[%s1970_s5] sm:$0x3] }
   0xd   :  { %1211 = vmatmul.msk.f32.gmra.mxu0 %vm48_vm0, %v31_v3  ;;  %199 = vmatpush.msra.mxu1 %v1558_v39  ;;  %v181_v3 = vld [vmem:[%s1966_s1] sm:$0x3] }
   0xe   :  { %288 = vmatpush.msra.mxu3 %v1529_v31 }
   0xf   :  { %200 = vmatpush.msra.mxu1 %v1565_v40 }
  0x10   :  { %289 = vmatpush.msra.mxu3 %v1536_v32 }
  0x11   :  { %201 = vmatpush.msra.mxu1 %v1574_v41 }
  0x12   :  { %1227 = vmatmul.msk.f32.vlgmr.msra.gmra.mxu1 %vm182_vm1, %v180_v42 }
  0x13   :  { %331 = vmatpush.msrb.mxu1 %v1550_v37 }
  0x15   :  { %1212 = vmatmul.msk.f32.gmra.mxu0 %vm48_vm0, %v32_v4  ;;  %332 = vmatpush.msrb.mxu1 %v1558_v39 }
  0x17   :  { %333 = vmatpush.msrb.mxu1 %v1565_v40 }
  0x19   :  { %334 = vmatpush.msrb.mxu1 %v1574_v41 }
  0x1b   :  { %415 = vmatpush.msra.mxu1 %v1518_v29 }
  0x1d   :  { %1213 = vmatmul.msk.f32.gmra.mxu0 %vm48_vm0, %v33_v5  ;;  %416 = vmatpush.msra.mxu1 %v1523_v30 }
  0x1f   :  { %417 = vmatpush.msra.mxu1 %v1529_v31 }
  0x21   :  { %418 = vmatpush.msra.mxu1 %v1536_v32 }
  0x25   :  { %1214 = vmatmul.msk.f32.gmra.mxu0 %vm48_vm0, %v34_v6 }
  0x2d   :  { %1215 = vmatmul.msk.f32.gmra.mxu0 %vm48_vm0, %v35_v7 }
  0x35   :  { %1216 = vmatmul.msk.f32.gmra.mxu0 %vm48_vm0, %v36_v8 }
  0x3d   :  { %1217 = vmatmul.msk.f32.gmra.mxu0 %vm48_vm0, %v37_v9 }
  0x45   :  { %1218 = vmatmul.msk.f32.gmra.mxu0 %vm48_vm0, %v38_v10 }
  0x4d   :  { %1219 = vmatmul.msk.f32.gmra.mxu0 %vm48_vm0, %v39_v11 }
  0x55   :  { %1220 = vmatmul.msk.f32.gmra.mxu0 %vm48_vm0, %v40_v12 }
  0x5d   :  { %1221 = vmatmul.msk.f32.gmra.mxu0 %vm48_vm0, %v41_v13 }
  0x65   :  { %1222 = vmatmul.msk.f32.gmra.mxu0 %vm48_vm0, %v42_v14  ;;  %v1695_v14 = vld [vmem:[%s1972_s7] sm:$0x3] }
  0x6d   :  { %1223 = vmatmul.msk.f32.gmra.mxu0 %vm48_vm0, %v43_v15 }
  0x75   :  { %1224 = vmatmul.msk.f32.gmra.mxu0 %vm48_vm0, %v44_v16 }
  0x7d   :  { %1225 = vmatmul.msk.f32.gmra.mxu0 %vm48_vm0, %v45_v17 }
  0x82   :  { %v1493_v18 = vpop.f32.mrf.mxu0 }
  0x8a   :  { %v1495_v19 = vpop.f32.mrf.mxu0 }
  0x8f   :  { %v203_v46 = vpop.f32.mrf.mxu1 }
  0x92   :  { %v1497_v20 = vpop.f32.mrf.mxu0 }
  0x9a   :  { %v1499_v21 = vpop.f32.mrf.mxu0 }
  0xa2   :  { %v1501_v22 = vpop.f32.mrf.mxu0 }
  0xaa   :  { %v1503_v23 = vpop.f32.mrf.mxu0 }
  0xb2   :  { %v1505_v24 = vpop.f32.mrf.mxu0 }
  0xba   :  { %v1507_v25 = vpop.f32.mrf.mxu0 }
  0xc2   :  { %v1509_v26 = vpop.f32.mrf.mxu0 }
  0xca   :  { %v1511_v27 = vpop.f32.mrf.mxu0 }
  0xd2   :  { %v1513_v28 = vpop.f32.mrf.mxu0 }
  0xda   :  { %v1538_v33 = vpop.f32.mrf.mxu0 }
  0xe2   :  { %v1541_v34 = vpop.f32.mrf.mxu0 }
  0xea   :  { %v1543_v35 = vpop.f32.mrf.mxu0 }
  0xf2   :  { %v1545_v36 = vpop.f32.mrf.mxu0 }
  0xfa   :  { %v1553_v38 = vpop.f32.mrf.mxu0 }
  0xfb   :  { %206 = vmatpush.msra.mxu2 %v1553_v38  ;;  %339 = vmatpush.msrb.mxu3 %v1553_v38 }
  0xfc   :  { %1107 = vmatpush.msrb.mxu0 %v1553_v38 }
  0xfd   :  { %207 = vmatpush.msra.mxu2 %v1545_v36  ;;  %340 = vmatpush.msrb.mxu3 %v1545_v36 }
  0xfe   :  { %1108 = vmatpush.msrb.mxu0 %v1545_v36 }
  0xff   :  { %208 = vmatpush.msra.mxu2 %v1543_v35  ;;  %341 = vmatpush.msrb.mxu3 %v1543_v35 }
 0x100   :  { %1109 = vmatpush.msrb.mxu0 %v1543_v35 }
 0x101   :  { %209 = vmatpush.msra.mxu2 %v1541_v34  ;;  %342 = vmatpush.msrb.mxu3 %v1541_v34 }
 0x102   :  { %1110 = vmatpush.msrb.mxu0 %v1541_v34 }
 0x103   :  { %210 = vmatpush.msra.mxu2 %v1538_v33  ;;  %343 = vmatpush.msrb.mxu3 %v1538_v33 }
 0x104   :  { %1111 = vmatpush.msrb.mxu0 %v1538_v33 }
 0x105   :  { %211 = vmatpush.msra.mxu2 %v1513_v28  ;;  %344 = vmatpush.msrb.mxu3 %v1513_v28 }
 0x106   :  { %1112 = vmatpush.msrb.mxu0 %v1513_v28 }
 0x107   :  { %212 = vmatpush.msra.mxu2 %v1511_v27  ;;  %345 = vmatpush.msrb.mxu3 %v1511_v27 }
 0x108   :  { %1113 = vmatpush.msrb.mxu0 %v1511_v27 }
 0x109   :  { %213 = vmatpush.msra.mxu2 %v1509_v26  ;;  %346 = vmatpush.msrb.mxu3 %v1509_v26 }
 0x10a   :  { %1114 = vmatpush.msrb.mxu0 %v1509_v26 }
 0x10b   :  { %214 = vmatpush.msra.mxu2 %v1507_v25  ;;  %347 = vmatpush.msrb.mxu3 %v1507_v25 }
 0x10c   :  { %1115 = vmatpush.msrb.mxu0 %v1507_v25 }
 0x10d   :  { %215 = vmatpush.msra.mxu2 %v1505_v24  ;;  %348 = vmatpush.msrb.mxu3 %v1505_v24 }
 0x10e   :  { %1116 = vmatpush.msrb.mxu0 %v1505_v24 }
 0x10f   :  { %216 = vmatpush.msra.mxu2 %v1503_v23  ;;  %349 = vmatpush.msrb.mxu3 %v1503_v23 }
 0x110   :  { %1117 = vmatpush.msrb.mxu0 %v1503_v23 }
 0x111   :  { %217 = vmatpush.msra.mxu2 %v1501_v22  ;;  %350 = vmatpush.msrb.mxu3 %v1501_v22 }
 0x112   :  { %1118 = vmatpush.msrb.mxu0 %v1501_v22 }
 0x113   :  { %218 = vmatpush.msra.mxu2 %v1499_v21  ;;  %351 = vmatpush.msrb.mxu3 %v1499_v21 }
 0x114   :  { %1119 = vmatpush.msrb.mxu0 %v1499_v21 }
 0x115   :  { %219 = vmatpush.msra.mxu2 %v1497_v20  ;;  %352 = vmatpush.msrb.mxu3 %v1497_v20 }
 0x116   :  { %1120 = vmatpush.msrb.mxu0 %v1497_v20 }
 0x117   :  { %220 = vmatpush.msra.mxu2 %v1495_v19  ;;  %353 = vmatpush.msrb.mxu3 %v1495_v19 }
 0x118   :  { %1121 = vmatpush.msrb.mxu0 %v1495_v19 }
 0x119   :  { %221 = vmatpush.msra.mxu2 %v1493_v18  ;;  %354 = vmatpush.msrb.mxu3 %v1493_v18 }
 0x11a   :  { %1122 = vmatpush.msrb.mxu0 %v1493_v18  ;;  %1228 = vmatmul.msk.f32.vlgmr.msra.gmra.mxu2 %vm177_vm2, %v1372_v45 }
 0x11b   :  { %543 = vmatpush.msrb.mxu2 %v1518_v29 }
 0x11d   :  { %544 = vmatpush.msrb.mxu2 %v1523_v30 }
 0x11f   :  { %545 = vmatpush.msrb.mxu2 %v1529_v31 }
 0x121   :  { %546 = vmatpush.msrb.mxu2 %v1536_v32 }
 0x123   :  { %587 = vmatpush.msra.mxu2 %v1550_v37 }
 0x125   :  { %588 = vmatpush.msra.mxu2 %v1558_v39 }
 0x127   :  { %589 = vmatpush.msra.mxu2 %v1565_v40 }
 0x129   :  { %590 = vmatpush.msra.mxu2 %v1574_v41 }
 0x19d   :  { %v223_v48 = vpop.f32.mrf.mxu2 }
 0x19e   :  { %v224_v49 = vadd.f32 %v223_v48, %v203_v46 }
 0x1a0   :  { %v226_v50 = vadd.f32 %v224_v49, %v1648_v47 }
 0x1a2   :  { %v1229_v51 = vmul.f32 -1.442695, %v226_v50 }
 0x1a4   :  { %1272 = vpow2.f32 %v1229_v51 }
 0x1aa   :  { %v1273_v52 = vpop.eup %1272 }
 0x1ab   :  { %v231_v53 = vadd.f32 1.0, %v1273_v52 }
 0x1ad   :  { %1274 = vrcp.f32 %v231_v53  ;;  %v243_v57 = vand.u32 2147483648, %v231_v53  ;;  %v241_v59 = vand.u32 2147483647, %v231_v53  ;;  %vm237_vm7 = vweird.f32 %v231_v53 }
 0x1ae   :  { %1276 = vtanh.f32 %v226_v50 }
 0x1af   :  { %v244_v62 = vor.u32 1.1754944e-38, %v243_v57  ;;  %vm242_vm9 = vcmp.eq.f32.partialorder %v241_v59, 8.507059e+37 }
 0x1b3   :  { %v1275_v54 = vpop.eup %1274 }
 0x1b4   :  { %v233_v55 = vmul.f32 %v1275_v54, %v231_v53  ;;  %vm238_vm5 = vweird.f32 %v1275_v54  ;;  %v1277_v0 = vpop.eup %1276 }
 0x1b5   :  { %vm239_vm8 = vmor %vm237_vm7, %vm238_vm5 }
 0x1b6   :  { %v234_v56 = vsub.f32 1.0, %v233_v55 }
 0x1b8   :  { %v235_v58 = vmul.f32 %v1275_v54, %v234_v56 }
 0x1ba   :  { %v236_v61 = vadd.f32 %v1275_v54, %v235_v58 }
 0x1bc   :  { %v240_v63 = vsel %vm239_vm8, %v1275_v54, %v236_v61 }
 0x1bd   :  { %v245_v1 = vsel %vm242_vm9, %v244_v62, %v240_v63 }
 0x1be   :  { %v247_v2 = vsel %vm1653_vm6, %v1277_v0, %v245_v1 }
 0x1bf   :  { %254 = vrot.lane.b32.xlu0 %v247_v2, %s1373_s13 }
 0x1c7   :  { %249 = vrot.lane.b32.xlu0 %v181_v3, %s1374_s15 }
 0x231   :  { %v255_v4 = vpop.permute.xlu0 %254 }
 0x232   :  { %v257_v5 = vmul.f32 %v255_v4, %v247_v2 }
 0x234   :  { %259 = vrot.lane.b32.xlu1 %v257_v5, %s1374_s15 }
 0x239   :  { %v250_v6 = vpop.permute.xlu0 %249 }
 0x23a   :  { %v252_v7 = vmul.f32 %v250_v6, %v247_v2 }
 0x2a6   :  { %v260_v8 = vpop.permute.xlu1 %259 }
 0x2a7   :  { %v1665_v9 = vadd.f32 %v260_v8, %v252_v7 }
 0x2a9   :  { %1278 = vtanh.f32 %v1665_v9 }
 0x2af   :  { %v1279_v10 = vpop.eup %1278 }
 0x2b0   :  { %265 = vrot.lane.b32.xlu1 %v1279_v10, %s1373_s13 }
 0x322   :  { %v266_v11 = vpop.permute.xlu1 %265 }
 0x323   :  { %v268_v12 = vmul.f32 %v266_v11, %v247_v2 }
 0x325   :  { %270 = vrot.lane.b32.xlu2 %v268_v12, %s1374_s15 }
 0x37f   :  { %v271_v13 = vpop.permute.xlu2 %270 }
 0x380   :  { %1230 = vmatmul.msk.f32.vlgmr.msra.gmra.mxu3 %vm182_vm1, %v271_v13  ;;  %1232 = vmatmul.msk.f32.vlgmr.msrb.gmra.mxu1 %vm182_vm1, %v271_v13 }
 0x381   :  { %595 = vmatpush.msra.mxu3 %v1553_v38  ;;  %459 = vmatpush.msrb.mxu1 %v1550_v37 }
 0x383   :  { %596 = vmatpush.msra.mxu3 %v1545_v36  ;;  %460 = vmatpush.msrb.mxu1 %v1558_v39 }
 0x385   :  { %597 = vmatpush.msra.mxu3 %v1543_v35  ;;  %461 = vmatpush.msrb.mxu1 %v1565_v40 }
 0x387   :  { %598 = vmatpush.msra.mxu3 %v1541_v34  ;;  %462 = vmatpush.msrb.mxu1 %v1574_v41 }
 0x389   :  { %599 = vmatpush.msra.mxu3 %v1538_v33 }
 0x38b   :  { %600 = vmatpush.msra.mxu3 %v1513_v28 }
 0x38d   :  { %601 = vmatpush.msra.mxu3 %v1511_v27 }
 0x38f   :  { %602 = vmatpush.msra.mxu3 %v1509_v26 }
 0x391   :  { %603 = vmatpush.msra.mxu3 %v1507_v25 }
 0x393   :  { %604 = vmatpush.msra.mxu3 %v1505_v24 }
 0x395   :  { %605 = vmatpush.msra.mxu3 %v1503_v23 }
 0x397   :  { %606 = vmatpush.msra.mxu3 %v1501_v22 }
 0x399   :  { %607 = vmatpush.msra.mxu3 %v1499_v21 }
 0x39b   :  { %608 = vmatpush.msra.mxu3 %v1497_v20 }
 0x39d   :  { %609 = vmatpush.msra.mxu3 %v1495_v19 }
 0x39f   :  { %610 = vmatpush.msra.mxu3 %v1493_v18 }
 0x3fd   :  { %v336_v59 = vpop.f32.mrf.mxu1 }
 0x403   :  { %v291_v15 = vpop.f32.mrf.mxu3 }
 0x404   :  { %v292_v16 = vadd.f32 %v291_v15, %v1695_v14 }
 0x406   :  { %294 = vst [vmem:[#allocation2] sm:$0x3] %v292_v16  ;;  %v296_v17 = vsel %vm295_vm10, %v292_v16, -inf }
 0x407   :  { %297 = vmax.xlane.f32.xlu2 %v296_v17 }
 0x47a   :  { %v298_v42 = vpop.xlane.xlu2 %297 }
 0x47b   :  { %vm299_vm11 = vcmp.ge.f32.partialorder %v292_v16, %v298_v42 }
 0x47c   :  { %v300_v43 = vsel %vm299_vm11, %v1623_v44, 128 }
 0x47d   :  { %v301_v46 = vsel %vm295_vm10, %v300_v43, 2147483647 }
 0x47e   :  { %v303_v48 = vshra.s32 %v301_v46, 16  ;;  %v302_v50 = vand.u32 65535, %v301_v46 }
 0x480   :  { %v305_v49 = vcvt.s32.f32 %v303_v48  ;;  %v304_v52 = vcvt.s32.f32 %v302_v50 }
 0x482   :  { %306 = vmin.xlane.f32.xlu0 %v305_v49 }
 0x4f5   :  { %v307_v51 = vpop.xlane.xlu0 %306 }
 0x4f6   :  { %vm308_vm12 = vcmp.eq.f32.partialorder %v305_v49, %v307_v51  ;;  %v313_v54 = vcvt.f32.s32 %v307_v51 }
 0x4f7   :  { %v309_v53 = vsel %vm308_vm12, %v304_v52, inf }
 0x4f8   :  { %310 = vmin.xlane.f32.xlu1 %v309_v53  ;;  %v314_v56 = vshll.u32 %v313_v54, 16 }
 0x56b   :  { %v311_v55 = vpop.xlane.xlu1 %310 }
 0x56c   :  { %v312_v57 = vcvt.f32.s32 %v311_v55 }
 0x56e   :  { %v315_v58 = vadd.s32 %v314_v56, %v312_v57 }
 0x570   :  { %vm316_vm13 = vcmp.eq.s32.totalorder %v1623_v44, %v315_v58 }
 0x571   :  { %1233 = vmatmul.msk.f32.vlgmr.msrb.gmra.mxu3 %vm316_vm13, %v1372_v45 }
 0x572   :  { %851 = vmatpush.msrb.mxu3 %v1553_v38 }
 0x574   :  { %852 = vmatpush.msrb.mxu3 %v1545_v36 }
 0x576   :  { %853 = vmatpush.msrb.mxu3 %v1543_v35 }
 0x578   :  { %854 = vmatpush.msrb.mxu3 %v1541_v34 }
 0x57a   :  { %855 = vmatpush.msrb.mxu3 %v1538_v33 }
 0x57c   :  { %856 = vmatpush.msrb.mxu3 %v1513_v28 }
 0x57e   :  { %857 = vmatpush.msrb.mxu3 %v1511_v27 }
 0x580   :  { %858 = vmatpush.msrb.mxu3 %v1509_v26 }
 0x582   :  { %859 = vmatpush.msrb.mxu3 %v1507_v25 }
 0x584   :  { %860 = vmatpush.msrb.mxu3 %v1505_v24 }
 0x586   :  { %861 = vmatpush.msrb.mxu3 %v1503_v23 }
 0x588   :  { %862 = vmatpush.msrb.mxu3 %v1501_v22 }
 0x58a   :  { %863 = vmatpush.msrb.mxu3 %v1499_v21 }
 0x58c   :  { %864 = vmatpush.msrb.mxu3 %v1497_v20 }
 0x58e   :  { %865 = vmatpush.msrb.mxu3 %v1495_v19 }
 0x590   :  { %866 = vmatpush.msrb.mxu3 %v1493_v18 }
 0x5f4   :  { %v356_v61 = vpop.f32.mrf.mxu3 }
 0x5f5   :  { %v357_v62 = vadd.f32 %v356_v61, %v336_v59 }
 0x5f7   :  { %v359_v63 = vadd.f32 %v357_v62, %v1648_v47 }
 0x5f9   :  { %v1234_v0 = vmul.f32 -1.442695, %v359_v63 }
 0x5fb   :  { %1280 = vpow2.f32 %v1234_v0 }
 0x601   :  { %v1281_v1 = vpop.eup %1280 }
 0x602   :  { %v364_v2 = vadd.f32 1.0, %v1281_v1 }
 0x604   :  { %1282 = vrcp.f32 %v364_v2  ;;  %v376_v6 = vand.u32 2147483648, %v364_v2  ;;  %v374_v8 = vand.u32 2147483647, %v364_v2  ;;  %vm370_vm15 = vweird.f32 %v364_v2 }
 0x605   :  { %1284 = vtanh.f32 %v359_v63 }
 0x606   :  { %v377_v11 = vor.u32 1.1754944e-38, %v376_v6  ;;  %vm375_vm2 = vcmp.eq.f32.partialorder %v374_v8, 8.507059e+37 }
 0x60a   :  { %v1283_v3 = vpop.eup %1282 }
 0x60b   :  { %v366_v4 = vmul.f32 %v1283_v3, %v364_v2  ;;  %vm371_vm14 = vweird.f32 %v1283_v3  ;;  %v1285_v13 = vpop.eup %1284 }
 0x60c   :  { %vm372_vm0 = vmor %vm370_vm15, %vm371_vm14 }
 0x60d   :  { %v367_v5 = vsub.f32 1.0, %v366_v4 }
 0x60f   :  { %v368_v7 = vmul.f32 %v1283_v3, %v367_v5 }
 0x611   :  { %v369_v10 = vadd.f32 %v1283_v3, %v368_v7 }
 0x613   :  { %v373_v12 = vsel %vm372_vm0, %v1283_v3, %v369_v10 }
 0x614   :  { %v378_v15 = vsel %vm375_vm2, %v377_v11, %v373_v12 }
 0x615   :  { %v380_v16 = vsel %vm1653_vm6, %v1285_v13, %v378_v15 }
 0x616   :  { %383 = vrot.lane.b32.xlu2 %v380_v16, %s1373_s13  ;;  %v381_v43 = vmul.f32 %v380_v16, %v1665_v9 }
 0x670   :  { %v384_v17 = vpop.permute.xlu2 %383 }
 0x671   :  { %v386_v42 = vmul.f32 %v384_v17, %v380_v16 }
 0x673   :  { %388 = vrot.lane.b32.xlu0 %v386_v42, %s1374_s15 }
 0x6e5   :  { %v389_v46 = vpop.permute.xlu0 %388 }
 0x6e6   :  { %v1725_v48 = vadd.f32 %v389_v46, %v381_v43 }
 0x6e8   :  { %1286 = vtanh.f32 %v1725_v48 }
 0x6ee   :  { %v1287_v49 = vpop.eup %1286 }
 0x6ef   :  { %394 = vrot.lane.b32.xlu1 %v1287_v49, %s1373_s13 }
 0x761   :  { %v395_v50 = vpop.permute.xlu1 %394 }
 0x762   :  { %v397_v51 = vmul.f32 %v395_v50, %v380_v16 }
 0x764   :  { %399 = vrot.lane.b32.xlu2 %v397_v51, %s1374_s15 }
 0x7be   :  { %v400_v52 = vpop.permute.xlu2 %399 }
 0x7bf   :  { %1235 = vmatmul.msk.f32.vlgmr.msra.gmra.mxu1 %vm182_vm1, %v400_v52 }
 0x7c0   :  { %467 = vmatpush.msra.mxu1 %v1553_v38 }
 0x7c2   :  { %468 = vmatpush.msra.mxu1 %v1545_v36 }
 0x7c4   :  { %469 = vmatpush.msra.mxu1 %v1543_v35 }
 0x7c6   :  { %470 = vmatpush.msra.mxu1 %v1541_v34 }
 0x7c7   :  { %1237 = vmatmul.msk.f32.vlgmr.msrb.gmra.mxu1 %vm182_vm1, %v400_v52 }
 0x7c8   :  { %471 = vmatpush.msra.mxu1 %v1538_v33 }
 0x7ca   :  { %472 = vmatpush.msra.mxu1 %v1513_v28 }
 0x7cc   :  { %473 = vmatpush.msra.mxu1 %v1511_v27 }
 0x7ce   :  { %474 = vmatpush.msra.mxu1 %v1509_v26 }
 0x7d0   :  { %475 = vmatpush.msra.mxu1 %v1507_v25 }
 0x7d2   :  { %476 = vmatpush.msra.mxu1 %v1505_v24 }
 0x7d4   :  { %477 = vmatpush.msra.mxu1 %v1503_v23 }
 0x7d6   :  { %478 = vmatpush.msra.mxu1 %v1501_v22 }
 0x7d8   :  { %479 = vmatpush.msra.mxu1 %v1499_v21 }
 0x7da   :  { %480 = vmatpush.msra.mxu1 %v1497_v20 }
 0x7dc   :  { %481 = vmatpush.msra.mxu1 %v1495_v19 }
 0x7de   :  { %482 = vmatpush.msra.mxu1 %v1493_v18 }
 0x7e0   :  { %723 = vmatpush.msrb.mxu1 %v1553_v38 }
 0x7e2   :  { %724 = vmatpush.msrb.mxu1 %v1545_v36 }
 0x7e4   :  { %725 = vmatpush.msrb.mxu1 %v1543_v35 }
 0x7e6   :  { %726 = vmatpush.msrb.mxu1 %v1541_v34 }
 0x7e8   :  { %727 = vmatpush.msrb.mxu1 %v1538_v33 }
 0x7ea   :  { %728 = vmatpush.msrb.mxu1 %v1513_v28 }
 0x7ec   :  { %729 = vmatpush.msrb.mxu1 %v1511_v27 }
 0x7ee   :  { %730 = vmatpush.msrb.mxu1 %v1509_v26 }
 0x7f0   :  { %731 = vmatpush.msrb.mxu1 %v1507_v25 }
 0x7f2   :  { %732 = vmatpush.msrb.mxu1 %v1505_v24 }
 0x7f4   :  { %733 = vmatpush.msrb.mxu1 %v1503_v23 }
 0x7f6   :  { %734 = vmatpush.msrb.mxu1 %v1501_v22 }
 0x7f8   :  { %735 = vmatpush.msrb.mxu1 %v1499_v21 }
 0x7fa   :  { %736 = vmatpush.msrb.mxu1 %v1497_v20 }
 0x7fc   :  { %737 = vmatpush.msrb.mxu1 %v1495_v19 }
 0x7fe   :  { %738 = vmatpush.msrb.mxu1 %v1493_v18 }
 0x83c   :  { %v420_v9 = vpop.f32.mrf.mxu1 }
 0x83d   :  { %v421_v53 = vadd.f32 %v420_v9, %v1695_v14 }
 0x83f   :  { %423 = vst [vmem:[#allocation2 + $0x2] sm:$0x3] %v421_v53  ;;  %v424_v54 = vsel %vm295_vm10, %v421_v53, -inf }
 0x840   :  { %425 = vmax.xlane.f32.xlu0 %v424_v54 }
 0x8b3   :  { %v426_v55 = vpop.xlane.xlu0 %425 }
 0x8b4   :  { %vm427_vm3 = vcmp.ge.f32.partialorder %v421_v53, %v426_v55 }
 0x8b5   :  { %v428_v56 = vsel %vm427_vm3, %v1623_v44, 128 }
 0x8b6   :  { %v429_v57 = vsel %vm295_vm10, %v428_v56, 2147483647 }
 0x8b7   :  { %v431_v58 = vshra.s32 %v429_v57, 16  ;;  %v430_v61 = vand.u32 65535, %v429_v57 }
 0x8b9   :  { %v433_v59 = vcvt.s32.f32 %v431_v58  ;;  %v432_v63 = vcvt.s32.f32 %v430_v61 }
 0x8bb   :  { %434 = vmin.xlane.f32.xlu2 %v433_v59 }
 0x92e   :  { %v435_v62 = vpop.xlane.xlu2 %434 }
 0x92f   :  { %vm436_vm4 = vcmp.eq.f32.partialorder %v433_v59, %v435_v62  ;;  %v441_v1 = vcvt.f32.s32 %v435_v62 }
 0x930   :  { %v437_v0 = vsel %vm436_vm4, %v432_v63, inf }
 0x931   :  { %438 = vmin.xlane.f32.xlu1 %v437_v0  ;;  %v442_v3 = vshll.u32 %v441_v1, 16 }
 0x9a4   :  { %v439_v2 = vpop.xlane.xlu1 %438 }
 0x9a5   :  { %v440_v4 = vcvt.f32.s32 %v439_v2 }
 0x9a7   :  { %v443_v5 = vadd.s32 %v442_v3, %v440_v4 }
 0x9a9   :  { %vm444_vm5 = vcmp.eq.s32.totalorder %v1623_v44, %v443_v5 }
 0x9aa   :  { %1238 = vmatmul.msk.f32.vlgmr.msra.gmra.mxu1 %vm444_vm5, %v1372_v45 }
 0x9ab   :  { %979 = vmatpush.msra.mxu1 %v1553_v38 }
 0x9ad   :  { %980 = vmatpush.msra.mxu1 %v1545_v36 }
 0x9af   :  { %981 = vmatpush.msra.mxu1 %v1543_v35 }
 0x9b1   :  { %982 = vmatpush.msra.mxu1 %v1541_v34 }
 0x9b3   :  { %983 = vmatpush.msra.mxu1 %v1538_v33 }
 0x9b5   :  { %984 = vmatpush.msra.mxu1 %v1513_v28  ;;  %v464_v28 = vpop.f32.mrf.mxu1 }
 0x9b7   :  { %985 = vmatpush.msra.mxu1 %v1511_v27 }
 0x9b9   :  { %986 = vmatpush.msra.mxu1 %v1509_v26 }
 0x9bb   :  { %987 = vmatpush.msra.mxu1 %v1507_v25 }
 0x9bd   :  { %988 = vmatpush.msra.mxu1 %v1505_v24 }
 0x9bf   :  { %989 = vmatpush.msra.mxu1 %v1503_v23 }
 0x9c1   :  { %990 = vmatpush.msra.mxu1 %v1501_v22 }
 0x9c3   :  { %991 = vmatpush.msra.mxu1 %v1499_v21 }
 0x9c5   :  { %992 = vmatpush.msra.mxu1 %v1497_v20 }
 0x9c7   :  { %993 = vmatpush.msra.mxu1 %v1495_v19 }
 0x9c9   :  { %994 = vmatpush.msra.mxu1 %v1493_v18 }
 0xa27   :  { %v484_v27 = vpop.f32.mrf.mxu1 }
 0xa28   :  { %v485_v33 = vadd.f32 %v484_v27, %v464_v28 }
 0xa2a   :  { %v487_v26 = vadd.f32 %v485_v33, %v1648_v47 }
 0xa2c   :  { %v1239_v25 = vmul.f32 -1.442695, %v487_v26 }
 0xa2e   :  { %1288 = vpow2.f32 %v1239_v25 }
 0xa34   :  { %v1289_v24 = vpop.eup %1288 }
 0xa35   :  { %v492_v34 = vadd.f32 1.0, %v1289_v24 }
 0xa37   :  { %1290 = vrcp.f32 %v492_v34  ;;  %v504_v21 = vand.u32 2147483648, %v492_v34  ;;  %v502_v19 = vand.u32 2147483647, %v492_v34  ;;  %vm498_vm8 = vweird.f32 %v492_v34 }
 0xa38   :  { %1292 = vtanh.f32 %v487_v26 }
 0xa39   :  { %v505_v18 = vor.u32 1.1754944e-38, %v504_v21  ;;  %vm503_vm11 = vcmp.eq.f32.partialorder %v502_v19, 8.507059e+37 }
 0xa3d   :  { %v1291_v23 = vpop.eup %1290 }
 0xa3e   :  { %v494_v22 = vmul.f32 %v1291_v23, %v492_v34  ;;  %vm499_vm7 = vweird.f32 %v1291_v23  ;;  %v1293_v6 = vpop.eup %1292 }
 0xa3f   :  { %vm500_vm9 = vmor %vm498_vm8, %vm499_vm7 }
 0xa40   :  { %v495_v35 = vsub.f32 1.0, %v494_v22 }
 0xa42   :  { %v496_v20 = vmul.f32 %v1291_v23, %v495_v35 }
 0xa44   :  { %v497_v36 = vadd.f32 %v1291_v23, %v496_v20 }
 0xa46   :  { %v501_v38 = vsel %vm500_vm9, %v1291_v23, %v497_v36 }
 0xa47   :  { %v506_v7 = vsel %vm503_vm11, %v505_v18, %v501_v38 }
 0xa48   :  { %v508_v8 = vsel %vm1653_vm6, %v1293_v6, %v506_v7 }
 0xa49   :  { %511 = vrot.lane.b32.xlu0 %v508_v8, %s1373_s13  ;;  %v509_v12 = vmul.f32 %v508_v8, %v1725_v48 }
 0xabb   :  { %v512_v10 = vpop.permute.xlu0 %511 }
 0xabc   :  { %v514_v11 = vmul.f32 %v512_v10, %v508_v8 }
 0xabe   :  { %516 = vrot.lane.b32.xlu2 %v514_v11, %s1374_s15 }
 0xb18   :  { %v517_v13 = vpop.permute.xlu2 %516 }
 0xb19   :  { %v1792_v15 = vadd.f32 %v517_v13, %v509_v12 }
 0xb1b   :  { %1294 = vtanh.f32 %v1792_v15 }
 0xb21   :  { %v1295_v16 = vpop.eup %1294 }
 0xb22   :  { %522 = vrot.lane.b32.xlu1 %v1295_v16, %s1373_s13 }
 0xb94   :  { %v523_v17 = vpop.permute.xlu1 %522 }
 0xb95   :  { %v525_v42 = vmul.f32 %v523_v17, %v508_v8 }
 0xb97   :  { %527 = vrot.lane.b32.xlu0 %v525_v42, %s1374_s15 }
 0xc09   :  { %v528_v43 = vpop.permute.xlu0 %527 }
 0xc0a   :  { %1240 = vmatmul.msk.f32.vlgmr.msrb.gmra.mxu2 %vm182_vm1, %v528_v43 }
 0xc0b   :  { %671 = vmatpush.msrb.mxu2 %v1518_v29 }
 0xc0d   :  { %672 = vmatpush.msrb.mxu2 %v1523_v30 }
 0xc0f   :  { %673 = vmatpush.msrb.mxu2 %v1529_v31 }
 0xc11   :  { %674 = vmatpush.msrb.mxu2 %v1536_v32 }
 0xc12   :  { %1242 = vmatmul.msk.f32.vlgmr.msra.gmra.mxu2 %vm182_vm1, %v528_v43 }
 0xc13   :  { %715 = vmatpush.msra.mxu2 %v1550_v37 }
 0xc15   :  { %716 = vmatpush.msra.mxu2 %v1558_v39 }
 0xc17   :  { %717 = vmatpush.msra.mxu2 %v1565_v40 }
 0xc19   :  { %718 = vmatpush.msra.mxu2 %v1574_v41 }
 0xc8d   :  { %v548_v46 = vpop.f32.mrf.mxu2 }
 0xc8e   :  { %v549_v48 = vadd.f32 %v548_v46, %v1695_v14 }
 0xc90   :  { %551 = vst [vmem:[#allocation2 + $0x4] sm:$0x3] %v549_v48  ;;  %v552_v49 = vsel %vm295_vm10, %v549_v48, -inf }
 0xc91   :  { %553 = vmax.xlane.f32.xlu2 %v552_v49 }
 0xc95   :  { %v592_v0 = vpop.f32.mrf.mxu2 }
 0xd04   :  { %v554_v50 = vpop.xlane.xlu2 %553 }
 0xd05   :  { %vm555_vm12 = vcmp.ge.f32.partialorder %v549_v48, %v554_v50 }
 0xd06   :  { %v556_v51 = vsel %vm555_vm12, %v1623_v44, 128 }
 0xd07   :  { %v557_v52 = vsel %vm295_vm10, %v556_v51, 2147483647 }
 0xd08   :  { %v559_v9 = vshra.s32 %v557_v52, 16  ;;  %v558_v54 = vand.u32 65535, %v557_v52 }
 0xd0a   :  { %v561_v53 = vcvt.s32.f32 %v559_v9  ;;  %v560_v56 = vcvt.s32.f32 %v558_v54 }
 0xd0c   :  { %562 = vmin.xlane.f32.xlu0 %v561_v53 }
 0xd7f   :  { %v563_v55 = vpop.xlane.xlu0 %562 }
 0xd80   :  { %vm564_vm13 = vcmp.eq.f32.partialorder %v561_v53, %v563_v55  ;;  %v569_v58 = vcvt.f32.s32 %v563_v55 }
 0xd81   :  { %v565_v57 = vsel %vm564_vm13, %v560_v56, inf }
 0xd82   :  { %566 = vmin.xlane.f32.xlu1 %v565_v57  ;;  %v570_v61 = vshll.u32 %v569_v58, 16 }
 0xdf5   :  { %v567_v59 = vpop.xlane.xlu1 %566 }
 0xdf6   :  { %v568_v62 = vcvt.f32.s32 %v567_v59 }
 0xdf8   :  { %v571_v63 = vadd.s32 %v570_v61, %v568_v62 }
 0xdfa   :  { %vm572_vm14 = vcmp.eq.s32.totalorder %v1623_v44, %v571_v63 }
 0xdfb   :  { %1243 = vmatmul.msk.f32.vlgmr.msra.gmra.mxu3 %vm572_vm14, %v1372_v45 }
 0xdfc   :  { %1183 = vmatpush.msra.mxu3 %v1518_v29 }
 0xdfe   :  { %1184 = vmatpush.msra.mxu3 %v1523_v30 }
 0xe00   :  { %1185 = vmatpush.msra.mxu3 %v1529_v31 }
 0xe02   :  { %1186 = vmatpush.msra.mxu3 %v1536_v32 }
 0xe7e   :  { %v612_v1 = vpop.f32.mrf.mxu3 }
 0xe7f   :  { %v613_v2 = vadd.f32 %v612_v1, %v592_v0 }
 0xe81   :  { %v615_v3 = vadd.f32 %v613_v2, %v1648_v47 }
 0xe83   :  { %v1244_v4 = vmul.f32 -1.442695, %v615_v3 }
 0xe85   :  { %1296 = vpow2.f32 %v1244_v4 }
 0xe8b   :  { %v1297_v5 = vpop.eup %1296 }
 0xe8c   :  { %v620_v28 = vadd.f32 1.0, %v1297_v5 }
 0xe8e   :  { %1298 = vrcp.f32 %v620_v28  ;;  %v632_v25 = vand.u32 2147483648, %v620_v28  ;;  %v630_v34 = vand.u32 2147483647, %v620_v28  ;;  %vm626_vm0 = vweird.f32 %v620_v28 }
 0xe8f   :  { %1300 = vtanh.f32 %v615_v3 }
 0xe90   :  { %v633_v22 = vor.u32 1.1754944e-38, %v632_v25  ;;  %vm631_vm3 = vcmp.eq.f32.partialorder %v630_v34, 8.507059e+37 }
 0xe94   :  { %v1299_v27 = vpop.eup %1298 }
 0xe95   :  { %v622_v33 = vmul.f32 %v1299_v27, %v620_v28  ;;  %vm627_vm15 = vweird.f32 %v1299_v27  ;;  %v1301_v21 = vpop.eup %1300 }
 0xe96   :  { %vm628_vm2 = vmor %vm626_vm0, %vm627_vm15 }
 0xe97   :  { %v623_v26 = vsub.f32 1.0, %v622_v33 }
 0xe99   :  { %v624_v24 = vmul.f32 %v1299_v27, %v623_v26 }
 0xe9b   :  { %v625_v23 = vadd.f32 %v1299_v27, %v624_v24 }
 0xe9d   :  { %v629_v35 = vsel %vm628_vm2, %v1299_v27, %v625_v23 }
 0xe9e   :  { %v634_v20 = vsel %vm631_vm3, %v633_v22, %v629_v35 }
 0xe9f   :  { %v636_v19 = vsel %vm1653_vm6, %v1301_v21, %v634_v20 }
 0xea0   :  { %639 = vrot.lane.b32.xlu2 %v636_v19, %s1373_s13  ;;  %v637_v38 = vmul.f32 %v636_v19, %v1792_v15 }
 0xefa   :  { %v640_v36 = vpop.permute.xlu2 %639 }
 0xefb   :  { %v642_v18 = vmul.f32 %v640_v36, %v636_v19  ;;  %v1865_v36 = vld [vmem:[%s1971_s6 + $0x10] sm:$0xff] }
 0xefd   :  { %644 = vrot.lane.b32.xlu0 %v642_v18, %s1374_s15  ;;  %v1871_v18 = vld [vmem:[%s1971_s6 + $0x8] sm:$0xff] }
 0xf6f   :  { %v645_v6 = vpop.permute.xlu0 %644 }
 0xf70   :  { %v1823_v7 = vadd.f32 %v645_v6, %v637_v38  ;;  %v1877_v38 = vld [vmem:[%s1971_s6] sm:$0xff] }
 0xf72   :  { %1302 = vtanh.f32 %v1823_v7 }
 0xf78   :  { %v1303_v8 = vpop.eup %1302 }
 0xf79   :  { %650 = vrot.lane.b32.xlu1 %v1303_v8, %s1373_s13 }
 0xfeb   :  { %v651_v10 = vpop.permute.xlu1 %650 }
 0xfec   :  { %v653_v11 = vmul.f32 %v651_v10, %v636_v19  ;;  %v1859_v19 = vld [vmem:[%s1971_s6 + $0x18] sm:$0xff] }
 0xfee   :  { %655 = vrot.lane.b32.xlu0 %v653_v11, %s1374_s15 }
0x1060   :  { %v656_v12 = vpop.permute.xlu0 %655 }
0x1061   :  { %1245 = vmatmul.msk.f32.vlgmr.msrb.gmra.mxu2 %vm182_vm1, %v656_v12 }
0x1062   :  { %799 = vmatpush.msrb.mxu2 %v1518_v29 }
0x1064   :  { %800 = vmatpush.msrb.mxu2 %v1523_v30 }
0x1066   :  { %801 = vmatpush.msrb.mxu2 %v1529_v31 }
0x1068   :  { %802 = vmatpush.msrb.mxu2 %v1536_v32 }
0x1069   :  { %1247 = vmatmul.msk.f32.vlgmr.msra.gmra.mxu2 %vm182_vm1, %v656_v12 }
0x106a   :  { %843 = vmatpush.msra.mxu2 %v1550_v37 }
0x106c   :  { %844 = vmatpush.msra.mxu2 %v1558_v39 }
0x106e   :  { %845 = vmatpush.msra.mxu2 %v1565_v40 }
0x1070   :  { %846 = vmatpush.msra.mxu2 %v1574_v41 }
0x10e4   :  { %v676_v13 = vpop.f32.mrf.mxu2 }
0x10e5   :  { %v677_v15 = vadd.f32 %v676_v13, %v1695_v14 }
0x10e7   :  { %679 = vst [vmem:[#allocation2 + $0x6] sm:$0x3] %v677_v15  ;;  %v680_v29 = vsel %vm295_vm10, %v677_v15, -inf }
0x10e8   :  { %681 = vmax.xlane.f32.xlu2 %v680_v29 }
0x10ec   :  { %v720_v53 = vpop.f32.mrf.mxu2 }
0x115b   :  { %v682_v30 = vpop.xlane.xlu2 %681 }
0x115c   :  { %vm683_vm4 = vcmp.ge.f32.partialorder %v677_v15, %v682_v30 }
0x115d   :  { %v684_v31 = vsel %vm683_vm4, %v1623_v44, 128 }
0x115e   :  { %v685_v32 = vsel %vm295_vm10, %v684_v31, 2147483647 }
0x115f   :  { %v687_v16 = vshra.s32 %v685_v32, 16  ;;  %v686_v42 = vand.u32 65535, %v685_v32 }
0x1161   :  { %v689_v17 = vcvt.s32.f32 %v687_v16  ;;  %v688_v46 = vcvt.s32.f32 %v686_v42 }
0x1163   :  { %690 = vmin.xlane.f32.xlu1 %v689_v17 }
0x11d6   :  { %v691_v43 = vpop.xlane.xlu1 %690 }
0x11d7   :  { %vm692_vm5 = vcmp.eq.f32.partialorder %v689_v17, %v691_v43  ;;  %v697_v49 = vcvt.f32.s32 %v691_v43 }
0x11d8   :  { %v693_v48 = vsel %vm692_vm5, %v688_v46, inf }
0x11d9   :  { %694 = vmin.xlane.f32.xlu0 %v693_v48  ;;  %v698_v51 = vshll.u32 %v697_v49, 16 }
0x124c   :  { %v695_v50 = vpop.xlane.xlu0 %694 }
0x124d   :  { %v696_v52 = vcvt.f32.s32 %v695_v50 }
0x124f   :  { %v699_v9 = vadd.s32 %v698_v51, %v696_v52 }
0x1251   :  { %vm700_vm7 = vcmp.eq.s32.totalorder %v1623_v44, %v699_v9 }
0x1252   :  { %1248 = vmatmul.msk.f32.vlgmr.msrb.gmra.mxu1 %vm700_vm7, %v1372_v45 }
0x12cf   :  { %v740_v54 = vpop.f32.mrf.mxu1 }
0x12d0   :  { %v741_v55 = vadd.f32 %v740_v54, %v720_v53 }
0x12d2   :  { %v743_v56 = vadd.f32 %v741_v55, %v1648_v47 }
0x12d4   :  { %v1249_v57 = vmul.f32 -1.442695, %v743_v56 }
0x12d6   :  { %1304 = vpow2.f32 %v1249_v57 }
0x12dc   :  { %v1305_v58 = vpop.eup %1304 }
0x12dd   :  { %v748_v59 = vadd.f32 1.0, %v1305_v58 }
0x12df   :  { %1306 = vrcp.f32 %v748_v59  ;;  %v760_v0 = vand.u32 2147483648, %v748_v59  ;;  %v758_v2 = vand.u32 2147483647, %v748_v59  ;;  %vm754_vm9 = vweird.f32 %v748_v59 }
0x12e0   :  { %1308 = vtanh.f32 %v743_v56 }
0x12e1   :  { %v761_v4 = vor.u32 1.1754944e-38, %v760_v0  ;;  %vm759_vm12 = vcmp.eq.f32.partialorder %v758_v2, 8.507059e+37 }
0x12e5   :  { %v1307_v61 = vpop.eup %1306 }
0x12e6   :  { %v750_v62 = vmul.f32 %v1307_v61, %v748_v59  ;;  %vm755_vm8 = vweird.f32 %v1307_v61  ;;  %v1309_v28 = vpop.eup %1308 }
0x12e7   :  { %vm756_vm11 = vmor %vm754_vm9, %vm755_vm8 }
0x12e8   :  { %v751_v63 = vsub.f32 1.0, %v750_v62 }
0x12ea   :  { %v752_v1 = vmul.f32 %v1307_v61, %v751_v63 }
0x12ec   :  { %v753_v3 = vadd.f32 %v1307_v61, %v752_v1 }
0x12ee   :  { %v757_v5 = vsel %vm756_vm11, %v1307_v61, %v753_v3 }
0x12ef   :  { %v762_v27 = vsel %vm759_vm12, %v761_v4, %v757_v5 }
0x12f0   :  { %v764_v33 = vsel %vm1653_vm6, %v1309_v28, %v762_v27  ;;  %v1340_v27 = vld [vmem:[%s1969_s4 + $0x18] sm:$0xff] }
0x12f1   :  { %767 = vrot.lane.b32.xlu2 %v764_v33, %s1373_s13  ;;  %v765_v24 = vmul.f32 %v764_v33, %v1823_v7 }
0x134b   :  { %v768_v26 = vpop.permute.xlu2 %767 }
0x134c   :  { %v770_v25 = vmul.f32 %v768_v26, %v764_v33  ;;  %v1342_v26 = vld [vmem:[%s1969_s4 + $0x8] sm:$0xff] }
0x134e   :  { %772 = vrot.lane.b32.xlu1 %v770_v25, %s1374_s15  ;;  %v1343_v25 = vld [vmem:[%s1969_s4] sm:$0xff] }
0x13c0   :  { %v773_v34 = vpop.permute.xlu1 %772 }
0x13c1   :  { %v1850_v23 = vadd.f32 %v773_v34, %v765_v24 }
0x13c3   :  { %1310 = vtanh.f32 %v1850_v23 }
0x13c9   :  { %v1311_v22 = vpop.eup %1310 }
0x13ca   :  { %778 = vrot.lane.b32.xlu0 %v1311_v22, %s1373_s13 }
0x143c   :  { %v779_v35 = vpop.permute.xlu0 %778 }
0x143d   :  { %v781_v21 = vmul.f32 %v779_v35, %v764_v33  ;;  %v1341_v33 = vld [vmem:[%s1969_s4 + $0x10] sm:$0xff] }
0x143f   :  { %783 = vrot.lane.b32.xlu2 %v781_v21, %s1374_s15 }
0x1499   :  { %v784_v20 = vpop.permute.xlu2 %783 }
0x149a   :  { %1250 = vmatmul.msk.f32.vlgmr.msrb.gmra.mxu2 %vm182_vm1, %v784_v20 }
0x149b   :  { %927 = vmatpush.msrb.mxu2 %v1859_v19 }
0x149d   :  { %928 = vmatpush.msrb.mxu2 %v1865_v36 }
0x149f   :  { %929 = vmatpush.msrb.mxu2 %v1871_v18 }
0x14a1   :  { %930 = vmatpush.msrb.mxu2 %v1877_v38 }
0x14a2   :  { %1252 = vmatmul.msk.f32.vlgmr.msra.gmra.mxu2 %vm182_vm1, %v784_v20 }
0x14a3   :  { %971 = vmatpush.msra.mxu2 %v1550_v37 }
0x14a5   :  { %972 = vmatpush.msra.mxu2 %v1558_v39 }
0x14a7   :  { %973 = vmatpush.msra.mxu2 %v1565_v40 }
0x14a9   :  { %974 = vmatpush.msra.mxu2 %v1574_v41 }
0x151d   :  { %v804_v6 = vpop.f32.mrf.mxu2 }
0x151e   :  { %v805_v7 = vadd.f32 %v804_v6, %v1695_v14 }
0x1520   :  { %807 = vst [vmem:[#allocation2 + $0x8] sm:$0x3] %v805_v7  ;;  %v808_v8 = vsel %vm295_vm10, %v805_v7, -inf }
0x1521   :  { %809 = vmax.xlane.f32.xlu0 %v808_v8 }
0x1525   :  { %v848_v17 = vpop.f32.mrf.mxu2 }
0x1594   :  { %v810_v10 = vpop.xlane.xlu0 %809 }
0x1595   :  { %vm811_vm13 = vcmp.ge.f32.partialorder %v805_v7, %v810_v10 }
0x1596   :  { %v812_v11 = vsel %vm811_vm13, %v1623_v44, 128 }
0x1597   :  { %v813_v12 = vsel %vm295_vm10, %v812_v11, 2147483647 }
0x1598   :  { %v815_v37 = vshra.s32 %v813_v12, 16  ;;  %v814_v39 = vand.u32 65535, %v813_v12 }
0x159a   :  { %v817_v13 = vcvt.s32.f32 %v815_v37  ;;  %v816_v15 = vcvt.s32.f32 %v814_v39 }
0x159c   :  { %818 = vmin.xlane.f32.xlu1 %v817_v13 }
0x160f   :  { %v819_v40 = vpop.xlane.xlu1 %818 }
0x1610   :  { %vm820_vm14 = vcmp.eq.f32.partialorder %v817_v13, %v819_v40  ;;  %v825_v29 = vcvt.f32.s32 %v819_v40  ;;  %v1929_v40 = vld [vmem:[%s1970_s5] sm:$0x3]  ;;  %s1375_s5 = smov [#allocation2]  }
0x1611   :  { %v821_v41 = vsel %vm820_vm14, %v816_v15, inf  ;;  %s1196_s10 = sshll.u32 %s1375_s5, 4  ;;  %s1197_s10 = int_to_ptr.vmem [resolvable:$true] %s1196_s10 }
0x1612   :  { %822 = vmin.xlane.f32.xlu2 %v821_v41  ;;  %v826_v31 = vshll.u32 %v825_v29, 16 }
0x1685   :  { %v823_v30 = vpop.xlane.xlu2 %822 }
0x1686   :  { %v824_v32 = vcvt.f32.s32 %v823_v30 }
0x1688   :  { %v827_v16 = vadd.s32 %v826_v31, %v824_v32 }
0x168a   :  { %vm828_vm15 = vcmp.eq.s32.totalorder %v1623_v44, %v827_v16 }
0x168b   :  { %1253 = vmatmul.msk.f32.vlgmr.msrb.gmra.mxu3 %vm828_vm15, %v1372_v45 }
0x170e   :  { %v868_v42 = vpop.f32.mrf.mxu3 }
0x170f   :  { %v869_v43 = vadd.f32 %v868_v42, %v848_v17 }
0x1711   :  { %v871_v46 = vadd.f32 %v869_v43, %v1648_v47 }
0x1713   :  { %v1254_v48 = vmul.f32 -1.442695, %v871_v46 }
0x1715   :  { %1312 = vpow2.f32 %v1254_v48 }
0x171b   :  { %v1313_v49 = vpop.eup %1312 }
0x171c   :  { %v876_v50 = vadd.f32 1.0, %v1313_v49 }
0x171e   :  { %1314 = vrcp.f32 %v876_v50  ;;  %v888_v53 = vand.u32 2147483648, %v876_v50  ;;  %v886_v55 = vand.u32 2147483647, %v876_v50  ;;  %vm882_vm2 = vweird.f32 %v876_v50 }
0x171f   :  { %1316 = vtanh.f32 %v871_v46 }
0x1720   :  { %v889_v57 = vor.u32 1.1754944e-38, %v888_v53  ;;  %vm887_vm4 = vcmp.eq.f32.partialorder %v886_v55, 8.507059e+37 }
0x1724   :  { %v1315_v51 = vpop.eup %1314 }
0x1725   :  { %v878_v52 = vmul.f32 %v1315_v51, %v876_v50  ;;  %vm883_vm0 = vweird.f32 %v1315_v51  ;;  %v1317_v47 = vpop.eup %1316 }
0x1726   :  { %vm884_vm3 = vmor %vm882_vm2, %vm883_vm0 }
0x1727   :  { %v879_v9 = vsub.f32 1.0, %v878_v52 }
0x1729   :  { %v880_v54 = vmul.f32 %v1315_v51, %v879_v9 }
0x172b   :  { %v881_v56 = vadd.f32 %v1315_v51, %v880_v54 }
0x172d   :  { %v885_v58 = vsel %vm884_vm3, %v1315_v51, %v881_v56 }
0x172e   :  { %v890_v59 = vsel %vm887_vm4, %v889_v57, %v885_v58 }
0x172f   :  { %v892_v61 = vsel %vm1653_vm6, %v1317_v47, %v890_v59 }
0x1730   :  { %895 = vrot.lane.b32.xlu0 %v892_v61, %s1373_s13  ;;  %v893_v0 = vmul.f32 %v892_v61, %v1850_v23 }
0x17a2   :  { %v896_v62 = vpop.permute.xlu0 %895 }
0x17a3   :  { %v898_v63 = vmul.f32 %v896_v62, %v892_v61 }
0x17a5   :  { %900 = vrot.lane.b32.xlu2 %v898_v63, %s1374_s15 }
0x17ff   :  { %v901_v1 = vpop.permute.xlu2 %900 }
0x1800   :  { %v1897_v2 = vadd.f32 %v901_v1, %v893_v0 }
0x1802   :  { %1318 = vtanh.f32 %v1897_v2 }
0x1808   :  { %v1319_v3 = vpop.eup %1318 }
0x1809   :  { %906 = vrot.lane.b32.xlu1 %v1319_v3, %s1373_s13 }
0x187b   :  { %v907_v4 = vpop.permute.xlu1 %906 }
0x187c   :  { %v909_v5 = vmul.f32 %v907_v4, %v892_v61 }
0x187e   :  { %911 = vrot.lane.b32.xlu0 %v909_v5, %s1374_s15 }
0x18f0   :  { %v912_v28 = vpop.permute.xlu0 %911 }
0x18f1   :  { %1255 = vmatmul.msk.f32.vlgmr.msrb.gmra.mxu2 %vm182_vm1, %v912_v28 }
0x18f2   :  { %1055 = vmatpush.msrb.mxu2 %v1859_v19 }
0x18f4   :  { %1056 = vmatpush.msrb.mxu2 %v1865_v36 }
0x18f6   :  { %1057 = vmatpush.msrb.mxu2 %v1871_v18 }
0x18f8   :  { %1058 = vmatpush.msrb.mxu2 %v1877_v38 }
0x18f9   :  { %1257 = vmatmul.msk.f32.vlgmr.msra.gmra.mxu2 %vm182_vm1, %v912_v28 }
0x18fa   :  { %1099 = vmatpush.msra.mxu2 %v1340_v27 }
0x18fc   :  { %1100 = vmatpush.msra.mxu2 %v1341_v33 }
0x18fe   :  { %1101 = vmatpush.msra.mxu2 %v1342_v26 }
0x1900   :  { %1102 = vmatpush.msra.mxu2 %v1343_v25 }
0x1974   :  { %v932_v24 = vpop.f32.mrf.mxu2 }
0x1975   :  { %v933_v34 = vadd.f32 %v932_v24, %v1695_v14 }
0x1977   :  { %935 = vst [vmem:[#allocation2 + $0xa] sm:$0x3] %v933_v34  ;;  %v936_v23 = vsel %vm295_vm10, %v933_v34, -inf }
0x1978   :  { %937 = vmax.xlane.f32.xlu2 %v936_v23 }
0x197c   :  { %v976_v37 = vpop.f32.mrf.mxu2 }
0x19eb   :  { %v938_v22 = vpop.xlane.xlu2 %937 }
0x19ec   :  { %vm939_vm5 = vcmp.ge.f32.partialorder %v933_v34, %v938_v22 }
0x19ed   :  { %v940_v35 = vsel %vm939_vm5, %v1623_v44, 128 }
0x19ee   :  { %v941_v21 = vsel %vm295_vm10, %v940_v35, 2147483647 }
0x19ef   :  { %v943_v20 = vshra.s32 %v941_v21, 16  ;;  %v942_v36 = vand.u32 65535, %v941_v21 }
0x19f1   :  { %v945_v19 = vcvt.s32.f32 %v943_v20  ;;  %v944_v38 = vcvt.s32.f32 %v942_v36 }
0x19f3   :  { %946 = vmin.xlane.f32.xlu0 %v945_v19 }
0x1a66   :  { %v947_v18 = vpop.xlane.xlu0 %946 }
0x1a67   :  { %vm948_vm7 = vcmp.eq.f32.partialorder %v945_v19, %v947_v18  ;;  %v953_v7 = vcvt.f32.s32 %v947_v18 }
0x1a68   :  { %v949_v6 = vsel %vm948_vm7, %v944_v38, inf }
0x1a69   :  { %950 = vmin.xlane.f32.xlu1 %v949_v6  ;;  %v954_v10 = vshll.u32 %v953_v7, 16 }
0x1adc   :  { %v951_v8 = vpop.xlane.xlu1 %950 }
0x1add   :  { %v952_v11 = vcvt.f32.s32 %v951_v8 }
0x1adf   :  { %v955_v12 = vadd.s32 %v954_v10, %v952_v11 }
0x1ae1   :  { %vm956_vm8 = vcmp.eq.s32.totalorder %v1623_v44, %v955_v12 }
0x1ae2   :  { %1258 = vmatmul.msk.f32.vlgmr.msra.gmra.mxu1 %vm956_vm8, %v1372_v45 }
0x1b5f   :  { %v996_v13 = vpop.f32.mrf.mxu1 }
0x1b60   :  { %v997_v39 = vadd.f32 %v996_v13, %v976_v37 }
0x1b62   :  { %v999_v15 = vadd.f32 %v1929_v40, %v997_v39 }
0x1b64   :  { %v1259_v41 = vmul.f32 -1.442695, %v999_v15 }
0x1b66   :  { %1320 = vpow2.f32 %v1259_v41 }
0x1b6c   :  { %v1321_v29 = vpop.eup %1320 }
0x1b6d   :  { %v1004_v30 = vadd.f32 1.0, %v1321_v29 }
0x1b6f   :  { %1322 = vrcp.f32 %v1004_v30  ;;  %v1016_v17 = vand.u32 2147483648, %v1004_v30  ;;  %v1014_v43 = vand.u32 2147483647, %v1004_v30  ;;  %vm1010_vm11 = vweird.f32 %v1004_v30 }
0x1b70   :  { %1324 = vtanh.f32 %v999_v15 }
0x1b71   :  { %v1017_v48 = vor.u32 1.1754944e-38, %v1016_v17  ;;  %vm1015_vm13 = vcmp.eq.f32.partialorder %v1014_v43, 8.507059e+37  ;;  %v1345_v17 = vld [vmem:[%s1972_s7] sm:$0x3] }
0x1b75   :  { %v1323_v31 = vpop.eup %1322 }
0x1b76   :  { %v1006_v32 = vmul.f32 %v1323_v31, %v1004_v30  ;;  %vm1011_vm9 = vweird.f32 %v1323_v31  ;;  %v1325_v50 = vpop.eup %1324 }
0x1b77   :  { %vm1012_vm12 = vmor %vm1010_vm11, %vm1011_vm9 }
0x1b78   :  { %v1007_v16 = vsub.f32 1.0, %v1006_v32 }
0x1b7a   :  { %v1008_v42 = vmul.f32 %v1323_v31, %v1007_v16 }
0x1b7c   :  { %v1009_v46 = vadd.f32 %v1323_v31, %v1008_v42 }
0x1b7e   :  { %v1013_v49 = vsel %vm1012_vm12, %v1323_v31, %v1009_v46 }
0x1b7f   :  { %v1018_v51 = vsel %vm1015_vm13, %v1017_v48, %v1013_v49 }
0x1b80   :  { %v1020_v52 = vsel %vm1653_vm6, %v1325_v50, %v1018_v51 }
0x1b81   :  { %1023 = vrot.lane.b32.xlu2 %v1020_v52, %s1373_s13  ;;  %v1021_v54 = vmul.f32 %v1020_v52, %v1897_v2 }
0x1bdb   :  { %v1024_v9 = vpop.permute.xlu2 %1023 }
0x1bdc   :  { %v1026_v53 = vmul.f32 %v1024_v9, %v1020_v52 }
0x1bde   :  { %1028 = vrot.lane.b32.xlu0 %v1026_v53, %s1374_s15 }
0x1c50   :  { %v1029_v55 = vpop.permute.xlu0 %1028 }
0x1c51   :  { %v1937_v56 = vadd.f32 %v1029_v55, %v1021_v54 }
0x1c53   :  { %1326 = vtanh.f32 %v1937_v56 }
0x1c59   :  { %v1327_v57 = vpop.eup %1326 }
0x1c5a   :  { %1034 = vrot.lane.b32.xlu1 %v1327_v57, %s1373_s13 }
0x1ccc   :  { %v1035_v58 = vpop.permute.xlu1 %1034 }
0x1ccd   :  { %v1037_v47 = vmul.f32 %v1035_v58, %v1020_v52 }
0x1ccf   :  { %1039 = vrot.lane.b32.xlu0 %v1037_v47, %s1374_s15 }
0x1d41   :  { %v1040_v59 = vpop.permute.xlu0 %1039 }
0x1d42   :  { %1260 = vmatmul.msk.f32.vlgmr.msrb.gmra.mxu2 %vm182_vm1, %v1040_v59 }
0x1d4a   :  { %1262 = vmatmul.msk.f32.vlgmr.msra.gmra.mxu2 %vm182_vm1, %v1040_v59 }
0x1dc5   :  { %v1060_v61 = vpop.f32.mrf.mxu2 }
0x1dc6   :  { %v1061_v62 = vadd.f32 %v1060_v61, %v1695_v14 }
0x1dc8   :  { %1063 = vst [vmem:[#allocation2 + $0xc] sm:$0x3] %v1061_v62  ;;  %v1064_v63 = vsel %vm295_vm10, %v1061_v62, -inf }
0x1dc9   :  { %1065 = vmax.xlane.f32.xlu2 %v1064_v63 }
0x1dcd   :  { %v1104_v23 = vpop.f32.mrf.mxu2 }
0x1e3c   :  { %v1066_v0 = vpop.xlane.xlu2 %1065 }
0x1e3d   :  { %vm1067_vm14 = vcmp.ge.f32.partialorder %v1061_v62, %v1066_v0 }
0x1e3e   :  { %v1068_v1 = vsel %vm1067_vm14, %v1623_v44, 128 }
0x1e3f   :  { %v1069_v2 = vsel %vm295_vm10, %v1068_v1, 2147483647 }
0x1e40   :  { %v1071_v3 = vshra.s32 %v1069_v2, 16  ;;  %v1070_v5 = vand.u32 65535, %v1069_v2 }
0x1e42   :  { %v1073_v4 = vcvt.s32.f32 %v1071_v3  ;;  %v1072_v27 = vcvt.s32.f32 %v1070_v5 }
0x1e44   :  { %1074 = vmin.xlane.f32.xlu1 %v1073_v4 }
0x1eb7   :  { %v1075_v28 = vpop.xlane.xlu1 %1074 }
0x1eb8   :  { %vm1076_vm15 = vcmp.eq.f32.partialorder %v1073_v4, %v1075_v28  ;;  %v1081_v14 = vcvt.f32.s32 %v1075_v28 }
0x1eb9   :  { %v1077_v33 = vsel %vm1076_vm15, %v1072_v27, inf }
0x1eba   :  { %1078 = vmin.xlane.f32.xlu0 %v1077_v33  ;;  %v1082_v25 = vshll.u32 %v1081_v14, 16 }
0x1f2d   :  { %v1079_v26 = vpop.xlane.xlu0 %1078 }
0x1f2e   :  { %v1080_v24 = vcvt.f32.s32 %v1079_v26 }
0x1f30   :  { %v1083_v34 = vadd.s32 %v1082_v25, %v1080_v24 }
0x1f32   :  { %vm1084_vm0 = vcmp.eq.s32.totalorder %v1623_v44, %v1083_v34 }
0x1f33   :  { %1263 = vmatmul.msk.f32.vlgmr.msrb.gmra.mxu0 %vm1084_vm0, %v1372_v45 }
0x1fb0   :  { %v1124_v22 = vpop.f32.mrf.mxu0 }
0x1fb1   :  { %v1125_v35 = vadd.f32 %v1124_v22, %v1104_v23 }
0x1fb3   :  { %v1127_v21 = vadd.f32 %v1929_v40, %v1125_v35 }
0x1fb5   :  { %v1264_v20 = vmul.f32 -1.442695, %v1127_v21 }
0x1fb7   :  { %1328 = vpow2.f32 %v1264_v20 }
0x1fbd   :  { %v1329_v19 = vpop.eup %1328 }
0x1fbe   :  { %v1132_v36 = vadd.f32 1.0, %v1329_v19 }
0x1fc0   :  { %1330 = vrcp.f32 %v1132_v36  ;;  %v1144_v7 = vand.u32 2147483648, %v1132_v36  ;;  %v1142_v44 = vand.u32 2147483647, %v1132_v36  ;;  %vm1138_vm2 = vweird.f32 %v1132_v36 }
0x1fc1   :  { %1332 = vtanh.f32 %v1127_v21 }
0x1fc2   :  { %v1145_v45 = vor.u32 1.1754944e-38, %v1144_v7  ;;  %vm1143_vm4 = vcmp.eq.f32.partialorder %v1142_v44, 8.507059e+37 }
0x1fc6   :  { %v1331_v18 = vpop.eup %1330 }
0x1fc7   :  { %v1134_v38 = vmul.f32 %v1331_v18, %v1132_v36  ;;  %vm1139_vm10 = vweird.f32 %v1331_v18  ;;  %v1333_v12 = vpop.eup %1332 }
0x1fc8   :  { %vm1140_vm3 = vmor %vm1138_vm2, %vm1139_vm10 }
0x1fc9   :  { %v1135_v6 = vsub.f32 1.0, %v1134_v38 }
0x1fcb   :  { %v1136_v8 = vmul.f32 %v1331_v18, %v1135_v6 }
0x1fcd   :  { %v1137_v10 = vadd.f32 %v1331_v18, %v1136_v8 }
0x1fcf   :  { %v1141_v11 = vsel %vm1140_vm3, %v1331_v18, %v1137_v10 }
0x1fd0   :  { %v1146_v37 = vsel %vm1143_vm4, %v1145_v45, %v1141_v11 }
0x1fd1   :  { %v1148_v13 = vsel %vm1653_vm6, %v1333_v12, %v1146_v37 }
0x1fd2   :  { %1151 = vrot.lane.b32.xlu2 %v1148_v13, %s1373_s13  ;;  %v1149_v15 = vmul.f32 %v1148_v13, %v1937_v56 }
0x202c   :  { %v1152_v39 = vpop.permute.xlu2 %1151 }
0x202d   :  { %v1154_v40 = vmul.f32 %v1152_v39, %v1148_v13 }
0x202f   :  { %1156 = vrot.lane.b32.xlu1 %v1154_v40, %s1374_s15 }
0x20a1   :  { %v1157_v41 = vpop.permute.xlu1 %1156 }
0x20a2   :  { %v1159_v29 = vadd.f32 %v1157_v41, %v1149_v15 }
0x20a4   :  { %1334 = vtanh.f32 %v1159_v29 }
0x20aa   :  { %v1335_v30 = vpop.eup %1334 }
0x20ab   :  { %1162 = vrot.lane.b32.xlu0 %v1335_v30, %s1373_s13  ;;  %s1376_s13 = smov 128  }
0x211d   :  { %v1163_v31 = vpop.permute.xlu0 %1162 }
0x211e   :  { %v1165_v32 = vmul.f32 %v1163_v31, %v1148_v13 }
0x2120   :  { %1167 = vrot.lane.b32.xlu2 %v1165_v32, %s1374_s15  ;;  %s1377_s15 = smov 8  }
0x217a   :  { %v1168_v60 = vpop.permute.xlu2 %1167 }
0x217b   :  { %1265 = vmatmul.msk.f32.vlgmr.msra.gmra.mxu3 %vm182_vm1, %v1168_v60 }
0x21fe   :  { %v1188_v16 = vpop.f32.mrf.mxu3 }
0x21ff   :  { %v1189_v42 = vadd.f32 %v1345_v17, %v1188_v16 }
0x2201   :  { %1191 = vst [vmem:[#allocation2 + $0xe] sm:$0x3] %v1189_v42 }
0x2202   :  { %1204 = dma.vmem_to_hbm [thread:$0]  %s1197_s10, 256, %s1199_s12, [#allocation3], %s1376_s13, %s1376_s13, %s1377_s15  }
0x2203   :  { %1370 = dma.done.wait [#allocation3], 256  }
0x2204   :  { %1371 = vsyncadd [#allocation3], 4294967040 }
0x2205   :  { %1209 = vsyncpa [#allocation3], 1 }

</bundles_post_ra>
